<compile_context>
chip_gen: v7x
topology: tpu7x:2x2x1
jax: 0.10.0
libtpu: 0.0.40
codegen_flags: <defaults>
</compile_context>

<pallas_src>
import functools

import jax
import jax.numpy as jnp
from jax import lax
from jax.experimental import pallas as pl
from jax.experimental.pallas import tpu as pltpu

LANE = 128
_MIN_GRID_STEPS = 4     # keep enough steps for megacore split + double-buffer overlap


def _round_up(x, m):
    return (x + m - 1) // m * m


def _vmem_budgets():
    """(vmem_limit_bytes, per-step tile budget) sized to the local TPU generation."""
    try:
        phys = int(pltpu.get_tpu_info().vmem_capacity_bytes)
    except Exception:                        # no TPU / interpret mode / older jax
        phys = 0
    if phys <= 0:
        phys = 64 * 1024 * 1024              # conservative: assume a 64 MiB part (v7x)
    limit = min(phys * 7 // 8, 112 * 1024 * 1024)   # headroom for Mosaic scratch
    budget = limit // 2                      # target working set per grid step
    return limit, budget


def _estimate_tile_vmem(th, w, cp, coutp, fuse_pool, itemsize):
    halo = th + 2
    buf_in = 2 * halo * w * cp * itemsize                      # center + halo blocks, 2-deep
    oh, ow = (th // 2, w // 2) if fuse_pool else (th, w)
    buf_out = 2 * oh * ow * coutp * itemsize                   # output block, 2-deep
    acc = th * w * coutp * 4                                   # f32 accumulator scratch
    tmp = 4 * halo * w * cp * itemsize + th * w * coutp * 4    # xt, x_l, x_r + slack
    return buf_in + buf_out + acc + tmp


def _choose_row_tile(n, h, w, cp, coutp, fuse_pool, itemsize, budget):
    cands = [t for t in range(h, 0, -1)
             if h % t == 0 and (not fuse_pool or t % 2 == 0)]
    fitting = [t for t in cands
               if _estimate_tile_vmem(t, w, cp, coutp, fuse_pool, itemsize) <= budget]
    if not fitting:
        raise ValueError(
            f"conv3x3 tile does not fit the VMEM budget ({budget} bytes) even at the "
            f"smallest row tile (H={h}, W={w}, Cp={cp}, Coutp={coutp}); "
            "W-tiling would be required for this configuration.")
    for t in fitting:                      # largest tile that still gives enough grid steps
        if n * (h // t) >= _MIN_GRID_STEPS:
            return t
    return fitting[0]                      # step floor unreachable: take the biggest tile


# ---------------------------------------------------------------------------
# Fused (pad + conv3x3 + LeakyReLU [+ 2x2 maxpool]) kernel
# ---------------------------------------------------------------------------
def _conv3x3_lrelu_kernel(x_c_ref, x_t_ref, x_b_ref, w_ref, o_ref, acc_ref, *,
                          negative_slope, fuse_pool):
    # x_c_ref: (1, TH, W, Cp)     center rows of the tile
    # x_t_ref: (1, 1,  W, Cp)     row above the tile (clamped; zeroed at boundary)
    # x_b_ref: (1, 1,  W, Cp)     row below the tile (clamped; zeroed at boundary)
    # w_ref:   (3, 3, Cp, Coutp)  resident in VMEM; w_ref[ky, kx] is one tap
    # o_ref:   (1, TH, W, Coutp) or (1, TH//2, W//2, Coutp) if fuse_pool
    # acc_ref: (TH*W, Coutp) f32 VMEM scratch
    th, w, cp = x_c_ref.shape[1], x_c_ref.shape[2], x_c_ref.shape[3]
    coutp = w_ref.shape[3]
    dt = x_c_ref.dtype

    r = pl.program_id(1)
    n_r = pl.num_programs(1)

    # In-kernel zero padding along H: zero the halo rows at the image boundary.
    top = x_t_ref[0] * jnp.where(r == 0, 0.0, 1.0).astype(dt)
    bot = x_b_ref[0] * jnp.where(r == n_r - 1, 0.0, 1.0).astype(dt)
    xt = jnp.concatenate([top, x_c_ref[0], bot], axis=0)            # (TH+2, W, Cp)

    # W-direction neighbour views with built-in zero padding: shift through an
    # explicit zero column (no roll, no masks, no integer modulo).
    zcol = jnp.zeros((th + 2, 1, cp), dt)
    x_l = jnp.concatenate([zcol, xt[:, :w - 1, :]], axis=1)         # value of x[.., c-1, ..]
    x_r = jnp.concatenate([xt[:, 1:, :], zcol], axis=1)             # value of x[.., c+1, ..]
    shifted = (x_l, xt, x_r)

    # Nine MXU dots with K = Cp accumulated into the f32 VMEM scratch.  Row slices
    # are along the leading (non-tiled) dim -> no sublane-offset relayouts.
    for ky in range(3):
        for kx in range(3):
            src = shifted[kx][ky:ky + th].reshape(th * w, cp)
            contrib = jnp.dot(src, w_ref[ky, kx],
                              preferred_element_type=jnp.float32)
            if ky == 0 and kx == 0:
                acc_ref[...] = contrib
            else:
                acc_ref[...] += contrib

    acc = acc_ref[...]
    acc = jnp.where(acc >= 0, acc, negative_slope * acc)            # LeakyReLU in f32
    y = acc.reshape(th, w, coutp)
    if fuse_pool:                                                   # fused MaxPool2d(2, 2)
        y = jnp.max(y.reshape(th // 2, 2, w, coutp), axis=1)
        y = jnp.max(y.reshape(th // 2, w // 2, 2, coutp), axis=2)
    o_ref[0] = y.astype(o_ref.dtype)


def conv3x3_leaky_relu(x, w4, *, negative_slope=0.1, fuse_pool=False, row_tile=None):
    """x: (N, H, W, Cp) with Cp % 128 == 0; w4: (3, 3, Cp, Coutp) with Coutp % 128 == 0."""
    n, h, w, cp = x.shape
    coutp = w4.shape[3]
    assert cp % LANE == 0 and coutp % LANE == 0 and w4.shape[:3] == (3, 3, cp)
    if fuse_pool:
        # TODO(synk): odd H/W with maxpool (PyTorch floor behavior) not handled.
        assert h % 2 == 0 and w % 2 == 0, "fused 2x2 maxpool needs even H, W"
    # TODO(synk): W not a multiple of the sublane packing (16 for bf16) still works but
    # pays relayout copies on the flat reshapes; add W padding/tiling for such shapes.

    vmem_limit, tile_budget = _vmem_budgets()
    weight_bytes = 9 * cp * coutp * w4.dtype.itemsize      # resident & single-buffered
    budget = max(tile_budget - weight_bytes, 4 * 1024 * 1024)
    th = row_tile or _choose_row_tile(n, h, w, cp, coutp, fuse_pool,
                                      x.dtype.itemsize, budget)
    assert h % th == 0 and (not fuse_pool or th % 2 == 0)

    if fuse_pool:
        out_shape = (n, h // 2, w // 2, coutp)
        out_block = (1, th // 2, w // 2, coutp)
    else:
        out_shape = (n, h, w, coutp)
        out_block = (1, th, w, coutp)

    kernel = functools.partial(_conv3x3_lrelu_kernel,
                               negative_slope=negative_slope, fuse_pool=fuse_pool)
    return pl.pallas_call(
        kernel,
        out_shape=jax.ShapeDtypeStruct(out_shape, x.dtype),
        grid_spec=pltpu.PrefetchScalarGridSpec(
            num_scalar_prefetch=0,
            grid=(n, h // th),
            in_specs=[
                # center rows of the tile
                pl.BlockSpec((1, th, w, cp), lambda ni, ri: (ni, ri, 0, 0)),
                # 1-row halo above (block size 1 along H -> block index == row index)
                pl.BlockSpec((1, 1, w, cp),
                             lambda ni, ri: (ni, jnp.maximum(ri * th - 1, 0), 0, 0)),
                # 1-row halo below
                pl.BlockSpec((1, 1, w, cp),
                             lambda ni, ri: (ni, jnp.minimum((ri + 1) * th, h - 1), 0, 0)),
                # weights: whole array resident in VMEM (single-buffered, fetched once)
                pl.BlockSpec(memory_space=pltpu.MemorySpace.VMEM),
            ],
            out_specs=pl.BlockSpec(out_block, lambda ni, ri: (ni, ri, 0, 0)),
            scratch_shapes=[pltpu.VMEM((th * w, coutp), jnp.float32)],
        ),
        compiler_params=pltpu.CompilerParams(
            dimension_semantics=("parallel", "parallel"),
            vmem_limit_bytes=vmem_limit),
    )(x, x, x, w4)


# ---------------------------------------------------------------------------
# VGGNetBlock: params + forward
# ---------------------------------------------------------------------------
def init_vggnet_block_params(key, in_channels, out_channels, n_convolution=1):
    """PyTorch Conv2d default init (kaiming_uniform a=sqrt(5)) ->
    U(-1/sqrt(fan_in), 1/sqrt(fan_in)); weights kept in PyTorch (Cout, Cin, 3, 3)."""
    params = []
    c_in = in_channels
    for _ in range(n_convolution):
        key, sub = jax.random.split(key)
        bound = 1.0 / float(c_in * 9) ** 0.5
        params.append(jax.random.uniform(sub, (out_channels, c_in, 3, 3),
                                         jnp.float32, -bound, bound))
        c_in = out_channels
    return params


def _prep_weight(w_oihw, cin_p, cout_p, dtype):
    cout, cin = w_oihw.shape[0], w_oihw.shape[1]
    wt = jnp.transpose(w_oihw, (2, 3, 1, 0))                    # (3, 3, Cin, Cout)
    wt = jnp.pad(wt, ((0, 0), (0, 0), (0, cin_p - cin), (0, cout_p - cout)))
    return wt.astype(dtype)                                     # (3, 3, Cp, Coutp)


def vggnet_block_forward(x_nchw, params, use_maxpool=True,
                         compute_dtype=jnp.bfloat16):
    """x_nchw: (N, C, H, W) f32 -> (N, K, h, w) f32, matching the PyTorch module."""
    # TODO(synk): only the module defaults (stride=1, LeakyReLU(0.1), no batch /
    # instance norm) are implemented.
    # TODO(synk): first-layer im2col (K = 9*Cin_real) and two-conv fusion from the
    # perf review are not implemented yet; the first layer pads Cin to 128 lanes.
    n, cin, h, w = x_nchw.shape
    cout = params[0].shape[0]
    cin_p = _round_up(cin, LANE)
    cout_p = _round_up(cout, LANE)

    # NCHW -> NHWC, channels zero-padded to a lane multiple; compute_dtype between layers.
    x = jnp.transpose(x_nchw, (0, 2, 3, 1)).astype(compute_dtype)
    x = jnp.pad(x, ((0, 0), (0, 0), (0, 0), (0, cin_p - cin)))

    for i, w_i in enumerate(params):
        is_last = i == len(params) - 1
        cpi = cin_p if i == 0 else cout_p
        assert x.shape[-1] == cpi
        w4 = _prep_weight(w_i, cpi, cout_p, compute_dtype)
        x = conv3x3_leaky_relu(x, w4, negative_slope=0.1,
                               fuse_pool=(use_maxpool and is_last))

    x = x[..., :cout].astype(x_nchw.dtype)                      # drop channel pad
    return jnp.transpose(x, (0, 3, 1, 2))                       # NHWC -> NCHW


# ---------------------------------------------------------------------------
# Pure-JAX reference (for tolerance validation)
# ---------------------------------------------------------------------------
def _reference_forward(x_nchw, params, use_maxpool=True):
    y = x_nchw
    for w_i in params:
        y = lax.conv_general_dilated(y, w_i, window_strides=(1, 1), padding="SAME",
                                     dimension_numbers=("NCHW", "OIHW", "NCHW"))
        y = jnp.where(y >= 0, y, 0.1 * y)
    if use_maxpool:
        y = lax.reduce_window(y, -jnp.inf, lax.max,
                              window_dimensions=(1, 1, 2, 2),
                              window_strides=(1, 1, 2, 2), padding="VALID")
    return y


if __name__ == "__main__":
    key = jax.random.PRNGKey(0)
    k_x, k_w = jax.random.split(key)

    N, Cin, H, W = 2, 4, 16, 16
    Cout, n_convolution = 8, 2

    x = jax.random.normal(k_x, (N, Cin, H, W), jnp.float32)
    params = init_vggnet_block_params(k_w, Cin, Cout, n_convolution)

    fwd = jax.jit(functools.partial(vggnet_block_forward, use_maxpool=True))
    out = jax.block_until_ready(fwd(x, params))
    assert out.shape == (N, Cout, H // 2, W // 2), out.shape
    assert out.dtype == jnp.float32

    ref = jax.block_until_ready(_reference_forward(x, params, use_maxpool=True))

    # Default bf16 activations/weights between layers -> loose tolerance.
    err_bf16 = float(jnp.max(jnp.abs(out - ref)))
    assert err_bf16 < 1e-1, f"bf16 path max abs err {err_bf16}"

    # Full-f32 compute path -> tight tolerance.
    out_f32 = jax.block_until_ready(
        vggnet_block_forward(x, params, use_maxpool=True, compute_dtype=jnp.float32))
    err_f32 = float(jnp.max(jnp.abs(out_f32 - ref)))
    assert err_f32 < 2e-2, f"f32 path max abs err {err_f32}"

    print("KERNEL_OK")
</pallas_src>

<mosaic_0001>
module attributes {stable_mosaic.version = 11 : i64} {
  func.func @_conv3x3_lrelu_kernel(%arg0: i32, %arg1: i32, %arg2: memref<1x8x16x128xbf16, #tpu.memory_space<vmem>>, %arg3: memref<1x1x16x128xbf16, #tpu.memory_space<vmem>>, %arg4: memref<1x1x16x128xbf16, #tpu.memory_space<vmem>>, %arg5: memref<3x3x128x128xbf16, #tpu.memory_space<vmem>>, %arg6: memref<1x8x16x128xbf16, #tpu.memory_space<vmem>>, %arg7: memref<128x128xf32, #tpu.memory_space<vmem>>) attributes {dimension_semantics = [#tpu.dimension_semantics<parallel>, #tpu.dimension_semantics<parallel>], iteration_bounds = array<i64: 2, 2>, scalar_prefetch = 0 : i64, scratch_operands = 1 : i64, tpu.core_type = #tpu.core_type<tc>, window_params = [{transform_indices = @transform_0, window_bounds = array<i64: 1, 8, 16, 128>}, {transform_indices = @transform_1, window_bounds = array<i64: 1, 1, 16, 128>}, {transform_indices = @transform_2, window_bounds = array<i64: 1, 1, 16, 128>}, {pipeline_mode = #tpu.pipeline_mode<synchronous>, transform_indices = @transform_3, window_bounds = array<i64: 3, 3, 128, 128>}, {transform_indices = @transform_4, window_bounds = array<i64: 1, 8, 16, 128>}]} {
    %c0 = arith.constant 0 : index
    %c0_0 = arith.constant 0 : index
    %c0_1 = arith.constant 0 : index
    %c0_2 = arith.constant 0 : index
    %0 = vector.load %arg3[%c0, %c0_0, %c0_1, %c0_2] : memref<1x1x16x128xbf16, #tpu.memory_space<vmem>>, vector<1x1x16x128xbf16>
    %1 = vector.shape_cast %0 : vector<1x1x16x128xbf16> to vector<1x16x128xbf16>
    %c0_i32 = arith.constant 0 : i32
    %2 = arith.cmpi eq, %arg1, %c0_i32 : i32
    %cst = arith.constant 0.000000e+00 : f32
    %cst_3 = arith.constant 1.000000e+00 : f32
    %3 = arith.select %2, %cst, %cst_3 : f32
    %4 = arith.truncf %3 : f32 to bf16
    %5 = vector.broadcast %4 : bf16 to vector<1x16x128xbf16>
    %6 = arith.mulf %1, %5 : vector<1x16x128xbf16>
    %c0_4 = arith.constant 0 : index
    %c0_5 = arith.constant 0 : index
    %c0_6 = arith.constant 0 : index
    %c0_7 = arith.constant 0 : index
    %7 = vector.load %arg4[%c0_4, %c0_5, %c0_6, %c0_7] : memref<1x1x16x128xbf16, #tpu.memory_space<vmem>>, vector<1x1x16x128xbf16>
    %8 = vector.shape_cast %7 : vector<1x1x16x128xbf16> to vector<1x16x128xbf16>
    %c1_i32 = arith.constant 1 : i32
    %9 = arith.cmpi eq, %arg1, %c1_i32 : i32
    %cst_8 = arith.constant 0.000000e+00 : f32
    %cst_9 = arith.constant 1.000000e+00 : f32
    %10 = arith.select %9, %cst_8, %cst_9 : f32
    %11 = arith.truncf %10 : f32 to bf16
    %12 = vector.broadcast %11 : bf16 to vector<1x16x128xbf16>
    %13 = arith.mulf %8, %12 : vector<1x16x128xbf16>
    %c0_10 = arith.constant 0 : index
    %c0_11 = arith.constant 0 : index
    %c0_12 = arith.constant 0 : index
    %c0_13 = arith.constant 0 : index
    %14 = vector.load %arg2[%c0_10, %c0_11, %c0_12, %c0_13] : memref<1x8x16x128xbf16, #tpu.memory_space<vmem>>, vector<1x8x16x128xbf16>
    %15 = vector.shape_cast %14 : vector<1x8x16x128xbf16> to vector<8x16x128xbf16>
    %16 = tpu.concatenate %6, %15, %13 in 0 : vector<1x16x128xbf16>, vector<8x16x128xbf16>, vector<1x16x128xbf16> -> vector<10x16x128xbf16>
    %cst_14 = arith.constant 0.000000e+00 : bf16
    %17 = vector.broadcast %cst_14 : bf16 to vector<10x1x128xbf16>
    %18 = vector.extract_strided_slice %16 {offsets = [0, 0, 0], sizes = [10, 15, 128], strides = [1, 1, 1]} : vector<10x16x128xbf16> to vector<10x15x128xbf16>
    %19 = tpu.concatenate %17, %18 in 1 : vector<10x1x128xbf16>, vector<10x15x128xbf16> -> vector<10x16x128xbf16>
    %20 = vector.extract_strided_slice %16 {offsets = [0, 1, 0], sizes = [10, 15, 128], strides = [1, 1, 1]} : vector<10x16x128xbf16> to vector<10x15x128xbf16>
    %21 = tpu.concatenate %20, %17 in 1 : vector<10x15x128xbf16>, vector<10x1x128xbf16> -> vector<10x16x128xbf16>
    %22 = vector.extract_strided_slice %19 {offsets = [0, 0, 0], sizes = [8, 16, 128], strides = [1, 1, 1]} : vector<10x16x128xbf16> to vector<8x16x128xbf16>
    %23 = vector.shape_cast %22 : vector<8x16x128xbf16> to vector<128x128xbf16>
    %c0_15 = arith.constant 0 : index
    %c0_16 = arith.constant 0 : index
    %c0_17 = arith.constant 0 : index
    %c0_18 = arith.constant 0 : index
    %24 = vector.load %arg5[%c0_15, %c0_16, %c0_17, %c0_18] : memref<3x3x128x128xbf16, #tpu.memory_space<vmem>>, vector<1x1x128x128xbf16>
    %25 = vector.shape_cast %24 : vector<1x1x128x128xbf16> to vector<128x128xbf16>
    %cst_19 = arith.constant dense<0.000000e+00> : vector<128x128xf32>
    %26 = tpu.matmul %23, %25, %cst_19 {dimension_numbers = #tpu.dot_dimension_numbers<[1], [0], [0], [1], [0, 0, 1, 1], [], []>} : vector<128x128xbf16>, vector<128x128xbf16>, vector<128x128xf32> -> vector<128x128xf32>
    %c0_20 = arith.constant 0 : index
    %c0_21 = arith.constant 0 : index
    %27 = vector.load %arg7[%c0_20, %c0_21] : memref<128x128xf32, #tpu.memory_space<vmem>>, vector<128x128xf32>
    tpu.vector_store %arg7[%c0_20, %c0_21], %26 {strides = array<i32>} : memref<128x128xf32, #tpu.memory_space<vmem>>, vector<128x128xf32>,
    %28 = vector.extract_strided_slice %16 {offsets = [0, 0, 0], sizes = [8, 16, 128], strides = [1, 1, 1]} : vector<10x16x128xbf16> to vector<8x16x128xbf16>
    %29 = vector.shape_cast %28 : vector<8x16x128xbf16> to vector<128x128xbf16>
    %c0_22 = arith.constant 0 : index
    %c1 = arith.constant 1 : index
    %c0_23 = arith.constant 0 : index
    %c0_24 = arith.constant 0 : index
    %30 = vector.load %arg5[%c0_22, %c1, %c0_23, %c0_24] : memref<3x3x128x128xbf16, #tpu.memory_space<vmem>>, vector<1x1x128x128xbf16>
    %31 = vector.shape_cast %30 : vector<1x1x128x128xbf16> to vector<128x128xbf16>
    %cst_25 = arith.constant dense<0.000000e+00> : vector<128x128xf32>
    %32 = tpu.matmul %29, %31, %cst_25 {dimension_numbers = #tpu.dot_dimension_numbers<[1], [0], [0], [1], [0, 0, 1, 1], [], []>} : vector<128x128xbf16>, vector<128x128xbf16>, vector<128x128xf32> -> vector<128x128xf32>
    %c0_26 = arith.constant 0 : index
    %c0_27 = arith.constant 0 : index
    %33 = vector.load %arg7[%c0_26, %c0_27] : memref<128x128xf32, #tpu.memory_space<vmem>>, vector<128x128xf32>
    %34 = arith.addf %33, %32 : vector<128x128xf32>
    %c0_28 = arith.constant 0 : index
    %c0_29 = arith.constant 0 : index
    %35 = vector.load %arg7[%c0_28, %c0_29] : memref<128x128xf32, #tpu.memory_space<vmem>>, vector<128x128xf32>
    tpu.vector_store %arg7[%c0_28, %c0_29], %34 {strides = array<i32>} : memref<128x128xf32, #tpu.memory_space<vmem>>, vector<128x128xf32>,
    %36 = vector.extract_strided_slice %21 {offsets = [0, 0, 0], sizes = [8, 16, 128], strides = [1, 1, 1]} : vector<10x16x128xbf16> to vector<8x16x128xbf16>
    %37 = vector.shape_cast %36 : vector<8x16x128xbf16> to vector<128x128xbf16>
    %c0_30 = arith.constant 0 : index
    %c2 = arith.constant 2 : index
    %c0_31 = arith.constant 0 : index
    %c0_32 = arith.constant 0 : index
    %38 = vector.load %arg5[%c0_30, %c2, %c0_31, %c0_32] : memref<3x3x128x128xbf16, #tpu.memory_space<vmem>>, vector<1x1x128x128xbf16>
    %39 = vector.shape_cast %38 : vector<1x1x128x128xbf16> to vector<128x128xbf16>
    %cst_33 = arith.constant dense<0.000000e+00> : vector<128x128xf32>
    %40 = tpu.matmul %37, %39, %cst_33 {dimension_numbers = #tpu.dot_dimension_numbers<[1], [0], [0], [1], [0, 0, 1, 1], [], []>} : vector<128x128xbf16>, vector<128x128xbf16>, vector<128x128xf32> -> vector<128x128xf32>
    %c0_34 = arith.constant 0 : index
    %c0_35 = arith.constant 0 : index
    %41 = vector.load %arg7[%c0_34, %c0_35] : memref<128x128xf32, #tpu.memory_space<vmem>>, vector<128x128xf32>
    %42 = arith.addf %41, %40 : vector<128x128xf32>
    %c0_36 = arith.constant 0 : index
    %c0_37 = arith.constant 0 : index
    %43 = vector.load %arg7[%c0_36, %c0_37] : memref<128x128xf32, #tpu.memory_space<vmem>>, vector<128x128xf32>
    tpu.vector_store %arg7[%c0_36, %c0_37], %42 {strides = array<i32>} : memref<128x128xf32, #tpu.memory_space<vmem>>, vector<128x128xf32>,
    %44 = vector.extract_strided_slice %19 {offsets = [1, 0, 0], sizes = [8, 16, 128], strides = [1, 1, 1]} : vector<10x16x128xbf16> to vector<8x16x128xbf16>
    %45 = vector.shape_cast %44 : vector<8x16x128xbf16> to vector<128x128xbf16>
    %c1_38 = arith.constant 1 : index
    %c0_39 = arith.constant 0 : index
    %c0_40 = arith.constant 0 : index
    %c0_41 = arith.constant 0 : index
    %46 = vector.load %arg5[%c1_38, %c0_39, %c0_40, %c0_41] : memref<3x3x128x128xbf16, #tpu.memory_space<vmem>>, vector<1x1x128x128xbf16>
    %47 = vector.shape_cast %46 : vector<1x1x128x128xbf16> to vector<128x128xbf16>
    %cst_42 = arith.constant dense<0.000000e+00> : vector<128x128xf32>
    %48 = tpu.matmul %45, %47, %cst_42 {dimension_numbers = #tpu.dot_dimension_numbers<[1], [0], [0], [1], [0, 0, 1, 1], [], []>} : vector<128x128xbf16>, vector<128x128xbf16>, vector<128x128xf32> -> vector<128x128xf32>
    %c0_43 = arith.constant 0 : index
    %c0_44 = arith.constant 0 : index
    %49 = vector.load %arg7[%c0_43, %c0_44] : memref<128x128xf32, #tpu.memory_space<vmem>>, vector<128x128xf32>
    %50 = arith.addf %49, %48 : vector<128x128xf32>
    %c0_45 = arith.constant 0 : index
    %c0_46 = arith.constant 0 : index
    %51 = vector.load %arg7[%c0_45, %c0_46] : memref<128x128xf32, #tpu.memory_space<vmem>>, vector<128x128xf32>
    tpu.vector_store %arg7[%c0_45, %c0_46], %50 {strides = array<i32>} : memref<128x128xf32, #tpu.memory_space<vmem>>, vector<128x128xf32>,
    %52 = vector.extract_strided_slice %16 {offsets = [1, 0, 0], sizes = [8, 16, 128], strides = [1, 1, 1]} : vector<10x16x128xbf16> to vector<8x16x128xbf16>
    %53 = vector.shape_cast %52 : vector<8x16x128xbf16> to vector<128x128xbf16>
    %c1_47 = arith.constant 1 : index
    %c1_48 = arith.constant 1 : index
    %c0_49 = arith.constant 0 : index
    %c0_50 = arith.constant 0 : index
    %54 = vector.load %arg5[%c1_47, %c1_48, %c0_49, %c0_50] : memref<3x3x128x128xbf16, #tpu.memory_space<vmem>>, vector<1x1x128x128xbf16>
    %55 = vector.shape_cast %54 : vector<1x1x128x128xbf16> to vector<128x128xbf16>
    %cst_51 = arith.constant dense<0.000000e+00> : vector<128x128xf32>
    %56 = tpu.matmul %53, %55, %cst_51 {dimension_numbers = #tpu.dot_dimension_numbers<[1], [0], [0], [1], [0, 0, 1, 1], [], []>} : vector<128x128xbf16>, vector<128x128xbf16>, vector<128x128xf32> -> vector<128x128xf32>
    %c0_52 = arith.constant 0 : index
    %c0_53 = arith.constant 0 : index
    %57 = vector.load %arg7[%c0_52, %c0_53] : memref<128x128xf32, #tpu.memory_space<vmem>>, vector<128x128xf32>
    %58 = arith.addf %57, %56 : vector<128x128xf32>
    %c0_54 = arith.constant 0 : index
    %c0_55 = arith.constant 0 : index
    %59 = vector.load %arg7[%c0_54, %c0_55] : memref<128x128xf32, #tpu.memory_space<vmem>>, vector<128x128xf32>
    tpu.vector_store %arg7[%c0_54, %c0_55], %58 {strides = array<i32>} : memref<128x128xf32, #tpu.memory_space<vmem>>, vector<128x128xf32>,
    %60 = vector.extract_strided_slice %21 {offsets = [1, 0, 0], sizes = [8, 16, 128], strides = [1, 1, 1]} : vector<10x16x128xbf16> to vector<8x16x128xbf16>
    %61 = vector.shape_cast %60 : vector<8x16x128xbf16> to vector<128x128xbf16>
    %c1_56 = arith.constant 1 : index
    %c2_57 = arith.constant 2 : index
    %c0_58 = arith.constant 0 : index
    %c0_59 = arith.constant 0 : index
    %62 = vector.load %arg5[%c1_56, %c2_57, %c0_58, %c0_59] : memref<3x3x128x128xbf16, #tpu.memory_space<vmem>>, vector<1x1x128x128xbf16>
    %63 = vector.shape_cast %62 : vector<1x1x128x128xbf16> to vector<128x128xbf16>
    %cst_60 = arith.constant dense<0.000000e+00> : vector<128x128xf32>
    %64 = tpu.matmul %61, %63, %cst_60 {dimension_numbers = #tpu.dot_dimension_numbers<[1], [0], [0], [1], [0, 0, 1, 1], [], []>} : vector<128x128xbf16>, vector<128x128xbf16>, vector<128x128xf32> -> vector<128x128xf32>
    %c0_61 = arith.constant 0 : index
    %c0_62 = arith.constant 0 : index
    %65 = vector.load %arg7[%c0_61, %c0_62] : memref<128x128xf32, #tpu.memory_space<vmem>>, vector<128x128xf32>
    %66 = arith.addf %65, %64 : vector<128x128xf32>
    %c0_63 = arith.constant 0 : index
    %c0_64 = arith.constant 0 : index
    %67 = vector.load %arg7[%c0_63, %c0_64] : memref<128x128xf32, #tpu.memory_space<vmem>>, vector<128x128xf32>
    tpu.vector_store %arg7[%c0_63, %c0_64], %66 {strides = array<i32>} : memref<128x128xf32, #tpu.memory_space<vmem>>, vector<128x128xf32>,
    %68 = vector.extract_strided_slice %19 {offsets = [2, 0, 0], sizes = [8, 16, 128], strides = [1, 1, 1]} : vector<10x16x128xbf16> to vector<8x16x128xbf16>
    %69 = vector.shape_cast %68 : vector<8x16x128xbf16> to vector<128x128xbf16>
    %c2_65 = arith.constant 2 : index
    %c0_66 = arith.constant 0 : index
    %c0_67 = arith.constant 0 : index
    %c0_68 = arith.constant 0 : index
    %70 = vector.load %arg5[%c2_65, %c0_66, %c0_67, %c0_68] : memref<3x3x128x128xbf16, #tpu.memory_space<vmem>>, vector<1x1x128x128xbf16>
    %71 = vector.shape_cast %70 : vector<1x1x128x128xbf16> to vector<128x128xbf16>
    %cst_69 = arith.constant dense<0.000000e+00> : vector<128x128xf32>
    %72 = tpu.matmul %69, %71, %cst_69 {dimension_numbers = #tpu.dot_dimension_numbers<[1], [0], [0], [1], [0, 0, 1, 1], [], []>} : vector<128x128xbf16>, vector<128x128xbf16>, vector<128x128xf32> -> vector<128x128xf32>
    %c0_70 = arith.constant 0 : index
    %c0_71 = arith.constant 0 : index
    %73 = vector.load %arg7[%c0_70, %c0_71] : memref<128x128xf32, #tpu.memory_space<vmem>>, vector<128x128xf32>
    %74 = arith.addf %73, %72 : vector<128x128xf32>
    %c0_72 = arith.constant 0 : index
    %c0_73 = arith.constant 0 : index
    %75 = vector.load %arg7[%c0_72, %c0_73] : memref<128x128xf32, #tpu.memory_space<vmem>>, vector<128x128xf32>
    tpu.vector_store %arg7[%c0_72, %c0_73], %74 {strides = array<i32>} : memref<128x128xf32, #tpu.memory_space<vmem>>, vector<128x128xf32>,
    %76 = vector.extract_strided_slice %16 {offsets = [2, 0, 0], sizes = [8, 16, 128], strides = [1, 1, 1]} : vector<10x16x128xbf16> to vector<8x16x128xbf16>
    %77 = vector.shape_cast %76 : vector<8x16x128xbf16> to vector<128x128xbf16>
    %c2_74 = arith.constant 2 : index
    %c1_75 = arith.constant 1 : index
    %c0_76 = arith.constant 0 : index
    %c0_77 = arith.constant 0 : index
    %78 = vector.load %arg5[%c2_74, %c1_75, %c0_76, %c0_77] : memref<3x3x128x128xbf16, #tpu.memory_space<vmem>>, vector<1x1x128x128xbf16>
    %79 = vector.shape_cast %78 : vector<1x1x128x128xbf16> to vector<128x128xbf16>
    %cst_78 = arith.constant dense<0.000000e+00> : vector<128x128xf32>
    %80 = tpu.matmul %77, %79, %cst_78 {dimension_numbers = #tpu.dot_dimension_numbers<[1], [0], [0], [1], [0, 0, 1, 1], [], []>} : vector<128x128xbf16>, vector<128x128xbf16>, vector<128x128xf32> -> vector<128x128xf32>
    %c0_79 = arith.constant 0 : index
    %c0_80 = arith.constant 0 : index
    %81 = vector.load %arg7[%c0_79, %c0_80] : memref<128x128xf32, #tpu.memory_space<vmem>>, vector<128x128xf32>
    %82 = arith.addf %81, %80 : vector<128x128xf32>
    %c0_81 = arith.constant 0 : index
    %c0_82 = arith.constant 0 : index
    %83 = vector.load %arg7[%c0_81, %c0_82] : memref<128x128xf32, #tpu.memory_space<vmem>>, vector<128x128xf32>
    tpu.vector_store %arg7[%c0_81, %c0_82], %82 {strides = array<i32>} : memref<128x128xf32, #tpu.memory_space<vmem>>, vector<128x128xf32>,
    %84 = vector.extract_strided_slice %21 {offsets = [2, 0, 0], sizes = [8, 16, 128], strides = [1, 1, 1]} : vector<10x16x128xbf16> to vector<8x16x128xbf16>
    %85 = vector.shape_cast %84 : vector<8x16x128xbf16> to vector<128x128xbf16>
    %c2_83 = arith.constant 2 : index
    %c2_84 = arith.constant 2 : index
    %c0_85 = arith.constant 0 : index
    %c0_86 = arith.constant 0 : index
    %86 = vector.load %arg5[%c2_83, %c2_84, %c0_85, %c0_86] : memref<3x3x128x128xbf16, #tpu.memory_space<vmem>>, vector<1x1x128x128xbf16>
    %87 = vector.shape_cast %86 : vector<1x1x128x128xbf16> to vector<128x128xbf16>
    %cst_87 = arith.constant dense<0.000000e+00> : vector<128x128xf32>
    %88 = tpu.matmul %85, %87, %cst_87 {dimension_numbers = #tpu.dot_dimension_numbers<[1], [0], [0], [1], [0, 0, 1, 1], [], []>} : vector<128x128xbf16>, vector<128x128xbf16>, vector<128x128xf32> -> vector<128x128xf32>
    %c0_88 = arith.constant 0 : index
    %c0_89 = arith.constant 0 : index
    %89 = vector.load %arg7[%c0_88, %c0_89] : memref<128x128xf32, #tpu.memory_space<vmem>>, vector<128x128xf32>
    %90 = arith.addf %89, %88 : vector<128x128xf32>
    %c0_90 = arith.constant 0 : index
    %c0_91 = arith.constant 0 : index
    %91 = vector.load %arg7[%c0_90, %c0_91] : memref<128x128xf32, #tpu.memory_space<vmem>>, vector<128x128xf32>
    tpu.vector_store %arg7[%c0_90, %c0_91], %90 {strides = array<i32>} : memref<128x128xf32, #tpu.memory_space<vmem>>, vector<128x128xf32>,
    %c0_92 = arith.constant 0 : index
    %c0_93 = arith.constant 0 : index
    %92 = vector.load %arg7[%c0_92, %c0_93] : memref<128x128xf32, #tpu.memory_space<vmem>>, vector<128x128xf32>
    %cst_94 = arith.constant 0.000000e+00 : f32
    %93 = vector.broadcast %cst_94 : f32 to vector<128x128xf32>
    %94 = arith.cmpf oge, %92, %93 : vector<128x128xf32>
    %cst_95 = arith.constant 1.000000e-01 : f32
    %95 = vector.broadcast %cst_95 : f32 to vector<128x128xf32>
    %96 = arith.mulf %95, %92 : vector<128x128xf32>
    %97 = arith.select %94, %92, %96 : vector<128x128xi1>, vector<128x128xf32>
    %98 = vector.shape_cast %97 : vector<128x128xf32> to vector<8x16x128xf32>
    %99 = arith.truncf %98 : vector<8x16x128xf32> to vector<8x16x128xbf16>
    %c0_96 = arith.constant 0 : index
    %c0_97 = arith.constant 0 : index
    %c0_98 = arith.constant 0 : index
    %c0_99 = arith.constant 0 : index
    %100 = vector.load %arg6[%c0_96, %c0_97, %c0_98, %c0_99] : memref<1x8x16x128xbf16, #tpu.memory_space<vmem>>, vector<1x8x16x128xbf16>
    %101 = vector.shape_cast %100 : vector<1x8x16x128xbf16> to vector<8x16x128xbf16>
    %102 = vector.shape_cast %99 : vector<8x16x128xbf16> to vector<1x8x16x128xbf16>
    tpu.vector_store %arg6[%c0_96, %c0_97, %c0_98, %c0_99], %102 {strides = array<i32>} : memref<1x8x16x128xbf16, #tpu.memory_space<vmem>>, vector<1x8x16x128xbf16>,
    return
  }
  func.func @transform_0(%arg0: i32, %arg1: i32) -> (i32, i32, i32, i32) {
    %c0_i32 = arith.constant 0 : i32
    %c0_i32_0 = arith.constant 0 : i32
    %c0_i32_1 = arith.constant 0 : i32
    return %arg0, %arg1, %c0_i32, %c0_i32_0 : i32, i32, i32, i32
  }
  func.func @transform_1(%arg0: i32, %arg1: i32) -> (i32, i32, i32, i32) {
    %c8_i32 = arith.constant 8 : i32
    %0 = arith.muli %arg1, %c8_i32 : i32
    %c1_i32 = arith.constant 1 : i32
    %1 = arith.subi %0, %c1_i32 : i32
    %c0_i32 = arith.constant 0 : i32
    %2 = arith.maxsi %1, %c0_i32 : i32
    %c0_i32_0 = arith.constant 0 : i32
    %c0_i32_1 = arith.constant 0 : i32
    %c0_i32_2 = arith.constant 0 : i32
    return %arg0, %2, %c0_i32_0, %c0_i32_1 : i32, i32, i32, i32
  }
  func.func @transform_2(%arg0: i32, %arg1: i32) -> (i32, i32, i32, i32) {
    %c1_i32 = arith.constant 1 : i32
    %0 = arith.addi %arg1, %c1_i32 : i32
    %c8_i32 = arith.constant 8 : i32
    %1 = arith.muli %0, %c8_i32 : i32
    %c15_i32 = arith.constant 15 : i32
    %2 = arith.minsi %1, %c15_i32 : i32
    %c0_i32 = arith.constant 0 : i32
    %c0_i32_0 = arith.constant 0 : i32
    %c0_i32_1 = arith.constant 0 : i32
    return %arg0, %2, %c0_i32, %c0_i32_0 : i32, i32, i32, i32
  }
  func.func @transform_3(%arg0: i32, %arg1: i32) -> (i32, i32, i32, i32) {
    %c0_i32 = arith.constant 0 : i32
    %c0_i32_0 = arith.constant 0 : i32
    %c0_i32_1 = arith.constant 0 : i32
    %c0_i32_2 = arith.constant 0 : i32
    %c0_i32_3 = arith.constant 0 : i32
    return %c0_i32, %c0_i32_0, %c0_i32_1, %c0_i32_2 : i32, i32, i32, i32
  }
  func.func @transform_4(%arg0: i32, %arg1: i32) -> (i32, i32, i32, i32) {
    %c0_i32 = arith.constant 0 : i32
    %c0_i32_0 = arith.constant 0 : i32
    %c0_i32_1 = arith.constant 0 : i32
    return %arg0, %arg1, %c0_i32, %c0_i32_0 : i32, i32, i32, i32
  }
}

module attributes {stable_mosaic.version = 11 : i64} {
  func.func @_conv3x3_lrelu_kernel(%arg0: i32, %arg1: i32, %arg2: memref<1x8x16x128xbf16, #tpu.memory_space<vmem>>, %arg3: memref<1x1x16x128xbf16, #tpu.memory_space<vmem>>, %arg4: memref<1x1x16x128xbf16, #tpu.memory_space<vmem>>, %arg5: memref<3x3x128x128xbf16, #tpu.memory_space<vmem>>, %arg6: memref<1x4x8x128xbf16, #tpu.memory_space<vmem>>, %arg7: memref<128x128xf32, #tpu.memory_space<vmem>>) attributes {dimension_semantics = [#tpu.dimension_semantics<parallel>, #tpu.dimension_semantics<parallel>], iteration_bounds = array<i64: 2, 2>, scalar_prefetch = 0 : i64, scratch_operands = 1 : i64, tpu.core_type = #tpu.core_type<tc>, window_params = [{transform_indices = @transform_0, window_bounds = array<i64: 1, 8, 16, 128>}, {transform_indices = @transform_1, window_bounds = array<i64: 1, 1, 16, 128>}, {transform_indices = @transform_2, window_bounds = array<i64: 1, 1, 16, 128>}, {pipeline_mode = #tpu.pipeline_mode<synchronous>, transform_indices = @transform_3, window_bounds = array<i64: 3, 3, 128, 128>}, {transform_indices = @transform_4, window_bounds = array<i64: 1, 4, 8, 128>}]} {
    %c0 = arith.constant 0 : index
    %c0_0 = arith.constant 0 : index
    %c0_1 = arith.constant 0 : index
    %c0_2 = arith.constant 0 : index
    %0 = vector.load %arg3[%c0, %c0_0, %c0_1, %c0_2] : memref<1x1x16x128xbf16, #tpu.memory_space<vmem>>, vector<1x1x16x128xbf16>
    %1 = vector.shape_cast %0 : vector<1x1x16x128xbf16> to vector<1x16x128xbf16>
    %c0_i32 = arith.constant 0 : i32
    %2 = arith.cmpi eq, %arg1, %c0_i32 : i32
    %cst = arith.constant 0.000000e+00 : f32
    %cst_3 = arith.constant 1.000000e+00 : f32
    %3 = arith.select %2, %cst, %cst_3 : f32
    %4 = arith.truncf %3 : f32 to bf16
    %5 = vector.broadcast %4 : bf16 to vector<1x16x128xbf16>
    %6 = arith.mulf %1, %5 : vector<1x16x128xbf16>
    %c0_4 = arith.constant 0 : index
    %c0_5 = arith.constant 0 : index
    %c0_6 = arith.constant 0 : index
    %c0_7 = arith.constant 0 : index
    %7 = vector.load %arg4[%c0_4, %c0_5, %c0_6, %c0_7] : memref<1x1x16x128xbf16, #tpu.memory_space<vmem>>, vector<1x1x16x128xbf16>
    %8 = vector.shape_cast %7 : vector<1x1x16x128xbf16> to vector<1x16x128xbf16>
    %c1_i32 = arith.constant 1 : i32
    %9 = arith.cmpi eq, %arg1, %c1_i32 : i32
    %cst_8 = arith.constant 0.000000e+00 : f32
    %cst_9 = arith.constant 1.000000e+00 : f32
    %10 = arith.select %9, %cst_8, %cst_9 : f32
    %11 = arith.truncf %10 : f32 to bf16
    %12 = vector.broadcast %11 : bf16 to vector<1x16x128xbf16>
    %13 = arith.mulf %8, %12 : vector<1x16x128xbf16>
    %c0_10 = arith.constant 0 : index
    %c0_11 = arith.constant 0 : index
    %c0_12 = arith.constant 0 : index
    %c0_13 = arith.constant 0 : index
    %14 = vector.load %arg2[%c0_10, %c0_11, %c0_12, %c0_13] : memref<1x8x16x128xbf16, #tpu.memory_space<vmem>>, vector<1x8x16x128xbf16>
    %15 = vector.shape_cast %14 : vector<1x8x16x128xbf16> to vector<8x16x128xbf16>
    %16 = tpu.concatenate %6, %15, %13 in 0 : vector<1x16x128xbf16>, vector<8x16x128xbf16>, vector<1x16x128xbf16> -> vector<10x16x128xbf16>
    %cst_14 = arith.constant 0.000000e+00 : bf16
    %17 = vector.broadcast %cst_14 : bf16 to vector<10x1x128xbf16>
    %18 = vector.extract_strided_slice %16 {offsets = [0, 0, 0], sizes = [10, 15, 128], strides = [1, 1, 1]} : vector<10x16x128xbf16> to vector<10x15x128xbf16>
    %19 = tpu.concatenate %17, %18 in 1 : vector<10x1x128xbf16>, vector<10x15x128xbf16> -> vector<10x16x128xbf16>
    %20 = vector.extract_strided_slice %16 {offsets = [0, 1, 0], sizes = [10, 15, 128], strides = [1, 1, 1]} : vector<10x16x128xbf16> to vector<10x15x128xbf16>
    %21 = tpu.concatenate %20, %17 in 1 : vector<10x15x128xbf16>, vector<10x1x128xbf16> -> vector<10x16x128xbf16>
    %22 = vector.extract_strided_slice %19 {offsets = [0, 0, 0], sizes = [8, 16, 128], strides = [1, 1, 1]} : vector<10x16x128xbf16> to vector<8x16x128xbf16>
    %23 = vector.shape_cast %22 : vector<8x16x128xbf16> to vector<128x128xbf16>
    %c0_15 = arith.constant 0 : index
    %c0_16 = arith.constant 0 : index
    %c0_17 = arith.constant 0 : index
    %c0_18 = arith.constant 0 : index
    %24 = vector.load %arg5[%c0_15, %c0_16, %c0_17, %c0_18] : memref<3x3x128x128xbf16, #tpu.memory_space<vmem>>, vector<1x1x128x128xbf16>
    %25 = vector.shape_cast %24 : vector<1x1x128x128xbf16> to vector<128x128xbf16>
    %cst_19 = arith.constant dense<0.000000e+00> : vector<128x128xf32>
    %26 = tpu.matmul %23, %25, %cst_19 {dimension_numbers = #tpu.dot_dimension_numbers<[1], [0], [0], [1], [0, 0, 1, 1], [], []>} : vector<128x128xbf16>, vector<128x128xbf16>, vector<128x128xf32> -> vector<128x128xf32>
    %c0_20 = arith.constant 0 : index
    %c0_21 = arith.constant 0 : index
    %27 = vector.load %arg7[%c0_20, %c0_21] : memref<128x128xf32, #tpu.memory_space<vmem>>, vector<128x128xf32>
    tpu.vector_store %arg7[%c0_20, %c0_21], %26 {strides = array<i32>} : memref<128x128xf32, #tpu.memory_space<vmem>>, vector<128x128xf32>,
    %28 = vector.extract_strided_slice %16 {offsets = [0, 0, 0], sizes = [8, 16, 128], strides = [1, 1, 1]} : vector<10x16x128xbf16> to vector<8x16x128xbf16>
    %29 = vector.shape_cast %28 : vector<8x16x128xbf16> to vector<128x128xbf16>
    %c0_22 = arith.constant 0 : index
    %c1 = arith.constant 1 : index
    %c0_23 = arith.constant 0 : index
    %c0_24 = arith.constant 0 : index
    %30 = vector.load %arg5[%c0_22, %c1, %c0_23, %c0_24] : memref<3x3x128x128xbf16, #tpu.memory_space<vmem>>, vector<1x1x128x128xbf16>
    %31 = vector.shape_cast %30 : vector<1x1x128x128xbf16> to vector<128x128xbf16>
    %cst_25 = arith.constant dense<0.000000e+00> : vector<128x128xf32>
    %32 = tpu.matmul %29, %31, %cst_25 {dimension_numbers = #tpu.dot_dimension_numbers<[1], [0], [0], [1], [0, 0, 1, 1], [], []>} : vector<128x128xbf16>, vector<128x128xbf16>, vector<128x128xf32> -> vector<128x128xf32>
    %c0_26 = arith.constant 0 : index
    %c0_27 = arith.constant 0 : index
    %33 = vector.load %arg7[%c0_26, %c0_27] : memref<128x128xf32, #tpu.memory_space<vmem>>, vector<128x128xf32>
    %34 = arith.addf %33, %32 : vector<128x128xf32>
    %c0_28 = arith.constant 0 : index
    %c0_29 = arith.constant 0 : index
    %35 = vector.load %arg7[%c0_28, %c0_29] : memref<128x128xf32, #tpu.memory_space<vmem>>, vector<128x128xf32>
    tpu.vector_store %arg7[%c0_28, %c0_29], %34 {strides = array<i32>} : memref<128x128xf32, #tpu.memory_space<vmem>>, vector<128x128xf32>,
    %36 = vector.extract_strided_slice %21 {offsets = [0, 0, 0], sizes = [8, 16, 128], strides = [1, 1, 1]} : vector<10x16x128xbf16> to vector<8x16x128xbf16>
    %37 = vector.shape_cast %36 : vector<8x16x128xbf16> to vector<128x128xbf16>
    %c0_30 = arith.constant 0 : index
    %c2 = arith.constant 2 : index
    %c0_31 = arith.constant 0 : index
    %c0_32 = arith.constant 0 : index
    %38 = vector.load %arg5[%c0_30, %c2, %c0_31, %c0_32] : memref<3x3x128x128xbf16, #tpu.memory_space<vmem>>, vector<1x1x128x128xbf16>
    %39 = vector.shape_cast %38 : vector<1x1x128x128xbf16> to vector<128x128xbf16>
    %cst_33 = arith.constant dense<0.000000e+00> : vector<128x128xf32>
    %40 = tpu.matmul %37, %39, %cst_33 {dimension_numbers = #tpu.dot_dimension_numbers<[1], [0], [0], [1], [0, 0, 1, 1], [], []>} : vector<128x128xbf16>, vector<128x128xbf16>, vector<128x128xf32> -> vector<128x128xf32>
    %c0_34 = arith.constant 0 : index
    %c0_35 = arith.constant 0 : index
    %41 = vector.load %arg7[%c0_34, %c0_35] : memref<128x128xf32, #tpu.memory_space<vmem>>, vector<128x128xf32>
    %42 = arith.addf %41, %40 : vector<128x128xf32>
    %c0_36 = arith.constant 0 : index
    %c0_37 = arith.constant 0 : index
    %43 = vector.load %arg7[%c0_36, %c0_37] : memref<128x128xf32, #tpu.memory_space<vmem>>, vector<128x128xf32>
    tpu.vector_store %arg7[%c0_36, %c0_37], %42 {strides = array<i32>} : memref<128x128xf32, #tpu.memory_space<vmem>>, vector<128x128xf32>,
    %44 = vector.extract_strided_slice %19 {offsets = [1, 0, 0], sizes = [8, 16, 128], strides = [1, 1, 1]} : vector<10x16x128xbf16> to vector<8x16x128xbf16>
    %45 = vector.shape_cast %44 : vector<8x16x128xbf16> to vector<128x128xbf16>
    %c1_38 = arith.constant 1 : index
    %c0_39 = arith.constant 0 : index
    %c0_40 = arith.constant 0 : index
    %c0_41 = arith.constant 0 : index
    %46 = vector.load %arg5[%c1_38, %c0_39, %c0_40, %c0_41] : memref<3x3x128x128xbf16, #tpu.memory_space<vmem>>, vector<1x1x128x128xbf16>
    %47 = vector.shape_cast %46 : vector<1x1x128x128xbf16> to vector<128x128xbf16>
    %cst_42 = arith.constant dense<0.000000e+00> : vector<128x128xf32>
    %48 = tpu.matmul %45, %47, %cst_42 {dimension_numbers = #tpu.dot_dimension_numbers<[1], [0], [0], [1], [0, 0, 1, 1], [], []>} : vector<128x128xbf16>, vector<128x128xbf16>, vector<128x128xf32> -> vector<128x128xf32>
    %c0_43 = arith.constant 0 : index
    %c0_44 = arith.constant 0 : index
    %49 = vector.load %arg7[%c0_43, %c0_44] : memref<128x128xf32, #tpu.memory_space<vmem>>, vector<128x128xf32>
    %50 = arith.addf %49, %48 : vector<128x128xf32>
    %c0_45 = arith.constant 0 : index
    %c0_46 = arith.constant 0 : index
    %51 = vector.load %arg7[%c0_45, %c0_46] : memref<128x128xf32, #tpu.memory_space<vmem>>, vector<128x128xf32>
    tpu.vector_store %arg7[%c0_45, %c0_46], %50 {strides = array<i32>} : memref<128x128xf32, #tpu.memory_space<vmem>>, vector<128x128xf32>,
    %52 = vector.extract_strided_slice %16 {offsets = [1, 0, 0], sizes = [8, 16, 128], strides = [1, 1, 1]} : vector<10x16x128xbf16> to vector<8x16x128xbf16>
    %53 = vector.shape_cast %52 : vector<8x16x128xbf16> to vector<128x128xbf16>
    %c1_47 = arith.constant 1 : index
    %c1_48 = arith.constant 1 : index
    %c0_49 = arith.constant 0 : index
    %c0_50 = arith.constant 0 : index
    %54 = vector.load %arg5[%c1_47, %c1_48, %c0_49, %c0_50] : memref<3x3x128x128xbf16, #tpu.memory_space<vmem>>, vector<1x1x128x128xbf16>
    %55 = vector.shape_cast %54 : vector<1x1x128x128xbf16> to vector<128x128xbf16>
    %cst_51 = arith.constant dense<0.000000e+00> : vector<128x128xf32>
    %56 = tpu.matmul %53, %55, %cst_51 {dimension_numbers = #tpu.dot_dimension_numbers<[1], [0], [0], [1], [0, 0, 1, 1], [], []>} : vector<128x128xbf16>, vector<128x128xbf16>, vector<128x128xf32> -> vector<128x128xf32>
    %c0_52 = arith.constant 0 : index
    %c0_53 = arith.constant 0 : index
    %57 = vector.load %arg7[%c0_52, %c0_53] : memref<128x128xf32, #tpu.memory_space<vmem>>, vector<128x128xf32>
    %58 = arith.addf %57, %56 : vector<128x128xf32>
    %c0_54 = arith.constant 0 : index
    %c0_55 = arith.constant 0 : index
    %59 = vector.load %arg7[%c0_54, %c0_55] : memref<128x128xf32, #tpu.memory_space<vmem>>, vector<128x128xf32>
    tpu.vector_store %arg7[%c0_54, %c0_55], %58 {strides = array<i32>} : memref<128x128xf32, #tpu.memory_space<vmem>>, vector<128x128xf32>,
    %60 = vector.extract_strided_slice %21 {offsets = [1, 0, 0], sizes = [8, 16, 128], strides = [1, 1, 1]} : vector<10x16x128xbf16> to vector<8x16x128xbf16>
    %61 = vector.shape_cast %60 : vector<8x16x128xbf16> to vector<128x128xbf16>
    %c1_56 = arith.constant 1 : index
    %c2_57 = arith.constant 2 : index
    %c0_58 = arith.constant 0 : index
    %c0_59 = arith.constant 0 : index
    %62 = vector.load %arg5[%c1_56, %c2_57, %c0_58, %c0_59] : memref<3x3x128x128xbf16, #tpu.memory_space<vmem>>, vector<1x1x128x128xbf16>
    %63 = vector.shape_cast %62 : vector<1x1x128x128xbf16> to vector<128x128xbf16>
    %cst_60 = arith.constant dense<0.000000e+00> : vector<128x128xf32>
    %64 = tpu.matmul %61, %63, %cst_60 {dimension_numbers = #tpu.dot_dimension_numbers<[1], [0], [0], [1], [0, 0, 1, 1], [], []>} : vector<128x128xbf16>, vector<128x128xbf16>, vector<128x128xf32> -> vector<128x128xf32>
    %c0_61 = arith.constant 0 : index
    %c0_62 = arith.constant 0 : index
    %65 = vector.load %arg7[%c0_61, %c0_62] : memref<128x128xf32, #tpu.memory_space<vmem>>, vector<128x128xf32>
    %66 = arith.addf %65, %64 : vector<128x128xf32>
    %c0_63 = arith.constant 0 : index
    %c0_64 = arith.constant 0 : index
    %67 = vector.load %arg7[%c0_63, %c0_64] : memref<128x128xf32, #tpu.memory_space<vmem>>, vector<128x128xf32>
    tpu.vector_store %arg7[%c0_63, %c0_64], %66 {strides = array<i32>} : memref<128x128xf32, #tpu.memory_space<vmem>>, vector<128x128xf32>,
    %68 = vector.extract_strided_slice %19 {offsets = [2, 0, 0], sizes = [8, 16, 128], strides = [1, 1, 1]} : vector<10x16x128xbf16> to vector<8x16x128xbf16>
    %69 = vector.shape_cast %68 : vector<8x16x128xbf16> to vector<128x128xbf16>
    %c2_65 = arith.constant 2 : index
    %c0_66 = arith.constant 0 : index
    %c0_67 = arith.constant 0 : index
    %c0_68 = arith.constant 0 : index
    %70 = vector.load %arg5[%c2_65, %c0_66, %c0_67, %c0_68] : memref<3x3x128x128xbf16, #tpu.memory_space<vmem>>, vector<1x1x128x128xbf16>
    %71 = vector.shape_cast %70 : vector<1x1x128x128xbf16> to vector<128x128xbf16>
    %cst_69 = arith.constant dense<0.000000e+00> : vector<128x128xf32>
    %72 = tpu.matmul %69, %71, %cst_69 {dimension_numbers = #tpu.dot_dimension_numbers<[1], [0], [0], [1], [0, 0, 1, 1], [], []>} : vector<128x128xbf16>, vector<128x128xbf16>, vector<128x128xf32> -> vector<128x128xf32>
    %c0_70 = arith.constant 0 : index
    %c0_71 = arith.constant 0 : index
    %73 = vector.load %arg7[%c0_70, %c0_71] : memref<128x128xf32, #tpu.memory_space<vmem>>, vector<128x128xf32>
    %74 = arith.addf %73, %72 : vector<128x128xf32>
    %c0_72 = arith.constant 0 : index
    %c0_73 = arith.constant 0 : index
    %75 = vector.load %arg7[%c0_72, %c0_73] : memref<128x128xf32, #tpu.memory_space<vmem>>, vector<128x128xf32>
    tpu.vector_store %arg7[%c0_72, %c0_73], %74 {strides = array<i32>} : memref<128x128xf32, #tpu.memory_space<vmem>>, vector<128x128xf32>,
    %76 = vector.extract_strided_slice %16 {offsets = [2, 0, 0], sizes = [8, 16, 128], strides = [1, 1, 1]} : vector<10x16x128xbf16> to vector<8x16x128xbf16>
    %77 = vector.shape_cast %76 : vector<8x16x128xbf16> to vector<128x128xbf16>
    %c2_74 = arith.constant 2 : index
    %c1_75 = arith.constant 1 : index
    %c0_76 = arith.constant 0 : index
    %c0_77 = arith.constant 0 : index
    %78 = vector.load %arg5[%c2_74, %c1_75, %c0_76, %c0_77] : memref<3x3x128x128xbf16, #tpu.memory_space<vmem>>, vector<1x1x128x128xbf16>
    %79 = vector.shape_cast %78 : vector<1x1x128x128xbf16> to vector<128x128xbf16>
    %cst_78 = arith.constant dense<0.000000e+00> : vector<128x128xf32>
    %80 = tpu.matmul %77, %79, %cst_78 {dimension_numbers = #tpu.dot_dimension_numbers<[1], [0], [0], [1], [0, 0, 1, 1], [], []>} : vector<128x128xbf16>, vector<128x128xbf16>, vector<128x128xf32> -> vector<128x128xf32>
    %c0_79 = arith.constant 0 : index
    %c0_80 = arith.constant 0 : index
    %81 = vector.load %arg7[%c0_79, %c0_80] : memref<128x128xf32, #tpu.memory_space<vmem>>, vector<128x128xf32>
    %82 = arith.addf %81, %80 : vector<128x128xf32>
    %c0_81 = arith.constant 0 : index
    %c0_82 = arith.constant 0 : index
    %83 = vector.load %arg7[%c0_81, %c0_82] : memref<128x128xf32, #tpu.memory_space<vmem>>, vector<128x128xf32>
    tpu.vector_store %arg7[%c0_81, %c0_82], %82 {strides = array<i32>} : memref<128x128xf32, #tpu.memory_space<vmem>>, vector<128x128xf32>,
    %84 = vector.extract_strided_slice %21 {offsets = [2, 0, 0], sizes = [8, 16, 128], strides = [1, 1, 1]} : vector<10x16x128xbf16> to vector<8x16x128xbf16>
    %85 = vector.shape_cast %84 : vector<8x16x128xbf16> to vector<128x128xbf16>
    %c2_83 = arith.constant 2 : index
    %c2_84 = arith.constant 2 : index
    %c0_85 = arith.constant 0 : index
    %c0_86 = arith.constant 0 : index
    %86 = vector.load %arg5[%c2_83, %c2_84, %c0_85, %c0_86] : memref<3x3x128x128xbf16, #tpu.memory_space<vmem>>, vector<1x1x128x128xbf16>
    %87 = vector.shape_cast %86 : vector<1x1x128x128xbf16> to vector<128x128xbf16>
    %cst_87 = arith.constant dense<0.000000e+00> : vector<128x128xf32>
    %88 = tpu.matmul %85, %87, %cst_87 {dimension_numbers = #tpu.dot_dimension_numbers<[1], [0], [0], [1], [0, 0, 1, 1], [], []>} : vector<128x128xbf16>, vector<128x128xbf16>, vector<128x128xf32> -> vector<128x128xf32>
    %c0_88 = arith.constant 0 : index
    %c0_89 = arith.constant 0 : index
    %89 = vector.load %arg7[%c0_88, %c0_89] : memref<128x128xf32, #tpu.memory_space<vmem>>, vector<128x128xf32>
    %90 = arith.addf %89, %88 : vector<128x128xf32>
    %c0_90 = arith.constant 0 : index
    %c0_91 = arith.constant 0 : index
    %91 = vector.load %arg7[%c0_90, %c0_91] : memref<128x128xf32, #tpu.memory_space<vmem>>, vector<128x128xf32>
    tpu.vector_store %arg7[%c0_90, %c0_91], %90 {strides = array<i32>} : memref<128x128xf32, #tpu.memory_space<vmem>>, vector<128x128xf32>,
    %c0_92 = arith.constant 0 : index
    %c0_93 = arith.constant 0 : index
    %92 = vector.load %arg7[%c0_92, %c0_93] : memref<128x128xf32, #tpu.memory_space<vmem>>, vector<128x128xf32>
    %cst_94 = arith.constant 0.000000e+00 : f32
    %93 = vector.broadcast %cst_94 : f32 to vector<128x128xf32>
    %94 = arith.cmpf oge, %92, %93 : vector<128x128xf32>
    %cst_95 = arith.constant 1.000000e-01 : f32
    %95 = vector.broadcast %cst_95 : f32 to vector<128x128xf32>
    %96 = arith.mulf %95, %92 : vector<128x128xf32>
    %97 = arith.select %94, %92, %96 : vector<128x128xi1>, vector<128x128xf32>
    %98 = vector.shape_cast %97 : vector<128x128xf32> to vector<8x16x128xf32>
    %99 = vector.shape_cast %98 : vector<8x16x128xf32> to vector<4x2x16x128xf32>
    %cst_96 = arith.constant dense<0xFF800000> : vector<4x16x128xf32>
    %100 = vector.multi_reduction <maximumf>, %99, %cst_96 [1] : vector<4x2x16x128xf32> to vector<4x16x128xf32>
    %101 = vector.shape_cast %100 : vector<4x16x128xf32> to vector<4x8x2x128xf32>
    %cst_97 = arith.constant dense<0xFF800000> : vector<4x8x128xf32>
    %102 = vector.multi_reduction <maximumf>, %101, %cst_97 [2] : vector<4x8x2x128xf32> to vector<4x8x128xf32>
    %103 = arith.truncf %102 : vector<4x8x128xf32> to vector<4x8x128xbf16>
    %c0_98 = arith.constant 0 : index
    %c0_99 = arith.constant 0 : index
    %c0_100 = arith.constant 0 : index
    %c0_101 = arith.constant 0 : index
    %104 = vector.load %arg6[%c0_98, %c0_99, %c0_100, %c0_101] : memref<1x4x8x128xbf16, #tpu.memory_space<vmem>>, vector<1x4x8x128xbf16>
    %105 = vector.shape_cast %104 : vector<1x4x8x128xbf16> to vector<4x8x128xbf16>
    %106 = vector.shape_cast %103 : vector<4x8x128xbf16> to vector<1x4x8x128xbf16>
    tpu.vector_store %arg6[%c0_98, %c0_99, %c0_100, %c0_101], %106 {strides = array<i32>} : memref<1x4x8x128xbf16, #tpu.memory_space<vmem>>, vector<1x4x8x128xbf16>,
    return
  }
  func.func @transform_0(%arg0: i32, %arg1: i32) -> (i32, i32, i32, i32) {
    %c0_i32 = arith.constant 0 : i32
    %c0_i32_0 = arith.constant 0 : i32
    %c0_i32_1 = arith.constant 0 : i32
    return %arg0, %arg1, %c0_i32, %c0_i32_0 : i32, i32, i32, i32
  }
  func.func @transform_1(%arg0: i32, %arg1: i32) -> (i32, i32, i32, i32) {
    %c8_i32 = arith.constant 8 : i32
    %0 = arith.muli %arg1, %c8_i32 : i32
    %c1_i32 = arith.constant 1 : i32
    %1 = arith.subi %0, %c1_i32 : i32
    %c0_i32 = arith.constant 0 : i32
    %2 = arith.maxsi %1, %c0_i32 : i32
    %c0_i32_0 = arith.constant 0 : i32
    %c0_i32_1 = arith.constant 0 : i32
    %c0_i32_2 = arith.constant 0 : i32
    return %arg0, %2, %c0_i32_0, %c0_i32_1 : i32, i32, i32, i32
  }
  func.func @transform_2(%arg0: i32, %arg1: i32) -> (i32, i32, i32, i32) {
    %c1_i32 = arith.constant 1 : i32
    %0 = arith.addi %arg1, %c1_i32 : i32
    %c8_i32 = arith.constant 8 : i32
    %1 = arith.muli %0, %c8_i32 : i32
    %c15_i32 = arith.constant 15 : i32
    %2 = arith.minsi %1, %c15_i32 : i32
    %c0_i32 = arith.constant 0 : i32
    %c0_i32_0 = arith.constant 0 : i32
    %c0_i32_1 = arith.constant 0 : i32
    return %arg0, %2, %c0_i32, %c0_i32_0 : i32, i32, i32, i32
  }
  func.func @transform_3(%arg0: i32, %arg1: i32) -> (i32, i32, i32, i32) {
    %c0_i32 = arith.constant 0 : i32
    %c0_i32_0 = arith.constant 0 : i32
    %c0_i32_1 = arith.constant 0 : i32
    %c0_i32_2 = arith.constant 0 : i32
    %c0_i32_3 = arith.constant 0 : i32
    return %c0_i32, %c0_i32_0, %c0_i32_1, %c0_i32_2 : i32, i32, i32, i32
  }
  func.func @transform_4(%arg0: i32, %arg1: i32) -> (i32, i32, i32, i32) {
    %c0_i32 = arith.constant 0 : i32
    %c0_i32_0 = arith.constant 0 : i32
    %c0_i32_1 = arith.constant 0 : i32
    return %arg0, %arg1, %c0_i32, %c0_i32_0 : i32, i32, i32, i32
  }
}

</mosaic_0001>

<bundles_post_ra>
// kernel: vggnet_block_forward.2
= control target key start
LH: loop header
LB: loop body
LE: loop exit
PB: predicated region body
PF: predicated region fallthrough
CT: control target
= control target key end

     0   :  { %s3857_s15 = smov 0   ;;  %s3859_s16 = smov 0   ;;  %s4479_s0 = inlined_call_operand.vmem [shape: bf16[2,16,16,128], index: 0, kind: input, shape index: {}, may-alias: {0,1,2}]   ;;  %s4480_s1 = inlined_call_operand.vmem [shape: bf16[2,16,16,128], index: 1, kind: input, shape index: {}, may-alias: {0,1,2}]   ;;  %s4481_s2 = inlined_call_operand.vmem [shape: bf16[2,16,16,128], index: 2, kind: input, shape index: {}, may-alias: {0,1,2}]   ;;  %s4482_s3 = inlined_call_operand.vmem [shape: bf16[3,3,128,128], index: 3, kind: input, shape index: {}]   ;;  %s4483_s4 = inlined_call_operand.vmem [shape: bf16[2,16,16,128], index: 4, kind: output, shape index: {}]  }
   0x1   :  { %s3861_s17 = smov 0   ;;  %s3863_s18 = smov 0  }
   0x2   :  { %s3865_s19 = smov 0  }
   0x3 LB: > { %s23_s20 = sadd.s32 1, %s3822_s17  ;;  %s26_s21 = sadd.s32 1, %s3826_s18  ;;  %s3830_s19 = sphi %s3865_s19, %s14_s19   ;;  %s3826_s18 = sphi %s3863_s18, %s4492_s18   ;;  %s3822_s17 = sphi %s3861_s17, %s4491_s17   ;;  %s3818_s16 = sphi %s3859_s16, %s4490_s16   ;;  %s3814_s15 = sphi %s3857_s15, %s4489_s15  }
   0x4   : > { %p24_p0 = scmp.ge.s32.totalorder %s23_s20, 2  ;;  %p2771_p1 = scmp.ge.s32.totalorder %s3830_s19, 1 }
   0x5   : > { %p248_p2 = scmp.lt.s32.totalorder %s3830_s19, 5 }
   0x6   : > { %s4494_s20 = smov (%p24_p0, %s23_s20), 0  ;;  %s4496_s21 = smov (!%p24_p0, %s26_s21), %s3826_s18 }
   0x7   : > { %p249_p3 = pnand %p2771_p1, %p248_p2  ;;  %p28_p4 = scmp.ge.s32.totalorder %s4496_s21, 2 }
   0x8   : > { %v3712_v0 = vld [vmem:[%s4482_s3] sm:$0xff] (!%p249_p3)   ;;  %s3893_s24 = sshll.u32 (!%p249_p3), %s3814_s15, 3  ;;  %p311_p5 = scmp.lt.s32.totalorder (!%p249_p3), %s3818_s16, 1  ;;  %v3714_v2 = vld [vmem:[%s4482_s3 + $0x8] sm:$0xff] (!%p249_p3)   ;;  %v3716_v4 = vld [vmem:[%s4482_s3 + $0x10] sm:$0xff] (!%p249_p3)   ;;  %vm553_vm0 = vcmask (!%p249_p3), 1040384  }
   0x9   : > { %s4498_s21 = smov (%p28_p4, %s4496_s21), 0  ;;  %252 = sbr.rel (%p249_p3) target bundleno = 408 (0x198), region = 36 }
   0xa   : > { %v3713_v1 = vld [vmem:[%s4482_s3 + $0x100] sm:$0xff] (!%p249_p3)   ;;  %3240 = vmatprep.subr.bf16.mxu1 (!%p249_p3), %v3712_v0  ;;  %p313_p6 = scmp.lt.s32.totalorder (!%p249_p3), %s3893_s24, 15  ;;  %v3715_v3 = vld [vmem:[%s4482_s3 + $0x108] sm:$0xff] (!%p249_p3)   ;;  %v3717_v5 = vld [vmem:[%s4482_s3 + $0x110] sm:$0xff] (!%p249_p3)   ;;  %s2777_s13 = sadd.s32 (!%p249_p3), 4294967295, %s3893_s24  ;;  %vm596_vm3 = vcmask (!%p249_p3), 1047552  }
   0xb   : > { %3368 = vmatprep.subr.bf16.mxu0 (!%p249_p3), %v3713_v1  ;;  %3241 = vmatpush3.bf16.msra.mxu1 (!%p249_p3), %v3712_v0  ;;  %v3718_v6 = vld [vmem:[%s4482_s3 + $0x18] sm:$0xff] (!%p249_p3)   ;;  %p323_p7 = scmp.gt.s32.totalorder (!%p249_p3), %s2777_s13, 0  ;;  %p2778_p8 = scmp.lt.s32.totalorder (!%p249_p3), %s2777_s13, 15  ;;  %v3720_v8 = vld [vmem:[%s4482_s3 + $0x20] sm:$0xff] (!%p249_p3)   ;;  %v3722_v10 = vld [vmem:[%s4482_s3 + $0x28] sm:$0xff] (!%p249_p3)  }
   0xc   : > { %3369 = vmatpush3.bf16.msra.mxu0 (!%p249_p3), %v3713_v1  ;;  %3242 = vmatprep.subr.bf16.mxu1 (!%p249_p3), %v3714_v2  ;;  %v3719_v7 = vld [vmem:[%s4482_s3 + $0x118] sm:$0xff] (!%p249_p3)   ;;  %v3721_v9 = vld [vmem:[%s4482_s3 + $0x120] sm:$0xff] (!%p249_p3)   ;;  %p369_p9 = scmp.eq.s32.totalorder (!%p249_p3), %s3814_s15, 0  ;;  %v3723_v11 = vld [vmem:[%s4482_s3 + $0x128] sm:$0xff] (!%p249_p3)   ;;  %vm554_vm1 = vsmask.f32 (!%p249_p3), 256 }
   0xd   : > { %3370 = vmatprep.subr.bf16.mxu0 (!%p249_p3), %v3715_v3  ;;  %v3724_v13 = vld [vmem:[%s4482_s3 + $0x30] sm:$0xff] (!%p249_p3)   ;;  %v3726_v15 = vld [vmem:[%s4482_s3 + $0x38] sm:$0xff] (!%p249_p3)   ;;  %v3729_v21 = vld [vmem:[%s4482_s3 + $0x40] sm:$0xff] (!%p249_p3)   ;;  %vm597_vm4 = vsmask.f32 (!%p249_p3), 7424  ;;  %p389_p12 = scmp.eq.s32.totalorder (!%p249_p3), %s3814_s15, 1 }
   0xe   : > { %v3725_v14 = vld [vmem:[%s4482_s3 + $0x130] sm:$0xff] (!%p249_p3)   ;;  %v3727_v16 = vld [vmem:[%s4482_s3 + $0x138] sm:$0xff] (!%p249_p3)   ;;  %v3731_v22 = vld [vmem:[%s4482_s3 + $0x140] sm:$0xff] (!%p249_p3)  }
   0xf   : > { %3243 = vmatpush3.bf16.msra.mxu1 (!%p249_p3), %v3714_v2  ;;  %v3733_v30 = vld [vmem:[%s4482_s3 + $0x148] sm:$0xff] (!%p249_p3)   ;;  %vm4000_vm2 = vmand (!%p249_p3), %vm553_vm0, %vm554_vm1  ;;  %v3737_v41 = vld [vmem:[%s4482_s3 + $0x150] sm:$0xff] (!%p249_p3)  }
  0x10   : > { %s4500_s16 = smov (!%p311_p5, %s3818_s16), 1  ;;  %3371 = vmatpush3.bf16.msra.mxu0 %v3715_v3  ;;  %3244 = vmatprep.subr.bf16.mxu1 %v3716_v4  ;;  %s4502_s13 = smov (!%p323_p7, %s2777_s13), 0  ;;  %v3732_v49 = vld [vmem:[%s4482_s3 + $0x48] sm:$0xff]   ;;  %v3739_v51 = vld [vmem:[%s4482_s3 + $0x158] sm:$0xff]   ;;  %v3743_v59 = vld [vmem:[%s4482_s3 + $0x160] sm:$0xff]  }
  0x11   : > { %s314_s7 = scalar_select %p313_p6, %s3893_s24, 15  ;;  %3372 = vmatprep.subr.bf16.mxu0 %v3717_v5  ;;  %v3735_v60 = vld [vmem:[%s4482_s3 + $0x50] sm:$0xff]   ;;  %v3738_v0 = vld [vmem:[%s4482_s3 + $0x58] sm:$0xff]   ;;  %v3745_v2 = vld [vmem:[%s4482_s3 + $0x168] sm:$0xff]  }
  0x12   : > { %s3912_s11 = sshll.u32 %s4500_s16, 5  ;;  %s4504_s13 = smov (!%p2778_p8, %s4502_s13), 15  ;;  %vm4124_vm5 = vmand %vm596_vm3, %vm597_vm4  ;;  %v3784_v39 = vld [vmem:[%s4482_s3 + $0x200] sm:$0xff]  }
  0x13   : > { %s2773_s10 = sshll.u32 %s314_s7, 1  ;;  %3245 = vmatpush3.bf16.msra.mxu1 %v3716_v4  ;;  %s2783_s7 = sshll.u32 %s4504_s13, 1 }
  0x14   : > { %s3915_s12 = sadd.s32 %s3912_s11, %s2773_s10  ;;  %3373 = vmatpush3.bf16.msra.mxu0 %v3717_v5  ;;  %3246 = vmatprep.subr.bf16.mxu1 %v3718_v6  ;;  %s331_s22 = sadd.s32 %s2783_s7, %s3912_s11 }
  0x15   : > { %s2775_s16 = sshll.u32 %s3915_s12, 2  ;;  %3374 = vmatprep.subr.bf16.mxu0 %v3719_v7  ;;  %s2785_s28 = sshll.u32 %s331_s22, 2 }
  0x16   : > { %s3936_s6 = scalar_lea.vmem %s4479_s0, %s2775_s16  ;;  %s333_s25 = scalar_lea.vmem %s4480_s1, %s2785_s28 }
  0x17   : > { %3247 = vmatpush3.bf16.msra.mxu1 %v3718_v6  ;;  %v3946_v12 = vld [vmem:[%s3936_s6] sm:$0xff]   ;;  %s370_s23 = scalar_select %p369_p9, 0.0, 1.0  ;;  %v3966_v17 = vld [vmem:[%s3936_s6 + $0x8] sm:$0xff]   ;;  %v3980_v27 = vld [vmem:[%s3936_s6 + $0x10] sm:$0xff]  }
  0x18   : > { %3375 = vmatpush3.bf16.msra.mxu0 %v3719_v7  ;;  %3248 = vmatprep.subr.bf16.mxu1 %v3720_v8  ;;  %v367_v18 = vld [vmem:[%s333_s25] sm:$0xf]  ;;  %v368_v19 = vld [vmem:[%s333_s25 + $0x4] sm:$0xf]  ;;  %v481_v20 = vshrl.u32 %v3946_v12, 16  ;;  %v488_v23 = vshrl.u32 %v3966_v17, 16 }
  0x19   : > { %3376 = vmatprep.subr.bf16.mxu0 %v3721_v9  ;;  %3384 = vmatprep.mubr.bf16.mxu0 %v3946_v12  ;;  %s373_s29 = sshrl.u32 %s370_s23, 16  ;;  %p372_p10 = scmp.ne.f32.partialorder %s370_s23, %s370_s23  ;;  %v484_v26 = vshll.u32 %v3946_v12, 16  ;;  %v491_v32 = vshll.u32 %v3966_v17, 16  ;;  %v3989_v33 = vld [vmem:[%s3936_s6 + $0x18] sm:$0xff]   ;;  %v495_v36 = vshrl.u32 %v3980_v27, 16  ;;  %v498_v46 = vshll.u32 %v3980_v27, 16 }
  0x1a   : > { %s374_s30 = sand.u32 1, %s373_s29  ;;  %v483_v25 = vrot.slane %v481_v20, 7  ;;  %v490_v31 = vrot.slane %v488_v23, 7  ;;  %v502_v42 = vshrl.u32 %v3989_v33, 16  ;;  %v4021_v47 = vld [vmem:[%s3936_s6 + $0x20] sm:$0xff]   ;;  %v505_v53 = vshll.u32 %v3989_v33, 16 }
  0x1b   : > { %3249 = vmatpush3.bf16.msra.mxu1 %v3720_v8  ;;  %s375_s8 = sadd.s32 32767, %s374_s30  ;;  %v497_v45 = vrot.slane %v495_v36, 7  ;;  %v4041_v55 = vld [vmem:[%s3936_s6 + $0x28] sm:$0xff]   ;;  %v509_v57 = vshrl.u32 %v4021_v47, 16  ;;  %v512_v63 = vshll.u32 %v4021_v47, 16  ;;  %v4078_v4 = vld [vmem:[%s3936_s6 + $0x30] sm:$0xff]  }
  0x1c   : > { %3377 = vmatpush3.bf16.msra.mxu0 %v3721_v9  ;;  %3250 = vmatprep.subr.bf16.mxu1 %v3722_v10  ;;  %s376_s22 = sadd.s32 %s375_s8, %s370_s23  ;;  %v486_v35 = vor.u32 %v484_v26, %v483_v25  ;;  %v493_v40 = vor.u32 %v491_v32, %v490_v31  ;;  %v504_v52 = vrot.slane %v502_v42, 7  ;;  %v516_v61 = vshrl.u32 %v4041_v55, 16  ;;  %v3741_v8 = vld [vmem:[%s4482_s3 + $0x60] sm:$0xff]  }
  0x1d   : > { %3378 = vmatprep.subr.bf16.mxu0 %v3723_v11  ;;  %s377_s26 = sand.u32 4294901760, %s376_s22  ;;  %v500_v56 = vor.u32 %v498_v46, %v497_v45  ;;  %v511_v1 = vrot.slane %v509_v57, 7  ;;  %v519_v6 = vshll.u32 %v4041_v55, 16  ;;  %v568_v9 = vrot.slane %v484_v26, 1  ;;  %v3753_v31 = vld [vmem:[%s4482_s3 + $0x180] sm:$0xff]   ;;  %v3755_v45 = vld [vmem:[%s4482_s3 + $0x188] sm:$0xff]  }
  0x1e   : > { %s4506_s26 = smov (%p372_p10, %s377_s26), 2143289344  ;;  %v4015_v44 = vsel %vm4000_vm2, 0, %v486_v35  ;;  %v4030_v50 = vsel %vm4000_vm2, 0, %v493_v40  ;;  %v507_v58 = vor.u32 %v505_v53, %v504_v52  ;;  %v518_v5 = vrot.slane %v516_v61, 7 }
  0x1f   : > { %3251 = vmatpush3.bf16.msra.mxu1 %v3722_v10  ;;  %s380_s30 = sshrl.u32 %s4506_s26, 16  ;;  %v4061_v62 = vsel %vm4000_vm2, 0, %v500_v56  ;;  %v514_v7 = vor.u32 %v512_v63, %v511_v1  ;;  %v523_v10 = vshrl.u32 %v4078_v4, 16  ;;  %v3759_v56 = vld [vmem:[%s4482_s3 + $0x198] sm:$0xff]  }
  0x20   : > { %3379 = vmatpush3.bf16.msra.mxu0 %v3723_v11  ;;  %3252 = vmatprep.subr.bf16.mxu1 %v3724_v13  ;;  %s381_s5 = sshll.u32 %s380_s30, 16  ;;  %v4075_v3 = vsel %vm4000_vm2, 0, %v507_v58  ;;  %v3749_v11 = vld [vmem:[%s4482_s3 + $0x170] sm:$0xff]  }
  0x21   : > { %3380 = vmatprep.subr.bf16.mxu0 %v3725_v14  ;;  %s382_s7 = sor.u32 %s381_s5, %s380_s30  ;;  %s3032_s30 = sadd.s32 8, %s3893_s24 }
  0x22   : > { %v383_v24 = vstv %s382_s7  ;;  %p4086_p11 = scmp.lt.s32.totalorder %s3032_s30, 15 }
  0x23   : > { %3253 = vmatpush3.bf16.msra.mxu1 %v3724_v13  ;;  %v385_v28 = vmul.bf16 %v383_v24, %v367_v18  ;;  %v386_v29 = vmul.bf16 %v383_v24, %v368_v19  ;;  %v521_v13 = vor.u32 %v519_v6, %v518_v5  ;;  %v3744_v18 = vld [vmem:[%s4482_s3 + $0x68] sm:$0xff]   ;;  %v569_v19 = vor.u32 %v568_v9, %v481_v20  ;;  %v3751_v20 = vld [vmem:[%s4482_s3 + $0x178] sm:$0xff]   ;;  %s4219_s15 = scalar_select %p389_p12, 0.0, 1.0 }
  0x24   : > { %3381 = vmatpush3.bf16.msra.mxu0 %v3725_v14  ;;  %3254 = vmatprep.subr.bf16.mxu1 %v3726_v15  ;;  %v570_v14 = vrot.slane %v491_v32, 1  ;;  %v3747_v32 = vld [vmem:[%s4482_s3 + $0x70] sm:$0xff]   ;;  %s4508_s30 = smov (!%p4086_p11, %s3032_s30), 15  ;;  %v3758_v5 = vld [vmem:[%s4482_s3 + $0x98] sm:$0xff]  }
  0x25   : > { %3382 = vmatprep.subr.bf16.mxu0 %v3727_v16  ;;  %v3991_v34 = vcombine.low %v385_v28, %v386_v29  ;;  %v4130_v25 = vsel %vm4000_vm2, 0, %v521_v13  ;;  %v4139_v26 = vsel %vm4124_vm5, %v569_v19, 0  ;;  %v572_v29 = vrot.slane %v498_v46, 1  ;;  %s4510_s30 = smov (!%p4086_p11, %s4508_s30), 15  ;;  %s393_s7 = sshrl.u32 %s4219_s15, 16  ;;  %v3760_v13 = vld [vmem:[%s4482_s3 + $0xa0] sm:$0xff]  }
  0x26   : > { %v571_v28 = vor.u32 %v570_v14, %v488_v23  ;;  %v3750_v23 = vld [vmem:[%s4482_s3 + $0x78] sm:$0xff]   ;;  %v576_v46 = vrot.slane %v512_v63, 1  ;;  %s4187_s13 = sshll.u32 %s4510_s30, 1  ;;  %p392_p13 = scmp.ne.f32.partialorder %s4219_s15, %s4219_s15 }
  0x27   : > { %3255 = vmatpush3.bf16.msra.mxu1 %v3726_v15  ;;  %v474_v37 = vshrl.u32 %v3991_v34, 16  ;;  %v477_v38 = vshll.u32 %v3991_v34, 16  ;;  %v4109_v15 = vld [vmem:[%s3936_s6 + $0x38] sm:$0xff]   ;;  %v573_v40 = vor.u32 %v572_v29, %v495_v36  ;;  %s348_s22 = sadd.s32 %s4187_s13, %s3912_s11  ;;  %s394_s24 = sand.u32 1, %s393_s7 }
  0x28   : > { %3383 = vmatpush3.bf16.msra.mxu0 %v3727_v16  ;;  %3272 = vmatprep.subr.bf16.mxu1 %v3729_v21  ;;  %v4113_v16 = vsel %vm4000_vm2, 0, %v514_v7  ;;  %v4162_v35 = vsel %vm4124_vm5, %v571_v28, 0  ;;  %v533_v63 = vshll.u32 %v4109_v15, 16  ;;  %s2792_s5 = sshll.u32 %s348_s22, 2  ;;  %s395_s14 = sadd.s32 32767, %s394_s24 }
  0x29   : > { %3400 = vmatprep.subr.bf16.mxu0 %v3731_v22  ;;  %v476_v43 = vrot.slane %v474_v37, 7  ;;  %v4183_v36 = vsel %vm4124_vm5, %v573_v40, 0  ;;  %s350_s25 = scalar_lea.vmem %s4481_s2, %s2792_s5  ;;  %s396_s22 = sadd.s32 %s395_s14, %s4219_s15  ;;  %v566_v28 = vrot.slane %v477_v38, 1 }
  0x2a   : > { %s397_s11 = sand.u32 4294901760, %s396_s22  ;;  %v387_v7 = vld [vmem:[%s350_s25] sm:$0xf]  ;;  %s4447_s24 = scalar_lea.vmem %s4483_s4, %s2775_s16 }
  0x2b   : > { %3385 = vmatmul.mubr.bf16.vlgmr.msra.gmra.mrb[0].mxu0 %v3966_v17  ;;  %v479_v48 = vor.u32 %v477_v38, %v476_v43  ;;  %s4512_s11 = smov (%p392_p13, %s397_s11), 2143289344  ;;  %v3764_v38 = vld [vmem:[%s4482_s3 + $0xb0] sm:$0xff]  }
  0x2c   : > { %3401 = vmatpush3.bf16.msra.mxu0 %v3731_v22  ;;  %3388 = vmatprep.mubr.bf16.mxu0 %v3980_v27  ;;  %v526_v22 = vshll.u32 %v4078_v4, 16  ;;  %s400_s29 = sshrl.u32 %s4512_s11, 16 }
  0x2d   : > { %3402 = vmatprep.subr.bf16.mxu0 %v3733_v30  ;;  %v556_v54 = vsel %vm4000_vm2, 0, %v479_v48  ;;  %s401_s23 = sshll.u32 %s400_s29, 16 }
  0x2e   : > { %3256 = vmatprep.mubr.bf16.mxu1 %v556_v54  ;;  %v3754_v54 = vld [vmem:[%s4482_s3 + $0x88] sm:$0xff]   ;;  %v580_v58 = vrot.slane %v526_v22, 1  ;;  %s402_s8 = sor.u32 %s401_s23, %s400_s29 }
  0x2f   : > { %3257 = vmatmul.mubr.bf16.vlgmr.msra.gmra.mrb[0].mxu1 %v4015_v44  ;;  %v403_v14 = vstv %s402_s8 }
  0x30   : > { %3403 = vmatpush3.bf16.msra.mxu0 %v3733_v30  ;;  %3273 = vmatpush3.bf16.msra.mxu1 %v3729_v21  ;;  %v525_v21 = vrot.slane %v523_v10, 7  ;;  %v581_v1 = vor.u32 %v580_v58, %v523_v10  ;;  %v405_v19 = vmul.bf16 %v403_v14, %v387_v7  ;;  %v3780_v7 = vld [vmem:[%s4482_s3 + $0xf0] sm:$0xff]  }
  0x31   : > { %3404 = vmatprep.subr.bf16.mxu0 %v3737_v41  ;;  %3260 = vmatprep.mubr.bf16.mxu1 %v4030_v50 }
  0x32   : > { %3274 = vmatprep.subr.bf16.mxu1 %v3732_v49  ;;  %v528_v30 = vor.u32 %v526_v22, %v525_v21  ;;  %v4262_v9 = vsel %vm4124_vm5, %v581_v1, 0  ;;  %v3762_v22 = vld [vmem:[%s4482_s3 + $0xa8] sm:$0xff]   ;;  %v3776_v1 = vld [vmem:[%s4482_s3 + $0xe0] sm:$0xff]  }
  0x33   : > { %3389 = vmatmul.mubr.bf16.gmra.mrb[4].mxu0 %v3989_v33 }
  0x34   : > { %3405 = vmatpush3.bf16.msra.mxu0 %v3737_v41  ;;  %3392 = vmatprep.mubr.bf16.mxu0 %v4021_v47  ;;  %v574_v41 = vrot.slane %v505_v53, 1  ;;  %v4170_v43 = vsel %vm4000_vm2, 0, %v528_v30  ;;  %v578_v53 = vrot.slane %v519_v6, 1  ;;  %v3763_v6 = vld [vmem:[%s4482_s3 + $0x1a8] sm:$0xff]  }
  0x35   : > { %3406 = vmatprep.subr.bf16.mxu0 %v3739_v51  ;;  %3275 = vmatpush3.bf16.msra.mxu1 %v3732_v49  ;;  %v3757_v49 = vld [vmem:[%s4482_s3 + $0x190] sm:$0xff]  }
  0x36   : > { %3276 = vmatprep.subr.bf16.mxu1 %v3735_v60  ;;  %v575_v48 = vor.u32 %v574_v41, %v502_v42  ;;  %v577_v42 = vor.u32 %v576_v46, %v509_v57 }
  0x37   : > { %3261 = vmatmul.mubr.bf16.gmra.mrb[4].mxu1 %v4061_v62 }
  0x38   : > { %3407 = vmatpush3.bf16.msra.mxu0 %v3739_v51  ;;  %3264 = vmatprep.mubr.bf16.mxu1 %v4075_v3  ;;  %v3752_v51 = vld [vmem:[%s4482_s3 + $0x80] sm:$0xff]   ;;  %v4204_v52 = vsel %vm4124_vm5, %v575_v48, 0  ;;  %v4216_v57 = vsel %vm4124_vm5, %v577_v42, 0  ;;  %v3773_v48 = vld [vmem:[%s4482_s3 + $0x1d0] sm:$0xff]   ;;  %v3775_v42 = vld [vmem:[%s4482_s3 + $0x1d8] sm:$0xff]  }
  0x39   : > { %3408 = vmatprep.subr.bf16.mxu0 %v3743_v59  ;;  %3277 = vmatpush3.bf16.msra.mxu1 %v3735_v60  ;;  %v3761_v60 = vld [vmem:[%s4482_s3 + $0x1a0] sm:$0xff]  }
  0x3a   : > { %3278 = vmatprep.subr.bf16.mxu1 %v3738_v0 }
  0x3b   : > { %3393 = vmatmul.mubr.bf16.gmra.mrb[8].mxu0 %v4041_v55 }
  0x3c   : > { %3409 = vmatpush3.bf16.msra.mxu0 %v3743_v59  ;;  %3396 = vmatprep.mubr.bf16.mxu0 %v4078_v4  ;;  %v579_v59 = vor.u32 %v578_v53, %v516_v61  ;;  %v530_v61 = vshrl.u32 %v4109_v15, 16 }
  0x3d   : > { %3410 = vmatprep.subr.bf16.mxu0 %v3745_v2  ;;  %3279 = vmatpush3.bf16.msra.mxu1 %v3738_v0 }
  0x3e   : > { %3280 = vmatprep.subr.bf16.mxu1 %v3741_v8  ;;  %v4239_v0 = vsel %vm4124_vm5, %v579_v59, 0  ;;  %v532_v53 = vrot.slane %v530_v61, 7  ;;  %v3774_v59 = vld [vmem:[%s4482_s3 + $0xd8] sm:$0xff]  }
  0x3f   : > { %3265 = vmatmul.mubr.bf16.gmra.mrb[8].mxu1 %v4113_v16 }
  0x40   : > { %3411 = vmatpush3.bf16.msra.mxu0 %v3745_v2  ;;  %3268 = vmatprep.mubr.bf16.mxu1 %v4130_v25  ;;  %v582_v2 = vrot.slane %v533_v63, 1 }
  0x41   : > { %3412 = vmatprep.subr.bf16.mxu0 %v3749_v11  ;;  %3281 = vmatpush3.bf16.msra.mxu1 %v3741_v8  ;;  %v388_v8 = vld [vmem:[%s350_s25 + $0x4] sm:$0xf] }
  0x42   : > { %3282 = vmatprep.subr.bf16.mxu1 %v3744_v18  ;;  %v583_v10 = vor.u32 %v582_v2, %v530_v61  ;;  %v406_v21 = vmul.bf16 %v403_v14, %v388_v8  ;;  %v3781_v61 = vld [vmem:[%s4482_s3 + $0x1f0] sm:$0xff]   ;;  %v3782_v8 = vld [vmem:[%s4482_s3 + $0xf8] sm:$0xff]  }
  0x43   : > { %3397 = vmatmul.mubr.bf16.gmra.mrb[12].mxu0 %v4109_v15 }
  0x44   : > { %3413 = vmatpush3.bf16.msra.mxu0 %v3749_v11  ;;  %3416 = vmatprep.mubr.bf16.mxu0 %v4139_v26  ;;  %v3765_v11 = vld [vmem:[%s4482_s3 + $0x1b0] sm:$0xff]   ;;  %v4286_v29 = vcombine.low %v405_v19, %v406_v21 }
  0x45   : > { %3414 = vmatprep.subr.bf16.mxu0 %v3751_v20  ;;  %3283 = vmatpush3.bf16.msra.mxu1 %v3744_v18  ;;  %v4276_v18 = vsel %vm4124_vm5, %v583_v10, 0  ;;  %v3785_v10 = vld [vmem:[%s4482_s3 + $0x208] sm:$0xff]  }
  0x46   : > { %3284 = vmatprep.subr.bf16.mxu1 %v3747_v32  ;;  %v540_v30 = vshll.u32 %v4286_v29, 16 }
  0x47   : > { %3269 = vmatmul.mubr.bf16.gmra.mrb[12].mxu1 %v4170_v43 }
  0x48   : > { %3415 = vmatpush3.bf16.msra.mxu0 %v3751_v20  ;;  %3288 = vmatprep.mubr.bf16.mxu1 %v3991_v34  ;;  %v3767_v20 = vld [vmem:[%s4482_s3 + $0x1b8] sm:$0xff]   ;;  %v584_v40 = vrot.slane %v540_v30, 1  ;;  %v3771_v34 = vld [vmem:[%s4482_s3 + $0x1c8] sm:$0xff]  }
  0x49   : > { %3432 = vmatprep.subr.bf16.mxu0 %v3753_v31  ;;  %3285 = vmatpush3.bf16.msra.mxu1 %v3747_v32  ;;  %v567_v32 = vor.u32 %v566_v28, %v474_v37 }
  0x4a   : > { %3286 = vmatprep.subr.bf16.mxu1 %v3750_v23 }
  0x4b   : > { %3417 = vmatmul.mubr.bf16.vlgmr.msra.gmra.mrb[0].mxu0 %v4162_v35  ;;  %v599_v46 = vsel %vm4124_vm5, %v567_v32, 0 }
  0x4c   : > { %3433 = vmatpush3.bf16.msra.mxu0 %v3753_v31  ;;  %3420 = vmatprep.mubr.bf16.mxu0 %v4183_v36  ;;  %v3769_v31 = vld [vmem:[%s4482_s3 + $0x1c0] sm:$0xff]  }
  0x4d   : > { %3434 = vmatprep.subr.bf16.mxu0 %v3755_v45  ;;  %3287 = vmatpush3.bf16.msra.mxu1 %v3750_v23  ;;  %v537_v23 = vshrl.u32 %v4286_v29, 16 }
  0x4e   : > { %3304 = vmatprep.subr.bf16.mxu1 %v3752_v51 }
  0x4f   : > { %v4302_v41 = vor.u32 %v584_v40, %v537_v23  ;;  %v539_v58 = vrot.slane %v537_v23, 7 }
  0x50   : > { %3435 = vmatpush3.bf16.msra.mxu0 %v3755_v45  ;;  %3289 = vmatmul.mubr.bf16.vlgmr.msra.gmra.mrb[0].mxu1 %v3946_v12  ;;  %v3756_v12 = vld [vmem:[%s4482_s3 + $0x90] sm:$0xff]   ;;  %v3766_v45 = vld [vmem:[%s4482_s3 + $0xb8] sm:$0xff]  }
  0x51   : > { %3436 = vmatprep.subr.bf16.mxu0 %v3757_v49  ;;  %3305 = vmatpush3.bf16.msra.mxu1 %v3752_v51  ;;  %v608_v37 = vsel %vm4124_vm5, %v4302_v41, 0  ;;  %v3770_v51 = vld [vmem:[%s4482_s3 + $0xc8] sm:$0xff]  }
  0x52   : > { %3292 = vmatprep.mubr.bf16.mxu1 %v3966_v17  ;;  %3306 = vmatprep.subr.bf16.mxu1 %v3754_v54 }
  0x53   : > { %3421 = vmatmul.mubr.bf16.gmra.mrb[4].mxu0 %v4204_v52 }
  0x54   : > { %3437 = vmatpush3.bf16.msra.mxu0 %v3757_v49  ;;  %3424 = vmatprep.mubr.bf16.mxu0 %v4216_v57  ;;  %v3768_v49 = vld [vmem:[%s4482_s3 + $0xc0] sm:$0xff]  }
  0x55   : > { %3438 = vmatprep.subr.bf16.mxu0 %v3759_v56  ;;  %3307 = vmatpush3.bf16.msra.mxu1 %v3754_v54  ;;  %v3777_v54 = vld [vmem:[%s4482_s3 + $0x1e0] sm:$0xff]  }
  0x56   : > { %3308 = vmatprep.subr.bf16.mxu1 %v3756_v12 }
  0x58   : > { %3439 = vmatpush3.bf16.msra.mxu0 %v3759_v56  ;;  %3293 = vmatmul.mubr.bf16.gmra.mrb[4].mxu1 %v3980_v27  ;;  %v3772_v56 = vld [vmem:[%s4482_s3 + $0xd0] sm:$0xff]  }
  0x59   : > { %3440 = vmatprep.subr.bf16.mxu0 %v3761_v60  ;;  %3309 = vmatpush3.bf16.msra.mxu1 %v3756_v12  ;;  %v542_v12 = vor.u32 %v540_v30, %v539_v58 }
  0x5a   : > { %3296 = vmatprep.mubr.bf16.mxu1 %v3989_v33  ;;  %3310 = vmatprep.subr.bf16.mxu1 %v3758_v5 }
  0x5b   : > { %3425 = vmatmul.mubr.bf16.gmra.mrb[8].mxu0 %v4239_v0  ;;  %v565_v2 = vsel %vm4000_vm2, 0, %v542_v12 }
  0x5c   : > { %3441 = vmatpush3.bf16.msra.mxu0 %v3761_v60  ;;  %3428 = vmatprep.mubr.bf16.mxu0 %v4262_v9  ;;  %v3779_v60 = vld [vmem:[%s4482_s3 + $0x1e8] sm:$0xff]  }
  0x5d   : > { %3442 = vmatprep.subr.bf16.mxu0 %v3763_v6  ;;  %3311 = vmatpush3.bf16.msra.mxu1 %v3758_v5  ;;  %v3778_v5 = vld [vmem:[%s4482_s3 + $0xe8] sm:$0xff]  }
  0x5e   : > { %3312 = vmatprep.subr.bf16.mxu1 %v3760_v13 }
  0x60   : > { %3443 = vmatpush3.bf16.msra.mxu0 %v3763_v6  ;;  %3297 = vmatmul.mubr.bf16.gmra.mrb[8].mxu1 %v4021_v47  ;;  %v3783_v6 = vld [vmem:[%s4482_s3 + $0x1f8] sm:$0xff]  }
  0x61   : > { %3444 = vmatprep.subr.bf16.mxu0 %v3765_v11  ;;  %3313 = vmatpush3.bf16.msra.mxu1 %v3760_v13 }
  0x62   : > { %3300 = vmatprep.mubr.bf16.mxu1 %v4041_v55  ;;  %3314 = vmatprep.subr.bf16.mxu1 %v3762_v22 }
  0x63   : > { %3429 = vmatmul.mubr.bf16.gmra.mrb[12].mxu0 %v4276_v18 }
  0x64   : > { %3445 = vmatpush3.bf16.msra.mxu0 %v3765_v11  ;;  %3448 = vmatprep.mubr.bf16.mxu0 %v4030_v50 }
  0x65   : > { %3446 = vmatprep.subr.bf16.mxu0 %v3767_v20  ;;  %3315 = vmatpush3.bf16.msra.mxu1 %v3762_v22 }
  0x66   : > { %3316 = vmatprep.subr.bf16.mxu1 %v3764_v38 }
  0x68   : > { %3447 = vmatpush3.bf16.msra.mxu0 %v3767_v20  ;;  %3301 = vmatmul.mubr.bf16.gmra.mrb[12].mxu1 %v4078_v4 }
  0x69   : > { %3464 = vmatprep.subr.bf16.mxu0 %v3769_v31  ;;  %3317 = vmatpush3.bf16.msra.mxu1 %v3764_v38 }
  0x6a   : > { %3320 = vmatprep.mubr.bf16.mxu1 %v599_v46  ;;  %3318 = vmatprep.subr.bf16.mxu1 %v3766_v45 }
  0x6b   : > { %3449 = vmatmul.mubr.bf16.vlgmr.msra.gmra.mrb[0].mxu0 %v4061_v62 }
  0x6c   : > { %3465 = vmatpush3.bf16.msra.mxu0 %v3769_v31  ;;  %3452 = vmatprep.mubr.bf16.mxu0 %v4075_v3 }
  0x6d   : > { %3466 = vmatprep.subr.bf16.mxu0 %v3771_v34  ;;  %3319 = vmatpush3.bf16.msra.mxu1 %v3766_v45 }
  0x6e   : > { %3336 = vmatprep.subr.bf16.mxu1 %v3768_v49 }
  0x70   : > { %3467 = vmatpush3.bf16.msra.mxu0 %v3771_v34  ;;  %3321 = vmatmul.mubr.bf16.vlgmr.msra.gmra.mrb[0].mxu1 %v4139_v26  ;;  %v535_v26 = vor.u32 %v533_v63, %v532_v53 }
  0x71   : > { %3468 = vmatprep.subr.bf16.mxu0 %v3773_v48  ;;  %3337 = vmatpush3.bf16.msra.mxu1 %v3768_v49 }
  0x72   : > { %3324 = vmatprep.mubr.bf16.mxu1 %v4162_v35  ;;  %3338 = vmatprep.subr.bf16.mxu1 %v3770_v51  ;;  %v4354_v63 = vsel %vm4000_vm2, 0, %v535_v26 }
  0x73   : > { %3453 = vmatmul.mubr.bf16.gmra.mrb[4].mxu0 %v4113_v16 }
  0x74   : > { %3469 = vmatpush3.bf16.msra.mxu0 %v3773_v48  ;;  %3456 = vmatprep.mubr.bf16.mxu0 %v4130_v25 }
  0x75   : > { %3470 = vmatprep.subr.bf16.mxu0 %v3775_v42  ;;  %3339 = vmatpush3.bf16.msra.mxu1 %v3770_v51 }
  0x76   : > { %3340 = vmatprep.subr.bf16.mxu1 %v3772_v56 }
  0x78   : > { %3471 = vmatpush3.bf16.msra.mxu0 %v3775_v42  ;;  %3325 = vmatmul.mubr.bf16.gmra.mrb[4].mxu1 %v4183_v36 }
  0x79   : > { %3472 = vmatprep.subr.bf16.mxu0 %v3777_v54  ;;  %3341 = vmatpush3.bf16.msra.mxu1 %v3772_v56 }
  0x7a   : > { %3328 = vmatprep.mubr.bf16.mxu1 %v4204_v52  ;;  %3342 = vmatprep.subr.bf16.mxu1 %v3774_v59 }
  0x7b   : > { %3457 = vmatmul.mubr.bf16.gmra.mrb[8].mxu0 %v4170_v43 }
  0x7c   : > { %3473 = vmatpush3.bf16.msra.mxu0 %v3777_v54  ;;  %3460 = vmatprep.mubr.bf16.mxu0 %v4354_v63 }
  0x7d   : > { %3474 = vmatprep.subr.bf16.mxu0 %v3779_v60  ;;  %3343 = vmatpush3.bf16.msra.mxu1 %v3774_v59 }
  0x7e   : > { %3344 = vmatprep.subr.bf16.mxu1 %v3776_v1 }
  0x80   : > { %3475 = vmatpush3.bf16.msra.mxu0 %v3779_v60  ;;  %3329 = vmatmul.mubr.bf16.gmra.mrb[8].mxu1 %v4216_v57 }
  0x81   : > { %3476 = vmatprep.subr.bf16.mxu0 %v3781_v61  ;;  %3345 = vmatpush3.bf16.msra.mxu1 %v3776_v1 }
  0x82   : > { %3332 = vmatprep.mubr.bf16.mxu1 %v4239_v0  ;;  %3346 = vmatprep.subr.bf16.mxu1 %v3778_v5 }
  0x83   : > { %3461 = vmatmul.mubr.bf16.gmra.mrb[12].mxu0 %v565_v2 }
  0x84   : > { %3477 = vmatpush3.bf16.msra.mxu0 %v3781_v61  ;;  %3480 = vmatprep.mubr.bf16.mxu0 %v3966_v17  ;;  %v3786_v17 = vld [vmem:[%s4482_s3 + $0x210] sm:$0xff]  }
  0x85   : > { %3478 = vmatprep.subr.bf16.mxu0 %v3783_v6  ;;  %3347 = vmatpush3.bf16.msra.mxu1 %v3778_v5 }
  0x86   : > { %3348 = vmatprep.subr.bf16.mxu1 %v3780_v7 }
  0x88   : > { %3479 = vmatpush3.bf16.msra.mxu0 %v3783_v6  ;;  %3333 = vmatmul.mubr.bf16.gmra.mrb[12].mxu1 %v4262_v9 }
  0x89   : > { %3496 = vmatprep.subr.bf16.mxu0 %v3784_v39  ;;  %3349 = vmatpush3.bf16.msra.mxu1 %v3780_v7 }
  0x8a   : > { %3352 = vmatprep.mubr.bf16.mxu1 %v4015_v44  ;;  %3350 = vmatprep.subr.bf16.mxu1 %v3782_v8  ;;  %v3789_v44 = vld [vmem:[%s4482_s3 + $0x228] sm:$0xff]  }
  0x8b   : > { %3481 = vmatmul.mubr.bf16.vlgmr.msra.gmra.mrb[0].mxu0 %v3980_v27  ;;  %v3787_v27 = vld [vmem:[%s4482_s3 + $0x218] sm:$0xff]  }
  0x8c   : > { %3497 = vmatpush3.bf16.msra.mxu0 %v3784_v39  ;;  %3484 = vmatprep.mubr.bf16.mxu0 %v3989_v33  ;;  %v3788_v33 = vld [vmem:[%s4482_s3 + $0x220] sm:$0xff]  }
  0x8d   : > { %3498 = vmatprep.subr.bf16.mxu0 %v3785_v10  ;;  %3351 = vmatpush3.bf16.msra.mxu1 %v3782_v8 }
  0x8e   : > { %3528 = vmatprep.subr.bf16.mxu1 %v3784_v39 }
  0x90   : > { %3499 = vmatpush3.bf16.msra.mxu0 %v3785_v10  ;;  %3353 = vmatmul.mubr.bf16.vlgmr.msra.gmra.mrb[0].mxu1 %v4030_v50  ;;  %v3791_v50 = vld [vmem:[%s4482_s3 + $0x238] sm:$0xff]  }
  0x91   : > { %3500 = vmatprep.subr.bf16.mxu0 %v3786_v17  ;;  %3536 = vmatpush3.bf16.msra.mxu1 %v3784_v39 }
  0x92   : > { %3356 = vmatprep.mubr.bf16.mxu1 %v4061_v62  ;;  %3529 = vmatprep.subr.bf16.mxu1 %v3785_v10 }
  0x93   : > { %3485 = vmatmul.mubr.bf16.gmra.mrb[4].mxu0 %v4021_v47  ;;  %v3790_v47 = vld [vmem:[%s4482_s3 + $0x230] sm:$0xff]  }
  0x94   : > { %3501 = vmatpush3.bf16.msra.mxu0 %v3786_v17  ;;  %3488 = vmatprep.mubr.bf16.mxu0 %v4041_v55 }
  0x95   : > { %3502 = vmatprep.subr.bf16.mxu0 %v3787_v27  ;;  %3537 = vmatpush3.bf16.msra.mxu1 %v3785_v10 }
  0x96   : > { %3530 = vmatprep.subr.bf16.mxu1 %v3786_v17 }
  0x98   : > { %3503 = vmatpush3.bf16.msra.mxu0 %v3787_v27  ;;  %3357 = vmatmul.mubr.bf16.gmra.mrb[4].mxu1 %v4075_v3 }
  0x99   : > { %3504 = vmatprep.subr.bf16.mxu0 %v3788_v33  ;;  %3538 = vmatpush3.bf16.msra.mxu1 %v3786_v17 }
  0x9a   : > { %3360 = vmatprep.mubr.bf16.mxu1 %v4113_v16  ;;  %3531 = vmatprep.subr.bf16.mxu1 %v3787_v27 }
  0x9b   : > { %3489 = vmatmul.mubr.bf16.gmra.mrb[8].mxu0 %v4078_v4 }
  0x9c   : > { %3505 = vmatpush3.bf16.msra.mxu0 %v3788_v33  ;;  %3492 = vmatprep.mubr.bf16.mxu0 %v4109_v15 }
  0x9d   : > { %3506 = vmatprep.subr.bf16.mxu0 %v3789_v44  ;;  %3539 = vmatpush3.bf16.msra.mxu1 %v3787_v27 }
  0x9e   : > { %3532 = vmatprep.subr.bf16.mxu1 %v3788_v33 }
  0xa0   : > { %3507 = vmatpush3.bf16.msra.mxu0 %v3789_v44  ;;  %3361 = vmatmul.mubr.bf16.gmra.mrb[8].mxu1 %v4130_v25 }
  0xa1   : > { %3508 = vmatprep.subr.bf16.mxu0 %v3790_v47  ;;  %3540 = vmatpush3.bf16.msra.mxu1 %v3788_v33 }
  0xa2   : > { %3364 = vmatprep.mubr.bf16.mxu1 %v4170_v43  ;;  %3533 = vmatprep.subr.bf16.mxu1 %v3789_v44 }
  0xa3   : > { %3493 = vmatmul.mubr.bf16.gmra.mrb[12].mxu0 %v4286_v29 }
  0xa4   : > { %3509 = vmatpush3.bf16.msra.mxu0 %v3790_v47  ;;  %3512 = vmatprep.mubr.bf16.mxu0 %v4162_v35 }
  0xa5   : > { %3510 = vmatprep.subr.bf16.mxu0 %v3791_v50  ;;  %3541 = vmatpush3.bf16.msra.mxu1 %v3789_v44 }
  0xa6   : > { %3534 = vmatprep.subr.bf16.mxu1 %v3790_v47 }
  0xa8   : > { %3511 = vmatpush3.bf16.msra.mxu0 %v3791_v50  ;;  %3365 = vmatmul.mubr.bf16.gmra.mrb[12].mxu1 %v4354_v63 }
  0xa9   : > { %3542 = vmatpush3.bf16.msra.mxu1 %v3790_v47  ;;  %3520 = vmatprep.mubr.bf16.mxu1 %v4239_v0 }
  0xaa   : > { %3535 = vmatprep.subr.bf16.mxu1 %v3791_v50 }
  0xab   : > { %3513 = vmatmul.mubr.bf16.vlgmr.msra.gmra.mrb[0].mxu0 %v4183_v36 }
  0xac   : > { %3516 = vmatprep.mubr.bf16.mxu0 %v4204_v52 }
  0xad   : > { %3543 = vmatpush3.bf16.msra.mxu1 %v3791_v50 }
  0xb0   : > { %3521 = vmatmul.mubr.bf16.vlgmr.msra.gmra.mrb[16].mxu1 %v4262_v9 }
  0xb1   : > { %3524 = vmatprep.mubr.bf16.mxu1 %v4276_v18 }
  0xb3   : > { %3517 = vmatmul.mubr.bf16.gmra.mrb[4].mxu0 %v4216_v57 }
  0xb8   : > { %3525 = vmatmul.mubr.bf16.gmra.mrb[20].mxu1 %v608_v37 }
 0x163   : > { %v3354_v55 = vpop.f32.mrb[0].mxu1 }
 0x164   : > { %v1313_v62 = vpop.f32.mrb[1].mxu1 }
 0x165   : > { %v3355_v3 = vpop.f32.mrb[2].mxu1 }
 0x166   : > { %v1316_v4 = vpop.f32.mrb[3].mxu1 }
 0x16b   : > { %v3358_v16 = vpop.f32.mrb[4].mxu1 }
 0x16c   : > { %v1329_v35 = vpop.f32.mrb[5].mxu1 }
 0x16d   : > { %v3359_v36 = vpop.f32.mrb[6].mxu1 }
 0x16e   : > { %v3490_v15 = vpop.f32.mrb[8].mxu0  ;;  %v4432_v57 = vpop.f32.mrb[7].mxu1 }
 0x16f   : > { %v2187_v25 = vpop.f32.mrb[9].mxu0 }
 0x170   : > { %v3491_v43 = vpop.f32.mrb[10].mxu0 }
 0x171   : > { %v2190_v52 = vpop.f32.mrb[11].mxu0 }
 0x173   : > { %v3362_v9 = vpop.f32.mrb[8].mxu1 }
 0x174   : > { %v3552_v24 = vadd.f32 %v3490_v15, %v3362_v9  ;;  %v1345_v13 = vpop.f32.mrb[9].mxu1 }
 0x175   : > { %v3554_v18 = vadd.f32 %v2187_v25, %v1345_v13  ;;  %v3363_v19 = vpop.f32.mrb[10].mxu1 }
 0x176   : > { %v3494_v0 = vpop.f32.mrb[12].mxu0  ;;  %v3556_v22 = vadd.f32 %v3491_v43, %v3363_v19  ;;  %v1348_v20 = vpop.f32.mrb[11].mxu1 }
 0x177   : > { %v2203_v11 = vpop.f32.mrb[13].mxu0  ;;  %v3558_v28 = vadd.f32 %v2190_v52, %v1348_v20 }
 0x178   : > { %v3495_v14 = vpop.f32.mrb[14].mxu0 }
 0x179   : > { %v2206_v21 = vpop.f32.mrb[15].mxu0 }
 0x17b   : > { %v3366_v30 = vpop.f32.mrb[12].mxu1 }
 0x17c   : > { %v4434_v32 = vadd.f32 %v3494_v0, %v3366_v30  ;;  %v1361_v23 = vpop.f32.mrb[13].mxu1 }
 0x17d   : > { %v4436_v45 = vadd.f32 %v2203_v11, %v1361_v23  ;;  %v3367_v46 = vpop.f32.mrb[14].mxu1 }
 0x17e   : > { %v3514_v29 = vpop.f32.mrb[0].mxu0  ;;  %v4438_v49 = vadd.f32 %v3495_v14, %v3367_v46  ;;  %v1364_v51 = vpop.f32.mrb[15].mxu1 }
 0x17f   : > { %v3544_v31 = vadd.f32 %v3514_v29, %v3354_v55  ;;  %v2365_v38 = vpop.f32.mrb[1].mxu0  ;;  %v4440_v54 = vadd.f32 %v2206_v21, %v1364_v51 }
 0x180   : > { %v3545_v40 = vadd.f32 %v2365_v38, %v1313_v62  ;;  %v3515_v41 = vpop.f32.mrb[2].mxu0 }
 0x181   : > { %v2510_v34 = vmul.f32 0.1, %v3544_v31  ;;  %v3546_v37 = vadd.f32 %v3515_v41, %v3355_v3  ;;  %v2368_v48 = vpop.f32.mrb[3].mxu0  ;;  %vm2494_vm6 = vcmp.ge.f32.partialorder %v3544_v31, 0.0 }
 0x182   : > { %v2508_v42 = vmul.f32 0.1, %v3545_v40  ;;  %v3547_v53 = vadd.f32 %v2368_v48, %v1316_v4  ;;  %vm2492_vm7 = vcmp.ge.f32.partialorder %v3545_v40, 0.0 }
 0x183   : > { %vm2495_vm8 = vcmp.ge.f32.partialorder %v3546_v37, 0.0  ;;  %v2511_v56 = vmul.f32 0.1, %v3546_v37  ;;  %v2526_v58 = vsel %vm2494_vm6, %v3544_v31, %v2510_v34  ;;  %v3522_v1 = vpop.f32.mrb[16].mxu1 }
 0x184   : > { %vm2493_vm9 = vcmp.ge.f32.partialorder %v3547_v53, 0.0  ;;  %v2509_v26 = vmul.f32 0.1, %v3547_v53  ;;  %v2524_v60 = vsel %vm2492_vm7, %v3545_v40, %v2508_v42  ;;  %v3553_v39 = vadd.f32 %v3552_v24, %v3522_v1  ;;  %v2397_v7 = vpop.f32.mrb[17].mxu1 }
 0x185   : > { %v2527_v59 = vsel %vm2495_vm8, %v3546_v37, %v2511_v56  ;;  %v3555_v17 = vadd.f32 %v3554_v18, %v2397_v7  ;;  %v3523_v27 = vpop.f32.mrb[18].mxu1 }
 0x186   : > { %v3057_v63 = vpack.c.bf16 %v2527_v59, %v2526_v58  ;;  %v2525_v12 = vsel %vm2493_vm9, %v3547_v53, %v2509_v26  ;;  %v3518_v61 = vpop.f32.mrb[4].mxu0  ;;  %vm2502_vm10 = vcmp.ge.f32.partialorder %v3553_v39, 0.0  ;;  %v2518_v47 = vmul.f32 0.1, %v3553_v39  ;;  %v2400_v55 = vpop.f32.mrb[19].mxu1 }
 0x187   : > { %v3052_v2 = vpack.c.bf16 %v2525_v12, %v2524_v60  ;;  %v3548_v5 = vadd.f32 %v3518_v61, %v3358_v16  ;;  %v2381_v6 = vpop.f32.mrb[5].mxu0  ;;  %v3557_v50 = vadd.f32 %v3556_v22, %v3523_v27  ;;  %v2516_v62 = vmul.f32 0.1, %v3555_v17 }
 0x188   : > { %3089 = vst [vmem:[%s4447_s24 + $0x8] sm:$0xff] %v3057_v63   ;;  %v3549_v8 = vadd.f32 %v2381_v6, %v1329_v35  ;;  %v3519_v10 = vpop.f32.mrb[6].mxu0  ;;  %v3559_v3 = vadd.f32 %v3558_v28, %v2400_v55  ;;  %vm2500_vm12 = vcmp.ge.f32.partialorder %v3555_v17, 0.0  ;;  %v2534_v16 = vsel %vm2502_vm10, %v3553_v39, %v2518_v47 }
 0x189   : > { %3053 = vst [vmem:[%s4447_s24] sm:$0xff] %v3052_v2   ;;  %v3550_v33 = vadd.f32 %v3519_v10, %v3359_v36  ;;  %v2384_v44 = vpop.f32.mrb[7].mxu0  ;;  %vm2498_vm11 = vcmp.ge.f32.partialorder %v3548_v5, 0.0  ;;  %v2514_v4 = vmul.f32 0.1, %v3548_v5  ;;  %vm2503_vm13 = vcmp.ge.f32.partialorder %v3557_v50, 0.0 }
 0x18a   : > { %v2519_v15 = vmul.f32 0.1, %v3557_v50  ;;  %vm2496_vm14 = vcmp.ge.f32.partialorder %v3549_v8, 0.0  ;;  %vm2501_vm15 = vcmp.ge.f32.partialorder %v3559_v3, 0.0  ;;  %v2517_v25 = vmul.f32 0.1, %v3559_v3 }
 0x18b   : > { %vm2499_vm0 = vcmp.ge.f32.partialorder %v3550_v33, 0.0  ;;  %v2512_v43 = vmul.f32 0.1, %v3549_v8  ;;  %v2515_v36 = vmul.f32 0.1, %v3550_v33  ;;  %v3551_v52 = vadd.f32 %v2384_v44, %v4432_v57  ;;  %v3526_v13 = vpop.f32.mrb[20].mxu1 }
 0x18c   : > { %v2535_v35 = vsel %vm2503_vm13, %v3557_v50, %v2519_v15  ;;  %v2532_v0 = vsel %vm2500_vm12, %v3555_v17, %v2516_v62  ;;  %v2533_v11 = vsel %vm2501_vm15, %v3559_v3, %v2517_v25  ;;  %v2530_v24 = vsel %vm2498_vm11, %v3548_v5, %v2514_v4  ;;  %v2413_v19 = vpop.f32.mrb[21].mxu1 }
 0x18d   : > { %v3077_v9 = vpack.c.bf16 %v2535_v35, %v2534_v16  ;;  %v3072_v14 = vpack.c.bf16 %v2533_v11, %v2532_v0  ;;  %v3561_v18 = vadd.f32 %v4434_v32, %v3526_v13  ;;  %v2531_v21 = vsel %vm2499_vm0, %v3550_v33, %v2515_v36  ;;  %v3527_v28 = vpop.f32.mrb[22].mxu1 }
 0x18e   : > { %vm2497_vm1 = vcmp.ge.f32.partialorder %v3551_v52, 0.0  ;;  %v3563_v22 = vadd.f32 %v4436_v45, %v2413_v19  ;;  %v3067_v20 = vpack.c.bf16 %v2531_v21, %v2530_v24  ;;  %v2513_v57 = vmul.f32 0.1, %v3551_v52  ;;  %v2416_v38 = vpop.f32.mrb[23].mxu1 }
 0x18f   : > { %3093 = vst [vmem:[%s4447_s24 + $0x28] sm:$0xff] %v3077_v9   ;;  %3092 = vst [vmem:[%s4447_s24 + $0x20] sm:$0xff] %v3072_v14   ;;  %v2522_v29 = vmul.f32 0.1, %v3561_v18  ;;  %v2528_v30 = vsel %vm2496_vm14, %v3549_v8, %v2512_v43  ;;  %v3565_v31 = vadd.f32 %v4438_v49, %v3527_v28  ;;  %vm2506_vm2 = vcmp.ge.f32.partialorder %v3561_v18, 0.0 }
 0x190   : > { %v2520_v32 = vmul.f32 0.1, %v3563_v22  ;;  %3091 = vst [vmem:[%s4447_s24 + $0x18] sm:$0xff] %v3067_v20   ;;  %v2529_v23 = vsel %vm2497_vm1, %v3551_v52, %v2513_v57  ;;  %v3567_v40 = vadd.f32 %v4440_v54, %v2416_v38  ;;  %vm2504_vm3 = vcmp.ge.f32.partialorder %v3563_v22, 0.0 }
 0x191   : > { %vm2507_vm4 = vcmp.ge.f32.partialorder %v3565_v31, 0.0  ;;  %v2523_v41 = vmul.f32 0.1, %v3565_v31  ;;  %v3062_v45 = vpack.c.bf16 %v2529_v23, %v2528_v30  ;;  %v2538_v34 = vsel %vm2506_vm2, %v3561_v18, %v2522_v29 }
 0x192   : > { %vm2505_vm5 = vcmp.ge.f32.partialorder %v3567_v40, 0.0  ;;  %v2521_v46 = vmul.f32 0.1, %v3567_v40  ;;  %v2536_v48 = vsel %vm2504_vm3, %v3563_v22, %v2520_v32 }
 0x193   : > { %v2539_v37 = vsel %vm2507_vm4, %v3565_v31, %v2523_v41  ;;  %3090 = vst [vmem:[%s4447_s24 + $0x10] sm:$0xff] %v3062_v45  }
 0x194   : > { %v3087_v49 = vpack.c.bf16 %v2539_v37, %v2538_v34  ;;  %v2537_v51 = vsel %vm2505_vm5, %v3567_v40, %v2521_v46 }
 0x195   : > { %v3082_v42 = vpack.c.bf16 %v2537_v51, %v2536_v48 }
 0x196   : > { %3095 = vst [vmem:[%s4447_s24 + $0x38] sm:$0xff] %v3087_v49  }
 0x197   : > { %3094 = vst [vmem:[%s4447_s24 + $0x30] sm:$0xff] %v3082_v42  }
 0x198 PF: > { %s14_s19 = sadd.s32 1, %s3830_s19   ;;  %s4489_s15 = smov %s3822_s17 }
 0x199   : > { %p11_p0 = scmp.ge.s32.totalorder %s14_s19, 6   ;;  %s4490_s16 = smov %s3826_s18 }
 0x19a   : > { %s4491_s17 = smov %s4494_s20  ;;  %s4492_s18 = smov %s4498_s21 }
 0x19b   :  { %13 = sbr.rel (!%p11_p0) target bundleno = 3 (0x3), region = 80 }

// kernel: vggnet_block_forward.3
= control target key start
LH: loop header
LB: loop body
LE: loop exit
PB: predicated region body
PF: predicated region fallthrough
CT: control target
= control target key end

     0   :  { %s4371_s15 = smov 0   ;;  %s4373_s16 = smov 0   ;;  %s5137_s0 = inlined_call_operand.vmem [shape: bf16[2,16,16,128], index: 0, kind: input, shape index: {}, may-alias: {0,1,2}]   ;;  %s5138_s1 = inlined_call_operand.vmem [shape: bf16[2,16,16,128], index: 1, kind: input, shape index: {}, may-alias: {0,1,2}]   ;;  %s5139_s2 = inlined_call_operand.vmem [shape: bf16[2,16,16,128], index: 2, kind: input, shape index: {}, may-alias: {0,1,2}]   ;;  %s5140_s3 = inlined_call_operand.vmem [shape: bf16[3,3,128,128], index: 3, kind: input, shape index: {}]   ;;  %s5141_s4 = inlined_call_operand.vmem [shape: bf16[2,8,8,128], index: 4, kind: output, shape index: {}]  }
   0x1   :  { %s4375_s17 = smov 0   ;;  %s4377_s18 = smov 0  }
   0x2   :  { %s4379_s19 = smov 0  }
   0x3 LB: > { %s23_s20 = sadd.s32 1, %s4335_s17  ;;  %s26_s21 = sadd.s32 1, %s4339_s18  ;;  %s4343_s19 = sphi %s4379_s19, %s14_s19   ;;  %s4339_s18 = sphi %s4377_s18, %s5151_s18   ;;  %s4335_s17 = sphi %s4375_s17, %s5150_s17   ;;  %s4331_s16 = sphi %s4373_s16, %s5149_s16   ;;  %s4327_s15 = sphi %s4371_s15, %s5148_s15  }
   0x4   : > { %p24_p0 = scmp.ge.s32.totalorder %s23_s20, 2  ;;  %p3299_p1 = scmp.ge.s32.totalorder %s4343_s19, 1 }
   0x5   : > { %p248_p2 = scmp.lt.s32.totalorder %s4343_s19, 5 }
   0x6   : > { %s5153_s20 = smov (%p24_p0, %s23_s20), 0  ;;  %s5155_s21 = smov (!%p24_p0, %s26_s21), %s4339_s18 }
   0x7   : > { %p249_p3 = pnand %p3299_p1, %p248_p2  ;;  %p28_p4 = scmp.ge.s32.totalorder %s5155_s21, 2 }
   0x8   : > { %v4225_v0 = vld [vmem:[%s5140_s3] sm:$0xff] (!%p249_p3)   ;;  %s4407_s24 = sshll.u32 (!%p249_p3), %s4327_s15, 3  ;;  %p310_p5 = scmp.lt.s32.totalorder (!%p249_p3), %s4331_s16, 1  ;;  %v4227_v2 = vld [vmem:[%s5140_s3 + $0x8] sm:$0xff] (!%p249_p3)   ;;  %v4229_v4 = vld [vmem:[%s5140_s3 + $0x10] sm:$0xff] (!%p249_p3)   ;;  %vm551_vm0 = vcmask (!%p249_p3), 1040384  }
   0x9   : > { %s5157_s21 = smov (%p28_p4, %s5155_s21), 0  ;;  %252 = sbr.rel (%p249_p3) target bundleno = 503 (0x1f7), region = 36 }
   0xa   : > { %v4226_v1 = vld [vmem:[%s5140_s3 + $0x100] sm:$0xff] (!%p249_p3)   ;;  %3752 = vmatprep.subr.bf16.mxu1 (!%p249_p3), %v4225_v0  ;;  %p312_p6 = scmp.lt.s32.totalorder (!%p249_p3), %s4407_s24, 15  ;;  %v4228_v3 = vld [vmem:[%s5140_s3 + $0x108] sm:$0xff] (!%p249_p3)   ;;  %v4230_v5 = vld [vmem:[%s5140_s3 + $0x110] sm:$0xff] (!%p249_p3)   ;;  %s3305_s13 = sadd.s32 (!%p249_p3), 4294967295, %s4407_s24  ;;  %vm594_vm3 = vcmask (!%p249_p3), 1047552  }
   0xb   : > { %3880 = vmatprep.subr.bf16.mxu0 (!%p249_p3), %v4226_v1  ;;  %3753 = vmatpush3.bf16.msra.mxu1 (!%p249_p3), %v4225_v0  ;;  %v4231_v6 = vld [vmem:[%s5140_s3 + $0x18] sm:$0xff] (!%p249_p3)   ;;  %p322_p7 = scmp.gt.s32.totalorder (!%p249_p3), %s3305_s13, 0  ;;  %p3306_p8 = scmp.lt.s32.totalorder (!%p249_p3), %s3305_s13, 15  ;;  %v4233_v8 = vld [vmem:[%s5140_s3 + $0x20] sm:$0xff] (!%p249_p3)   ;;  %v4235_v10 = vld [vmem:[%s5140_s3 + $0x28] sm:$0xff] (!%p249_p3)   ;;  %vm2722_vm10 = vcmask (!%p249_p3), 1041408  }
   0xc   : > { %3881 = vmatpush3.bf16.msra.mxu0 (!%p249_p3), %v4226_v1  ;;  %3754 = vmatprep.subr.bf16.mxu1 (!%p249_p3), %v4227_v2  ;;  %v4232_v7 = vld [vmem:[%s5140_s3 + $0x118] sm:$0xff] (!%p249_p3)   ;;  %v4234_v9 = vld [vmem:[%s5140_s3 + $0x120] sm:$0xff] (!%p249_p3)   ;;  %v4236_v11 = vld [vmem:[%s5140_s3 + $0x128] sm:$0xff] (!%p249_p3)   ;;  %p367_p9 = scmp.eq.s32.totalorder (!%p249_p3), %s4327_s15, 0  ;;  %vm552_vm1 = vsmask.f32 (!%p249_p3), 256 }
   0xd   : > { %3882 = vmatprep.subr.bf16.mxu0 (!%p249_p3), %v4228_v3  ;;  %v4237_v13 = vld [vmem:[%s5140_s3 + $0x30] sm:$0xff] (!%p249_p3)   ;;  %v4239_v15 = vld [vmem:[%s5140_s3 + $0x38] sm:$0xff] (!%p249_p3)   ;;  %v4483_v18 = vld [vmem:[%s5140_s3 + $0x40] sm:$0xff] (!%p249_p3)   ;;  %vm595_vm4 = vsmask.f32 (!%p249_p3), 7424  ;;  %s3575_s9 = sadd.s32 (!%p249_p3), 8, %s4407_s24 }
   0xe   : > { %v4238_v14 = vld [vmem:[%s5140_s3 + $0x130] sm:$0xff] (!%p249_p3)   ;;  %v4240_v16 = vld [vmem:[%s5140_s3 + $0x138] sm:$0xff] (!%p249_p3)   ;;  %v4244_v19 = vld [vmem:[%s5140_s3 + $0x140] sm:$0xff] (!%p249_p3)   ;;  %p4652_p11 = scmp.lt.s32.totalorder (!%p249_p3), %s3575_s9, 15  ;;  %p387_p12 = scmp.eq.s32.totalorder (!%p249_p3), %s4327_s15, 1  ;;  %vm3107_vm13 = vcmask (!%p249_p3), 1041409  }
   0xf   : > { %3755 = vmatpush3.bf16.msra.mxu1 (!%p249_p3), %v4227_v2  ;;  %v4246_v25 = vld [vmem:[%s5140_s3 + $0x148] sm:$0xff] (!%p249_p3)   ;;  %v4250_v36 = vld [vmem:[%s5140_s3 + $0x150] sm:$0xff] (!%p249_p3)   ;;  %vm4523_vm2 = vmand (!%p249_p3), %vm551_vm0, %vm552_vm1  ;;  %vm3109_vm15 = vcmask (!%p249_p3), 1042434   ;;  %vm3111_vm0 = vcmask (!%p249_p3), 1043459   ;;  %vm3113_vm1 = vcmask (!%p249_p3), 1044484  }
  0x10   : > { %s5159_s16 = smov (!%p310_p5, %s4331_s16), 1  ;;  %3883 = vmatpush3.bf16.msra.mxu0 %v4228_v3  ;;  %3756 = vmatprep.subr.bf16.mxu1 %v4229_v4  ;;  %s5161_s13 = smov (!%p322_p7, %s3305_s13), 0  ;;  %v4252_v46 = vld [vmem:[%s5140_s3 + $0x158] sm:$0xff]   ;;  %v4245_v55 = vld [vmem:[%s5140_s3 + $0x48] sm:$0xff]   ;;  %v4256_v58 = vld [vmem:[%s5140_s3 + $0x160] sm:$0xff]  }
  0x11   : > { %s313_s7 = scalar_select %p312_p6, %s4407_s24, 15  ;;  %3884 = vmatprep.subr.bf16.mxu0 %v4230_v5  ;;  %v4248_v61 = vld [vmem:[%s5140_s3 + $0x50] sm:$0xff]   ;;  %v4258_v2 = vld [vmem:[%s5140_s3 + $0x168] sm:$0xff]   ;;  %v4251_v3 = vld [vmem:[%s5140_s3 + $0x58] sm:$0xff]  }
  0x12   : > { %s4429_s11 = sshll.u32 %s5159_s16, 5  ;;  %s5163_s13 = smov (!%p3306_p8, %s5161_s13), 15  ;;  %vm4612_vm5 = vmand %vm594_vm3, %vm595_vm4  ;;  %v4297_v44 = vld [vmem:[%s5140_s3 + $0x200] sm:$0xff]   ;;  %vm3115_vm3 = vcmask 1045509   ;;  %vm3117_vm4 = vcmask 1046534  }
  0x13   : > { %s3301_s10 = sshll.u32 %s313_s7, 1  ;;  %3757 = vmatpush3.bf16.msra.mxu1 %v4229_v4  ;;  %s5167_s9 = smov (!%p4652_p11, %s3575_s9), 15 }
  0x14   : > { %s316_s12 = sadd.s32 %s4429_s11, %s3301_s10  ;;  %3885 = vmatpush3.bf16.msra.mxu0 %v4230_v5  ;;  %3758 = vmatprep.subr.bf16.mxu1 %v4231_v6  ;;  %s3311_s10 = sshll.u32 %s5163_s13, 1 }
  0x15   : > { %s3303_s26 = sshll.u32 %s316_s12, 2  ;;  %3886 = vmatprep.subr.bf16.mxu0 %v4232_v7  ;;  %s330_s22 = sadd.s32 %s3311_s10, %s4429_s11 }
  0x16   : > { %s4448_s7 = scalar_lea.vmem %s5137_s0, %s3303_s26  ;;  %s3313_s28 = sshll.u32 %s330_s22, 2 }
  0x17   : > { %3759 = vmatpush3.bf16.msra.mxu1 %v4231_v6  ;;  %v4458_v12 = vld [vmem:[%s4448_s7] sm:$0xff]   ;;  %s368_s26 = scalar_select %p367_p9, 0.0, 1.0  ;;  %v4478_v17 = vld [vmem:[%s4448_s7 + $0x8] sm:$0xff]   ;;  %v4491_v24 = vld [vmem:[%s4448_s7 + $0x10] sm:$0xff]  }
  0x18   : > { %3887 = vmatpush3.bf16.msra.mxu0 %v4232_v7  ;;  %3760 = vmatprep.subr.bf16.mxu1 %v4233_v8  ;;  %s332_s23 = scalar_lea.vmem %s5138_s1, %s3313_s28  ;;  %v479_v22 = vshrl.u32 %v4458_v12, 16  ;;  %v486_v23 = vshrl.u32 %v4478_v17, 16  ;;  %v4498_v27 = vld [vmem:[%s4448_s7 + $0x18] sm:$0xff]   ;;  %v482_v30 = vshll.u32 %v4458_v12, 16  ;;  %v489_v33 = vshll.u32 %v4478_v17, 16  ;;  %v4538_v50 = vld [vmem:[%s4448_s7 + $0x20] sm:$0xff]  }
  0x19   : > { %3888 = vmatprep.subr.bf16.mxu0 %v4234_v9  ;;  %3896 = vmatprep.mubr.bf16.mxu0 %v4458_v12  ;;  %s371_s29 = sshrl.u32 %s368_s26, 16  ;;  %p370_p10 = scmp.ne.f32.partialorder %s368_s26, %s368_s26  ;;  %v365_v20 = vld [vmem:[%s332_s23] sm:$0xf]  ;;  %v366_v21 = vld [vmem:[%s332_s23 + $0x4] sm:$0xf]  ;;  %v493_v34 = vshrl.u32 %v4491_v24, 16 }
  0x1a   : > { %s372_s6 = sand.u32 1, %s371_s29  ;;  %v481_v31 = vrot.slane %v479_v22, 7  ;;  %v488_v32 = vrot.slane %v486_v23, 7  ;;  %v500_v37 = vshrl.u32 %v4498_v27, 16  ;;  %v496_v42 = vshll.u32 %v4491_v24, 16  ;;  %v4548_v53 = vld [vmem:[%s4448_s7 + $0x28] sm:$0xff]  }
  0x1b   : > { %3761 = vmatpush3.bf16.msra.mxu1 %v4233_v8  ;;  %s373_s10 = sadd.s32 32767, %s372_s6  ;;  %v495_v41 = vrot.slane %v493_v34, 7  ;;  %v503_v48 = vshll.u32 %v4498_v27, 16  ;;  %v507_v59 = vshrl.u32 %v4538_v50, 16  ;;  %v514_v62 = vshrl.u32 %v4548_v53, 16  ;;  %v4595_v7 = vld [vmem:[%s4448_s7 + $0x30] sm:$0xff]  }
  0x1c   : > { %3889 = vmatpush3.bf16.msra.mxu0 %v4234_v9  ;;  %3762 = vmatprep.subr.bf16.mxu1 %v4235_v10  ;;  %s374_s22 = sadd.s32 %s373_s10, %s368_s26  ;;  %v484_v40 = vor.u32 %v482_v30, %v481_v31  ;;  %v491_v45 = vor.u32 %v489_v33, %v488_v32  ;;  %v502_v47 = vrot.slane %v500_v37, 7  ;;  %v510_v63 = vshll.u32 %v4538_v50, 16  ;;  %v4262_v8 = vld [vmem:[%s5140_s3 + $0x170] sm:$0xff]   ;;  %v4266_v31 = vld [vmem:[%s5140_s3 + $0x180] sm:$0xff]   ;;  %s5169_s9 = smov (!%p4652_p11, %s5167_s9), 15 }
  0x1d   : > { %3890 = vmatprep.subr.bf16.mxu0 %v4236_v11  ;;  %s375_s25 = sand.u32 4294901760, %s374_s22  ;;  %v498_v52 = vor.u32 %v496_v42, %v495_v41  ;;  %v566_v0 = vrot.slane %v482_v30, 1  ;;  %v509_v4 = vrot.slane %v507_v59, 7  ;;  %v517_v5 = vshll.u32 %v4548_v53, 16  ;;  %s4693_s24 = sshll.u32 %s5169_s9, 1 }
  0x1e   : > { %s5165_s25 = smov (%p370_p10, %s375_s25), 2143289344  ;;  %v4542_v51 = vsel %vm4523_vm2, 0, %v484_v40  ;;  %v4557_v56 = vsel %vm4523_vm2, 0, %v491_v45  ;;  %v505_v57 = vor.u32 %v503_v48, %v502_v47  ;;  %v516_v6 = vrot.slane %v514_v62, 7  ;;  %v4268_v40 = vld [vmem:[%s5140_s3 + $0x188] sm:$0xff]   ;;  %v4263_v45 = vld [vmem:[%s5140_s3 + $0x78] sm:$0xff]   ;;  %s347_s8 = sadd.s32 %s4693_s24, %s4429_s11 }
  0x1f   : > { %3763 = vmatpush3.bf16.msra.mxu1 %v4235_v10  ;;  %s378_s26 = sshrl.u32 %s5165_s25, 16  ;;  %v4571_v60 = vsel %vm4523_vm2, 0, %v498_v52  ;;  %v512_v9 = vor.u32 %v510_v63, %v509_v4  ;;  %v4605_v10 = vld [vmem:[%s4448_s7 + $0x38] sm:$0xff]   ;;  %v4270_v47 = vld [vmem:[%s5140_s3 + $0x190] sm:$0xff]   ;;  %v4276_v4 = vld [vmem:[%s5140_s3 + $0x1a8] sm:$0xff]  }
  0x20   : > { %3891 = vmatpush3.bf16.msra.mxu0 %v4236_v11  ;;  %3764 = vmatprep.subr.bf16.mxu1 %v4237_v13  ;;  %s379_s28 = sshll.u32 %s378_s26, 16  ;;  %v4580_v1 = vsel %vm4523_vm2, 0, %v505_v57  ;;  %v567_v11 = vor.u32 %v566_v0, %v479_v22  ;;  %v4257_v22 = vld [vmem:[%s5140_s3 + $0x68] sm:$0xff]   ;;  %v4269_v0 = vld [vmem:[%s5140_s3 + $0x90] sm:$0xff]  }
  0x21   : > { %3892 = vmatprep.subr.bf16.mxu0 %v4238_v14  ;;  %s380_s5 = sor.u32 %s379_s28, %s378_s26  ;;  %s3320_s28 = sshll.u32 %s347_s8, 2 }
  0x22   : > { %v381_v26 = vstv %s380_s5  ;;  %s388_s13 = scalar_select %p387_p12, 0.0, 1.0 }
  0x23   : > { %3765 = vmatpush3.bf16.msra.mxu1 %v4237_v13  ;;  %v383_v28 = vmul.bf16 %v381_v26, %v365_v20  ;;  %v384_v29 = vmul.bf16 %v381_v26, %v366_v21  ;;  %v521_v13 = vshrl.u32 %v4595_v7, 16  ;;  %v570_v20 = vrot.slane %v496_v42, 1  ;;  %s349_s8 = scalar_lea.vmem %s5139_s2, %s3320_s28  ;;  %s3321_s28 = sshll.u32 %s4327_s15, 2 }
  0x24   : > { %3893 = vmatpush3.bf16.msra.mxu0 %v4238_v14  ;;  %3766 = vmatprep.subr.bf16.mxu1 %v4239_v15  ;;  %v4631_v21 = vsel %vm4523_vm2, 0, %v512_v9  ;;  %v574_v42 = vrot.slane %v510_v63, 1  ;;  %v4274_v63 = vld [vmem:[%s5140_s3 + $0x1a0] sm:$0xff]   ;;  %s391_s5 = sshrl.u32 %s388_s13, 16  ;;  %p390_p13 = scmp.ne.f32.partialorder %s388_s13, %s388_s13 }
  0x25   : > { %3894 = vmatprep.subr.bf16.mxu0 %v4240_v16  ;;  %v4508_v35 = vcombine.low %v383_v28, %v384_v29  ;;  %v523_v26 = vrot.slane %v521_v13, 7  ;;  %v524_v28 = vshll.u32 %v4595_v7, 16  ;;  %v571_v32 = vor.u32 %v570_v20, %v493_v34  ;;  %s392_s6 = sand.u32 1, %s391_s5  ;;  %v385_v9 = vld [vmem:[%s349_s8] sm:$0xf]  ;;  %p5012_p0 = scmp.lt.s32.totalorder %s3321_s28, 7 }
  0x26   : > { %v572_v34 = vrot.slane %v503_v48, 1  ;;  %v576_v48 = vrot.slane %v517_v5, 1  ;;  %s393_s7 = sadd.s32 32767, %s392_s6  ;;  %s3322_s6 = sshll.u32 %s5159_s16, 3 }
  0x27   : > { %3767 = vmatpush3.bf16.msra.mxu1 %v4239_v15  ;;  %v472_v38 = vshrl.u32 %v4508_v35, 16  ;;  %v475_v39 = vshll.u32 %v4508_v35, 16  ;;  %v568_v15 = vrot.slane %v489_v33, 1  ;;  %v4260_v33 = vld [vmem:[%s5140_s3 + $0x70] sm:$0xff]   ;;  %v4684_v41 = vsel %vm4612_vm5, %v571_v32, 0  ;;  %s394_s12 = sadd.s32 %s393_s7, %s388_s13  ;;  %s5173_s28 = smov (!%p5012_p0, %s3321_s28), 7 }
  0x28   : > { %3895 = vmatpush3.bf16.msra.mxu0 %v4240_v16  ;;  %3784 = vmatprep.subr.bf16.mxu1 %v4483_v18  ;;  %v4254_v16 = vld [vmem:[%s5140_s3 + $0x60] sm:$0xff]   ;;  %s395_s14 = sand.u32 4294901760, %s394_s12  ;;  %s360_s15 = sadd.s32 %s3322_s6, %s5173_s28 }
  0x29   : > { %3912 = vmatprep.subr.bf16.mxu0 %v4244_v19  ;;  %v474_v43 = vrot.slane %v472_v38, 7  ;;  %v569_v30 = vor.u32 %v568_v15, %v486_v23  ;;  %v526_v23 = vor.u32 %v524_v28, %v523_v26  ;;  %s5171_s14 = smov (%p390_p13, %s395_s14), 2143289344  ;;  %v4273_v15 = vld [vmem:[%s5140_s3 + $0xa0] sm:$0xff]   ;;  %s3323_s16 = sshll.u32 %s360_s15, 2 }
  0x2a   : > { %s398_s29 = sshrl.u32 %s5171_s14, 16  ;;  %s5048_s9 = scalar_lea.vmem %s5141_s4, %s3323_s16 }
  0x2b   : > { %3897 = vmatmul.mubr.bf16.vlgmr.msra.gmra.mrb[0].mxu0 %v4478_v17  ;;  %v477_v49 = vor.u32 %v475_v39, %v474_v43  ;;  %v4690_v43 = vsel %vm4523_vm2, 0, %v526_v23  ;;  %s399_s30 = sshll.u32 %s398_s29, 16 }
  0x2c   : > { %3913 = vmatpush3.bf16.msra.mxu0 %v4244_v19  ;;  %3900 = vmatprep.mubr.bf16.mxu0 %v4491_v24  ;;  %v4264_v19 = vld [vmem:[%s5140_s3 + $0x178] sm:$0xff]   ;;  %s400_s13 = sor.u32 %s399_s30, %s398_s29 }
  0x2d   : > { %3914 = vmatprep.subr.bf16.mxu0 %v4246_v25  ;;  %v554_v54 = vsel %vm4523_vm2, 0, %v477_v49  ;;  %v575_v49 = vor.u32 %v574_v42, %v507_v59  ;;  %v4267_v59 = vld [vmem:[%s5140_s3 + $0x88] sm:$0xff]  }
  0x2e   : > { %3768 = vmatprep.mubr.bf16.mxu1 %v554_v54  ;;  %v4272_v54 = vld [vmem:[%s5140_s3 + $0x198] sm:$0xff]  }
  0x2f   : > { %3769 = vmatmul.mubr.bf16.vlgmr.msra.gmra.mrb[0].mxu1 %v4542_v51  ;;  %v4727_v57 = vsel %vm4612_vm5, %v575_v49, 0 }
  0x30   : > { %3915 = vmatpush3.bf16.msra.mxu0 %v4246_v25  ;;  %3785 = vmatpush3.bf16.msra.mxu1 %v4483_v18  ;;  %v519_v18 = vor.u32 %v517_v5, %v516_v6  ;;  %v4638_v25 = vsel %vm4612_vm5, %v567_v11, 0  ;;  %v4271_v6 = vld [vmem:[%s5140_s3 + $0x98] sm:$0xff]   ;;  %v386_v11 = vld [vmem:[%s349_s8 + $0x4] sm:$0xf] }
  0x31   : > { %3916 = vmatprep.subr.bf16.mxu0 %v4250_v36  ;;  %3772 = vmatprep.mubr.bf16.mxu1 %v4557_v56 }
  0x32   : > { %3786 = vmatprep.subr.bf16.mxu1 %v4245_v55  ;;  %v4646_v29 = vsel %vm4523_vm2, 0, %v519_v18  ;;  %v401_v18 = vstv %s400_s13 }
  0x33   : > { %3901 = vmatmul.mubr.bf16.gmra.mrb[4].mxu0 %v4498_v27  ;;  %v403_v20 = vmul.bf16 %v401_v18, %v385_v9  ;;  %v4295_v9 = vld [vmem:[%s5140_s3 + $0xf8] sm:$0xff]  }
  0x34   : > { %3917 = vmatpush3.bf16.msra.mxu0 %v4250_v36  ;;  %3904 = vmatprep.mubr.bf16.mxu0 %v4538_v50  ;;  %v4673_v36 = vsel %vm4612_vm5, %v569_v30, 0  ;;  %v564_v30 = vrot.slane %v475_v39, 1  ;;  %v4277_v39 = vld [vmem:[%s5140_s3 + $0xb0] sm:$0xff]  }
  0x35   : > { %3918 = vmatprep.subr.bf16.mxu0 %v4252_v46  ;;  %3787 = vmatpush3.bf16.msra.mxu1 %v4245_v55  ;;  %v577_v55 = vor.u32 %v576_v48, %v514_v62  ;;  %v4288_v48 = vld [vmem:[%s5140_s3 + $0x1d8] sm:$0xff]  }
  0x36   : > { %3788 = vmatprep.subr.bf16.mxu1 %v4248_v61 }
  0x37   : > { %3773 = vmatmul.mubr.bf16.gmra.mrb[4].mxu1 %v4571_v60  ;;  %v4737_v62 = vsel %vm4612_vm5, %v577_v55, 0 }
  0x38   : > { %3919 = vmatpush3.bf16.msra.mxu0 %v4252_v46  ;;  %3776 = vmatprep.mubr.bf16.mxu1 %v4580_v1  ;;  %v573_v46 = vor.u32 %v572_v34, %v500_v37  ;;  %v4265_v37 = vld [vmem:[%s5140_s3 + $0x80] sm:$0xff]   ;;  %v565_v34 = vor.u32 %v564_v30, %v472_v38 }
  0x39   : > { %3920 = vmatprep.subr.bf16.mxu0 %v4256_v58  ;;  %3789 = vmatpush3.bf16.msra.mxu1 %v4248_v61  ;;  %v531_v61 = vshll.u32 %v4605_v10, 16 }
  0x3a   : > { %3790 = vmatprep.subr.bf16.mxu1 %v4251_v3  ;;  %v4717_v52 = vsel %vm4612_vm5, %v573_v46, 0  ;;  %v597_v38 = vsel %vm4612_vm5, %v565_v34, 0  ;;  %v4286_v46 = vld [vmem:[%s5140_s3 + $0x1d0] sm:$0xff]  }
  0x3b   : > { %3905 = vmatmul.mubr.bf16.gmra.mrb[8].mxu0 %v4548_v53 }
  0x3c   : > { %3921 = vmatpush3.bf16.msra.mxu0 %v4256_v58  ;;  %3908 = vmatprep.mubr.bf16.mxu0 %v4595_v7  ;;  %v578_v58 = vrot.slane %v524_v28, 1  ;;  %v4275_v28 = vld [vmem:[%s5140_s3 + $0xa8] sm:$0xff]  }
  0x3d   : > { %3922 = vmatprep.subr.bf16.mxu0 %v4258_v2  ;;  %3791 = vmatpush3.bf16.msra.mxu1 %v4251_v3  ;;  %v528_v3 = vshrl.u32 %v4605_v10, 16 }
  0x3e   : > { %3792 = vmatprep.subr.bf16.mxu1 %v4254_v16 }
  0x3f   : > { %3777 = vmatmul.mubr.bf16.gmra.mrb[8].mxu1 %v4631_v21  ;;  %v530_v49 = vrot.slane %v528_v3, 7 }
  0x40   : > { %3923 = vmatpush3.bf16.msra.mxu0 %v4258_v2  ;;  %3780 = vmatprep.mubr.bf16.mxu1 %v4646_v29  ;;  %v579_v2 = vor.u32 %v578_v58, %v521_v13  ;;  %v4278_v13 = vld [vmem:[%s5140_s3 + $0x1b0] sm:$0xff]  }
  0x41   : > { %3924 = vmatprep.subr.bf16.mxu0 %v4262_v8  ;;  %3793 = vmatpush3.bf16.msra.mxu1 %v4254_v16  ;;  %v533_v55 = vor.u32 %v531_v61, %v530_v49  ;;  %v4285_v58 = vld [vmem:[%s5140_s3 + $0xd0] sm:$0xff]  }
  0x42   : > { %3794 = vmatprep.subr.bf16.mxu1 %v4257_v22  ;;  %v4763_v5 = vsel %vm4612_vm5, %v579_v2, 0  ;;  %v4294_v2 = vld [vmem:[%s5140_s3 + $0x1f0] sm:$0xff]  }
  0x43   : > { %3909 = vmatmul.mubr.bf16.gmra.mrb[12].mxu0 %v4605_v10 }
  0x44   : > { %3925 = vmatpush3.bf16.msra.mxu0 %v4262_v8  ;;  %3928 = vmatprep.mubr.bf16.mxu0 %v4638_v25 }
  0x45   : > { %3926 = vmatprep.subr.bf16.mxu0 %v4264_v19  ;;  %3795 = vmatpush3.bf16.msra.mxu1 %v4257_v22  ;;  %v404_v22 = vmul.bf16 %v401_v18, %v386_v11  ;;  %v4299_v11 = vld [vmem:[%s5140_s3 + $0x210] sm:$0xff]  }
  0x46   : > { %3796 = vmatprep.subr.bf16.mxu1 %v4260_v33 }
  0x47   : > { %3781 = vmatmul.mubr.bf16.gmra.mrb[12].mxu1 %v4690_v43  ;;  %v4789_v26 = vcombine.low %v403_v20, %v404_v22 }
  0x48   : > { %3927 = vmatpush3.bf16.msra.mxu0 %v4264_v19  ;;  %3800 = vmatprep.mubr.bf16.mxu1 %v4508_v35  ;;  %v4280_v19 = vld [vmem:[%s5140_s3 + $0x1b8] sm:$0xff]  }
  0x49   : > { %3944 = vmatprep.subr.bf16.mxu0 %v4266_v31  ;;  %3797 = vmatpush3.bf16.msra.mxu1 %v4260_v33  ;;  %v538_v32 = vshll.u32 %v4789_v26, 16  ;;  %v535_v23 = vshrl.u32 %v4789_v26, 16  ;;  %v4279_v35 = vld [vmem:[%s5140_s3 + $0xb8] sm:$0xff]  }
  0x4a   : > { %3798 = vmatprep.subr.bf16.mxu1 %v4263_v45 }
  0x4b   : > { %3929 = vmatmul.mubr.bf16.vlgmr.msra.gmra.mrb[0].mxu0 %v4673_v36  ;;  %v582_v33 = vrot.slane %v538_v32, 1 }
  0x4c   : > { %3945 = vmatpush3.bf16.msra.mxu0 %v4266_v31  ;;  %3932 = vmatprep.mubr.bf16.mxu0 %v4684_v41  ;;  %v4282_v31 = vld [vmem:[%s5140_s3 + $0x1c0] sm:$0xff]  }
  0x4d   : > { %3946 = vmatprep.subr.bf16.mxu0 %v4268_v40  ;;  %3799 = vmatpush3.bf16.msra.mxu1 %v4263_v45  ;;  %v4812_v42 = vor.u32 %v582_v33, %v535_v23 }
  0x4e   : > { %3816 = vmatprep.subr.bf16.mxu1 %v4265_v37 }
  0x4f   : > { %v606_v45 = vsel %vm4612_vm5, %v4812_v42, 0 }
  0x50   : > { %3947 = vmatpush3.bf16.msra.mxu0 %v4268_v40  ;;  %3801 = vmatmul.mubr.bf16.vlgmr.msra.gmra.mrb[0].mxu1 %v4458_v12  ;;  %v580_v12 = vrot.slane %v531_v61, 1  ;;  %v4284_v40 = vld [vmem:[%s5140_s3 + $0x1c8] sm:$0xff]   ;;  %v4287_v61 = vld [vmem:[%s5140_s3 + $0xd8] sm:$0xff]  }
  0x51   : > { %3948 = vmatprep.subr.bf16.mxu0 %v4270_v47  ;;  %3817 = vmatpush3.bf16.msra.mxu1 %v4265_v37  ;;  %v4283_v37 = vld [vmem:[%s5140_s3 + $0xc8] sm:$0xff]  }
  0x52   : > { %3804 = vmatprep.mubr.bf16.mxu1 %v4478_v17  ;;  %3818 = vmatprep.subr.bf16.mxu1 %v4267_v59  ;;  %v581_v8 = vor.u32 %v580_v12, %v528_v3  ;;  %v4289_v3 = vld [vmem:[%s5140_s3 + $0xe0] sm:$0xff]  }
  0x53   : > { %3933 = vmatmul.mubr.bf16.gmra.mrb[4].mxu0 %v4717_v52 }
  0x54   : > { %3949 = vmatpush3.bf16.msra.mxu0 %v4270_v47  ;;  %3936 = vmatprep.mubr.bf16.mxu0 %v4727_v57  ;;  %v4783_v16 = vsel %vm4612_vm5, %v581_v8, 0  ;;  %v4281_v47 = vld [vmem:[%s5140_s3 + $0xc0] sm:$0xff]   ;;  %v4293_v8 = vld [vmem:[%s5140_s3 + $0xf0] sm:$0xff]   ;;  %vm3119_vm5 = vcmask 1047559  }
  0x55   : > { %3950 = vmatprep.subr.bf16.mxu0 %v4272_v54  ;;  %3819 = vmatpush3.bf16.msra.mxu1 %v4267_v59  ;;  %v537_v59 = vrot.slane %v535_v23, 7 }
  0x56   : > { %3820 = vmatprep.subr.bf16.mxu1 %v4269_v0 }
  0x58   : > { %3951 = vmatpush3.bf16.msra.mxu0 %v4272_v54  ;;  %3805 = vmatmul.mubr.bf16.gmra.mrb[4].mxu1 %v4491_v24  ;;  %v4290_v54 = vld [vmem:[%s5140_s3 + $0x1e0] sm:$0xff]  }
  0x59   : > { %3952 = vmatprep.subr.bf16.mxu0 %v4274_v63  ;;  %3821 = vmatpush3.bf16.msra.mxu1 %v4269_v0  ;;  %v540_v0 = vor.u32 %v538_v32, %v537_v59 }
  0x5a   : > { %3808 = vmatprep.mubr.bf16.mxu1 %v4498_v27  ;;  %3822 = vmatprep.subr.bf16.mxu1 %v4271_v6 }
  0x5b   : > { %3937 = vmatmul.mubr.bf16.gmra.mrb[8].mxu0 %v4737_v62  ;;  %v563_v12 = vsel %vm4523_vm2, 0, %v540_v0 }
  0x5c   : > { %3953 = vmatpush3.bf16.msra.mxu0 %v4274_v63  ;;  %3940 = vmatprep.mubr.bf16.mxu0 %v4763_v5  ;;  %v4292_v63 = vld [vmem:[%s5140_s3 + $0x1e8] sm:$0xff]  }
  0x5d   : > { %3954 = vmatprep.subr.bf16.mxu0 %v4276_v4  ;;  %3823 = vmatpush3.bf16.msra.mxu1 %v4271_v6  ;;  %v4291_v6 = vld [vmem:[%s5140_s3 + $0xe8] sm:$0xff]  }
  0x5e   : > { %3824 = vmatprep.subr.bf16.mxu1 %v4273_v15 }
  0x60   : > { %3955 = vmatpush3.bf16.msra.mxu0 %v4276_v4  ;;  %3809 = vmatmul.mubr.bf16.gmra.mrb[8].mxu1 %v4538_v50  ;;  %v4296_v4 = vld [vmem:[%s5140_s3 + $0x1f8] sm:$0xff]  }
  0x61   : > { %3956 = vmatprep.subr.bf16.mxu0 %v4278_v13  ;;  %3825 = vmatpush3.bf16.msra.mxu1 %v4273_v15 }
  0x62   : > { %3812 = vmatprep.mubr.bf16.mxu1 %v4548_v53  ;;  %3826 = vmatprep.subr.bf16.mxu1 %v4275_v28 }
  0x63   : > { %3941 = vmatmul.mubr.bf16.gmra.mrb[12].mxu0 %v4783_v16 }
  0x64   : > { %3957 = vmatpush3.bf16.msra.mxu0 %v4278_v13  ;;  %3960 = vmatprep.mubr.bf16.mxu0 %v4557_v56 }
  0x65   : > { %3958 = vmatprep.subr.bf16.mxu0 %v4280_v19  ;;  %3827 = vmatpush3.bf16.msra.mxu1 %v4275_v28 }
  0x66   : > { %3828 = vmatprep.subr.bf16.mxu1 %v4277_v39 }
  0x68   : > { %3959 = vmatpush3.bf16.msra.mxu0 %v4280_v19  ;;  %3813 = vmatmul.mubr.bf16.gmra.mrb[12].mxu1 %v4595_v7  ;;  %v2558_v19 = vlaneseq }
  0x69   : > { %3976 = vmatprep.subr.bf16.mxu0 %v4282_v31  ;;  %3829 = vmatpush3.bf16.msra.mxu1 %v4277_v39 }
  0x6a   : > { %3832 = vmatprep.mubr.bf16.mxu1 %v597_v38  ;;  %3830 = vmatprep.subr.bf16.mxu1 %v4279_v35  ;;  %v2559_v33 = vshrl.u32 %v2558_v19, 7 }
  0x6b   : > { %3961 = vmatmul.mubr.bf16.vlgmr.msra.gmra.mrb[0].mxu0 %v4571_v60 }
  0x6c   : > { %3977 = vmatpush3.bf16.msra.mxu0 %v4282_v31  ;;  %3964 = vmatprep.mubr.bf16.mxu0 %v4580_v1 }
  0x6d   : > { %3978 = vmatprep.subr.bf16.mxu0 %v4284_v40  ;;  %3831 = vmatpush3.bf16.msra.mxu1 %v4279_v35 }
  0x6e   : > { %3848 = vmatprep.subr.bf16.mxu1 %v4281_v47 }
  0x70   : > { %3979 = vmatpush3.bf16.msra.mxu0 %v4284_v40  ;;  %3833 = vmatmul.mubr.bf16.vlgmr.msra.gmra.mrb[0].mxu1 %v4638_v25  ;;  %v4856_v25 = vsel %vm4523_vm2, 0, %v533_v55 }
  0x71   : > { %3980 = vmatprep.subr.bf16.mxu0 %v4286_v46  ;;  %3849 = vmatpush3.bf16.msra.mxu1 %v4281_v47 }
  0x72   : > { %3836 = vmatprep.mubr.bf16.mxu1 %v4673_v36  ;;  %3850 = vmatprep.subr.bf16.mxu1 %v4283_v37 }
  0x73   : > { %3965 = vmatmul.mubr.bf16.gmra.mrb[4].mxu0 %v4631_v21 }
  0x74   : > { %3981 = vmatpush3.bf16.msra.mxu0 %v4286_v46  ;;  %3968 = vmatprep.mubr.bf16.mxu0 %v4646_v29 }
  0x75   : > { %3982 = vmatprep.subr.bf16.mxu0 %v4288_v48  ;;  %3851 = vmatpush3.bf16.msra.mxu1 %v4283_v37 }
  0x76   : > { %3852 = vmatprep.subr.bf16.mxu1 %v4285_v58 }
  0x78   : > { %3983 = vmatpush3.bf16.msra.mxu0 %v4288_v48  ;;  %3837 = vmatmul.mubr.bf16.gmra.mrb[4].mxu1 %v4684_v41 }
  0x79   : > { %3984 = vmatprep.subr.bf16.mxu0 %v4290_v54  ;;  %3853 = vmatpush3.bf16.msra.mxu1 %v4285_v58 }
  0x7a   : > { %3840 = vmatprep.mubr.bf16.mxu1 %v4717_v52  ;;  %3854 = vmatprep.subr.bf16.mxu1 %v4287_v61 }
  0x7b   : > { %3969 = vmatmul.mubr.bf16.gmra.mrb[8].mxu0 %v4690_v43 }
  0x7c   : > { %3985 = vmatpush3.bf16.msra.mxu0 %v4290_v54  ;;  %3972 = vmatprep.mubr.bf16.mxu0 %v4856_v25 }
  0x7d   : > { %3986 = vmatprep.subr.bf16.mxu0 %v4292_v63  ;;  %3855 = vmatpush3.bf16.msra.mxu1 %v4287_v61 }
  0x7e   : > { %3856 = vmatprep.subr.bf16.mxu1 %v4289_v3 }
  0x80   : > { %3987 = vmatpush3.bf16.msra.mxu0 %v4292_v63  ;;  %3841 = vmatmul.mubr.bf16.gmra.mrb[8].mxu1 %v4727_v57 }
  0x81   : > { %3988 = vmatprep.subr.bf16.mxu0 %v4294_v2  ;;  %3857 = vmatpush3.bf16.msra.mxu1 %v4289_v3 }
  0x82   : > { %3844 = vmatprep.mubr.bf16.mxu1 %v4737_v62  ;;  %3858 = vmatprep.subr.bf16.mxu1 %v4291_v6 }
  0x83   : > { %3973 = vmatmul.mubr.bf16.gmra.mrb[12].mxu0 %v563_v12 }
  0x84   : > { %3989 = vmatpush3.bf16.msra.mxu0 %v4294_v2  ;;  %3992 = vmatprep.mubr.bf16.mxu0 %v4478_v17  ;;  %v4298_v17 = vld [vmem:[%s5140_s3 + $0x208] sm:$0xff]  }
  0x85   : > { %3990 = vmatprep.subr.bf16.mxu0 %v4296_v4  ;;  %3859 = vmatpush3.bf16.msra.mxu1 %v4291_v6 }
  0x86   : > { %3860 = vmatprep.subr.bf16.mxu1 %v4293_v8 }
  0x88   : > { %3991 = vmatpush3.bf16.msra.mxu0 %v4296_v4  ;;  %3845 = vmatmul.mubr.bf16.gmra.mrb[12].mxu1 %v4763_v5 }
  0x89   : > { %4008 = vmatprep.subr.bf16.mxu0 %v4297_v44  ;;  %3861 = vmatpush3.bf16.msra.mxu1 %v4293_v8 }
  0x8a   : > { %3864 = vmatprep.mubr.bf16.mxu1 %v4542_v51  ;;  %3862 = vmatprep.subr.bf16.mxu1 %v4295_v9  ;;  %v4303_v51 = vld [vmem:[%s5140_s3 + $0x230] sm:$0xff]  }
  0x8b   : > { %3993 = vmatmul.mubr.bf16.vlgmr.msra.gmra.mrb[0].mxu0 %v4491_v24  ;;  %v4300_v24 = vld [vmem:[%s5140_s3 + $0x218] sm:$0xff]  }
  0x8c   : > { %4009 = vmatpush3.bf16.msra.mxu0 %v4297_v44  ;;  %3996 = vmatprep.mubr.bf16.mxu0 %v4498_v27  ;;  %v4301_v27 = vld [vmem:[%s5140_s3 + $0x220] sm:$0xff]  }
  0x8d   : > { %4010 = vmatprep.subr.bf16.mxu0 %v4298_v17  ;;  %3863 = vmatpush3.bf16.msra.mxu1 %v4295_v9 }
  0x8e   : > { %4040 = vmatprep.subr.bf16.mxu1 %v4297_v44 }
  0x90   : > { %4011 = vmatpush3.bf16.msra.mxu0 %v4298_v17  ;;  %3865 = vmatmul.mubr.bf16.vlgmr.msra.gmra.mrb[0].mxu1 %v4557_v56 }
  0x91   : > { %4012 = vmatprep.subr.bf16.mxu0 %v4299_v11  ;;  %4048 = vmatpush3.bf16.msra.mxu1 %v4297_v44 }
  0x92   : > { %3868 = vmatprep.mubr.bf16.mxu1 %v4571_v60  ;;  %4041 = vmatprep.subr.bf16.mxu1 %v4298_v17 }
  0x93   : > { %3997 = vmatmul.mubr.bf16.gmra.mrb[4].mxu0 %v4538_v50  ;;  %v4302_v50 = vld [vmem:[%s5140_s3 + $0x228] sm:$0xff]  }
  0x94   : > { %4013 = vmatpush3.bf16.msra.mxu0 %v4299_v11  ;;  %4000 = vmatprep.mubr.bf16.mxu0 %v4548_v53  ;;  %v4304_v53 = vld [vmem:[%s5140_s3 + $0x238] sm:$0xff]  }
  0x95   : > { %4014 = vmatprep.subr.bf16.mxu0 %v4300_v24  ;;  %4049 = vmatpush3.bf16.msra.mxu1 %v4298_v17 }
  0x96   : > { %4042 = vmatprep.subr.bf16.mxu1 %v4299_v11 }
  0x98   : > { %4015 = vmatpush3.bf16.msra.mxu0 %v4300_v24  ;;  %3869 = vmatmul.mubr.bf16.gmra.mrb[4].mxu1 %v4580_v1 }
  0x99   : > { %4016 = vmatprep.subr.bf16.mxu0 %v4301_v27  ;;  %4050 = vmatpush3.bf16.msra.mxu1 %v4299_v11 }
  0x9a   : > { %3872 = vmatprep.mubr.bf16.mxu1 %v4631_v21  ;;  %4043 = vmatprep.subr.bf16.mxu1 %v4300_v24 }
  0x9b   : > { %4001 = vmatmul.mubr.bf16.gmra.mrb[8].mxu0 %v4595_v7 }
  0x9c   : > { %4017 = vmatpush3.bf16.msra.mxu0 %v4301_v27  ;;  %4004 = vmatprep.mubr.bf16.mxu0 %v4605_v10 }
  0x9d   : > { %4018 = vmatprep.subr.bf16.mxu0 %v4302_v50  ;;  %4051 = vmatpush3.bf16.msra.mxu1 %v4300_v24 }
  0x9e   : > { %4044 = vmatprep.subr.bf16.mxu1 %v4301_v27 }
  0xa0   : > { %4019 = vmatpush3.bf16.msra.mxu0 %v4302_v50  ;;  %3873 = vmatmul.mubr.bf16.gmra.mrb[8].mxu1 %v4646_v29 }
  0xa1   : > { %4020 = vmatprep.subr.bf16.mxu0 %v4303_v51  ;;  %4052 = vmatpush3.bf16.msra.mxu1 %v4301_v27 }
  0xa2   : > { %3876 = vmatprep.mubr.bf16.mxu1 %v4690_v43  ;;  %4045 = vmatprep.subr.bf16.mxu1 %v4302_v50 }
  0xa3   : > { %4005 = vmatmul.mubr.bf16.gmra.mrb[12].mxu0 %v4789_v26 }
  0xa4   : > { %4021 = vmatpush3.bf16.msra.mxu0 %v4303_v51  ;;  %4024 = vmatprep.mubr.bf16.mxu0 %v4673_v36 }
  0xa5   : > { %4022 = vmatprep.subr.bf16.mxu0 %v4304_v53  ;;  %4053 = vmatpush3.bf16.msra.mxu1 %v4302_v50 }
  0xa6   : > { %4046 = vmatprep.subr.bf16.mxu1 %v4303_v51 }
  0xa8   : > { %4023 = vmatpush3.bf16.msra.mxu0 %v4304_v53  ;;  %3877 = vmatmul.mubr.bf16.gmra.mrb[12].mxu1 %v4856_v25 }
  0xa9   : > { %4054 = vmatpush3.bf16.msra.mxu1 %v4303_v51  ;;  %4032 = vmatprep.mubr.bf16.mxu1 %v4737_v62 }
  0xaa   : > { %4047 = vmatprep.subr.bf16.mxu1 %v4304_v53 }
  0xab   : > { %4025 = vmatmul.mubr.bf16.vlgmr.msra.gmra.mrb[0].mxu0 %v4684_v41 }
  0xac   : > { %4028 = vmatprep.mubr.bf16.mxu0 %v4717_v52 }
  0xad   : > { %4055 = vmatpush3.bf16.msra.mxu1 %v4304_v53 }
  0xb0   : > { %4033 = vmatmul.mubr.bf16.vlgmr.msra.gmra.mrb[16].mxu1 %v4763_v5 }
  0xb1   : > { %4036 = vmatprep.mubr.bf16.mxu1 %v4783_v16  ;;  %v4345_v16 = vmov 1983009808  }
  0xb2   : > { %v2556_v18 = vunpack.c.l.s4 %v4345_v16 }
  0xb3   : > { %4029 = vmatmul.mubr.bf16.gmra.mrb[4].mxu0 %v4727_v57 }
  0xb4   : > { %v2557_v23 = vunpack.c.0.s8 %v2556_v18 }
  0xb6   : > { %v4947_v46 = vsub.s32 %v2557_v23, %v2559_v33 }
  0xb8   : > { %4037 = vmatmul.mubr.bf16.gmra.mrb[20].mxu1 %v606_v45 }
 0x163   : > { %v3866_v56 = vpop.f32.mrb[0].mxu1 }
 0x164   : > { %v1311_v60 = vpop.f32.mrb[1].mxu1 }
 0x165   : > { %v3867_v1 = vpop.f32.mrb[2].mxu1 }
 0x166   : > { %v1314_v7 = vpop.f32.mrb[3].mxu1 }
 0x16b   : > { %v3870_v36 = vpop.f32.mrb[4].mxu1 }
 0x16c   : > { %v1327_v43 = vpop.f32.mrb[5].mxu1 }
 0x16d   : > { %v4939_v52 = vpop.f32.mrb[6].mxu1 }
 0x16e   : > { %v4002_v10 = vpop.f32.mrb[8].mxu0  ;;  %v4941_v57 = vpop.f32.mrb[7].mxu1 }
 0x16f   : > { %v2185_v21 = vpop.f32.mrb[9].mxu0 }
 0x170   : > { %v4003_v29 = vpop.f32.mrb[10].mxu0 }
 0x171   : > { %v2188_v41 = vpop.f32.mrb[11].mxu0 }
 0x173   : > { %v3874_v13 = vpop.f32.mrb[8].mxu1 }
 0x174   : > { %v4064_v20 = vadd.f32 %v4002_v10, %v3874_v13  ;;  %v1343_v22 = vpop.f32.mrb[9].mxu1 }
 0x175   : > { %v4066_v26 = vadd.f32 %v2185_v21, %v1343_v22  ;;  %v3875_v28 = vpop.f32.mrb[10].mxu1 }
 0x176   : > { %v4006_v62 = vpop.f32.mrb[12].mxu0  ;;  %v4943_v30 = vadd.f32 %v4003_v29, %v3875_v28  ;;  %v1346_v31 = vpop.f32.mrb[11].mxu1 }
 0x177   : > { %v2201_v5 = vpop.f32.mrb[13].mxu0  ;;  %v4945_v32 = vadd.f32 %v2188_v41, %v1346_v31 }
 0x178   : > { %v4007_v14 = vpop.f32.mrb[14].mxu0 }
 0x179   : > { %v2204_v15 = vpop.f32.mrb[15].mxu0 }
 0x17b   : > { %v3878_v35 = vpop.f32.mrb[12].mxu1 }
 0x17c   : > { %v4949_v49 = vadd.f32 %v4006_v62, %v3878_v35  ;;  %v1359_v37 = vpop.f32.mrb[13].mxu1 }
 0x17d   : > { %v4951_v58 = vadd.f32 %v2201_v5, %v1359_v37  ;;  %v3879_v59 = vpop.f32.mrb[14].mxu1 }
 0x17e   : > { %v4026_v39 = vpop.f32.mrb[0].mxu0  ;;  %v4953_v61 = vadd.f32 %v4007_v14, %v3879_v59  ;;  %v1362_v0 = vpop.f32.mrb[15].mxu1 }
 0x17f   : > { %v4056_v34 = vadd.f32 %v4026_v39, %v3866_v56  ;;  %v2363_v40 = vpop.f32.mrb[1].mxu0  ;;  %v4955_v12 = vadd.f32 %v2204_v15, %v1362_v0 }
 0x180   : > { %v4057_v42 = vadd.f32 %v2363_v40, %v1311_v60  ;;  %v4027_v45 = vpop.f32.mrb[2].mxu0 }
 0x181   : > { %vm2492_vm6 = vcmp.ge.f32.partialorder %v4056_v34, 0.0  ;;  %v2508_v38 = vmul.f32 0.1, %v4056_v34  ;;  %v4058_v47 = vadd.f32 %v4027_v45, %v3867_v1  ;;  %v2366_v48 = vpop.f32.mrb[3].mxu0 }
 0x182   : > { %vm2490_vm7 = vcmp.ge.f32.partialorder %v4057_v42, 0.0  ;;  %v2506_v54 = vmul.f32 0.1, %v4057_v42  ;;  %v4059_v55 = vadd.f32 %v2366_v48, %v1314_v7 }
 0x183   : > { %v2524_v63 = vsel %vm2492_vm6, %v4056_v34, %v2508_v38  ;;  %vm2493_vm8 = vcmp.ge.f32.partialorder %v4058_v47, 0.0  ;;  %v2509_v25 = vmul.f32 0.1, %v4058_v47  ;;  %v4034_v53 = vpop.f32.mrb[16].mxu1 }
 0x184   : > { %v2522_v2 = vsel %vm2490_vm7, %v4057_v42, %v2506_v54  ;;  %vm2491_vm9 = vcmp.ge.f32.partialorder %v4059_v55, 0.0  ;;  %v2507_v3 = vmul.f32 0.1, %v4059_v55  ;;  %v4065_v10 = vadd.f32 %v4064_v20, %v4034_v53  ;;  %v2395_v29 = vpop.f32.mrb[17].mxu1 }
 0x185   : > { %v2538_v4 = vmax.f32 %v2522_v2, %v2524_v63  ;;  %v2525_v6 = vsel %vm2493_vm8, %v4058_v47, %v2509_v25  ;;  %v4067_v14 = vadd.f32 %v4066_v26, %v2395_v29  ;;  %v4035_v13 = vpop.f32.mrb[18].mxu1 }
 0x186   : > { %v2523_v44 = vsel %vm2491_vm9, %v4059_v55, %v2507_v3  ;;  %v4030_v8 = vpop.f32.mrb[4].mxu0  ;;  %vm2500_vm11 = vcmp.ge.f32.partialorder %v4065_v10, 0.0  ;;  %v2516_v15 = vmul.f32 0.1, %v4065_v10  ;;  %v4973_v19 = vpop.f32.mrb[19].mxu1  ;;  %v4069_v26 = vadd.f32 %v4943_v30, %v4035_v13 }
 0x187   : > { %v2554_v17 = vcombine.high %v2538_v4, %v2538_v4  ;;  %v2561_v9 = vrot.slane %v2538_v4, %v4947_v46  ;;  %v2539_v11 = vmax.f32 %v2523_v44, %v2525_v6  ;;  %v4958_v24 = vadd.f32 %v4030_v8, %v3870_v36  ;;  %v2379_v27 = vpop.f32.mrb[5].mxu0 }
 0x188   : > { %v4960_v50 = vadd.f32 %v2379_v27, %v1327_v43  ;;  %v4962_v51 = vpop.f32.mrb[6].mxu0  ;;  %vm2498_vm12 = vcmp.ge.f32.partialorder %v4067_v14, 0.0  ;;  %v2514_v28 = vmul.f32 0.1, %v4067_v14  ;;  %v2532_v31 = vsel %vm2500_vm11, %v4065_v10, %v2516_v15 }
 0x189   : > { %v2568_v56 = vrot.slane %v2554_v17, %v4947_v46  ;;  %v2569_v60 = vcombine.high %v2561_v9, %v2561_v9  ;;  %v2723_v1 = vsel %vm2722_vm10, %v2561_v9, -inf  ;;  %v4966_v7 = vpop.f32.mrb[7].mxu0  ;;  %v2571_v41 = vcombine.high %v2539_v11, %v2539_v11 }
 0x18a   : > { %v2724_v21 = vrot.slane %v2723_v1, 4  ;;  %v4969_v36 = vrot.slane %v2539_v11, %v4947_v46  ;;  %v2530_v40 = vsel %vm2498_vm12, %v4067_v14, %v2514_v28  ;;  %vm2501_vm14 = vcmp.ge.f32.partialorder %v4069_v26, 0.0 }
 0x18b   : > { %v2570_v62 = vcombine.high %v2568_v56, %v2568_v56  ;;  %v2730_v43 = vsel %vm2722_vm10, %v2569_v60, -inf  ;;  %v2737_v5 = vsel %vm2722_vm10, %v2568_v56, -inf  ;;  %v4978_v42 = vrot.slane %v2571_v41, %v4947_v46  ;;  %v4982_v55 = vpop.f32.mrb[20].mxu1 }
 0x18c   : > { %v2725_v16 = vmax.f32 %v2723_v1, %v2724_v21  ;;  %v2731_v18 = vrot.slane %v2730_v43, 4  ;;  %v2738_v20 = vrot.slane %v2737_v5, 4  ;;  %v2542_v47 = vmax.f32 %v2530_v40, %v2532_v31  ;;  %v4984_v0 = vpop.f32.mrb[21].mxu1 }
 0x18d   : > { %v2744_v22 = vsel %vm2722_vm10, %v2570_v62, -inf  ;;  %v2517_v37 = vmul.f32 0.1, %v4069_v26  ;;  %v2586_v54 = vcombine.high %v4969_v36, %v4969_v36  ;;  %v2587_v6 = vcombine.high %v4978_v42, %v4978_v42  ;;  %v4991_v44 = vpop.f32.mrb[22].mxu1 }
 0x18e   : > { %v2726_v23 = vrot.slane %v2725_v16, 2  ;;  %v2732_v33 = vmax.f32 %v2730_v43, %v2731_v18  ;;  %v2745_v39 = vrot.slane %v2744_v22, 4  ;;  %v2739_v34 = vmax.f32 %v2737_v5, %v2738_v20  ;;  %v4994_v27 = vpop.f32.mrb[23].mxu1 }
 0x18f   : > { %v2622_v30 = vcombine.high %v2542_v47, %v2542_v47  ;;  %v2629_v3 = vrot.slane %v2542_v47, %v4947_v46  ;;  %v4987_v4 = vsel %vm2501_vm14, %v4069_v26, %v2517_v37  ;;  %v2751_v1 = vsel %vm2722_vm10, %v4969_v36, -inf }
 0x190   : > { %v2727_v45 = vmax.f32 %v2725_v16, %v2726_v23  ;;  %v2733_v35 = vrot.slane %v2732_v33, 2  ;;  %v2746_v38 = vmax.f32 %v2744_v22, %v2745_v39  ;;  %v2740_v48 = vrot.slane %v2739_v34, 2 }
 0x191   : > { %v2636_v11 = vrot.slane %v2622_v30, %v4947_v46  ;;  %v2637_v56 = vcombine.high %v2629_v3, %v2629_v3  ;;  %v2835_v60 = vsel %vm2722_vm10, %v2629_v3, -inf  ;;  %v2758_v3 = vsel %vm2722_vm10, %v2586_v54, -inf }
 0x192   : > { %v2728_v59 = vrot.slane %v2727_v45, 1  ;;  %v2734_v63 = vmax.f32 %v2732_v33, %v2733_v35  ;;  %v2747_v25 = vrot.slane %v2746_v38, 2  ;;  %v2741_v2 = vmax.f32 %v2739_v34, %v2740_v48 }
 0x193   : > { %v2638_v41 = vcombine.high %v2636_v11, %v2636_v11  ;;  %v2836_v43 = vrot.slane %v2835_v60, 4  ;;  %v2842_v5 = vsel %vm2722_vm10, %v2637_v56, -inf  ;;  %v2849_v14 = vsel %vm2722_vm10, %v2636_v11, -inf }
 0x194   : > { %v2729_v8 = vmax.f32 %v2727_v45, %v2728_v59  ;;  %v2735_v17 = vrot.slane %v2734_v63, 1  ;;  %v2748_v9 = vmax.f32 %v2746_v38, %v2747_v25  ;;  %v2742_v53 = vrot.slane %v2741_v2, 1 }
 0x195   : > { %v2843_v18 = vrot.slane %v2842_v5, 4  ;;  %v2837_v22 = vmax.f32 %v2835_v60, %v2836_v43  ;;  %v2850_v28 = vrot.slane %v2849_v14, 4  ;;  %v2856_v31 = vsel %vm2722_vm10, %v2638_v41, -inf }
 0x196   : > { %v2736_v10 = vmax.f32 %v2734_v63, %v2735_v17  ;;  %v2749_v21 = vrot.slane %v2748_v9, 1  ;;  %v3576_v29 = vpack.c.bf16 %v2729_v8, %v2729_v8  ;;  %v2743_v62 = vmax.f32 %v2741_v2, %v2742_v53 }
 0x197   : > { %v2844_v33 = vmax.f32 %v2842_v5, %v2843_v18  ;;  %v2857_v39 = vrot.slane %v2856_v31, 4  ;;  %v2838_v40 = vrot.slane %v2837_v22, 2  ;;  %v2851_v26 = vmax.f32 %v2849_v14, %v2850_v28 }
 0x198   : > { %v2750_v13 = vmax.f32 %v2748_v9, %v2749_v21  ;;  %v3577_v15 = vpack.c.bf16 %v2736_v10, %v2736_v10  ;;  %v3075_v16 = vunpack.c.l.b16 %v3576_v29  ;;  %v3578_v20 = vpack.c.bf16 %v2743_v62, %v2743_v62 }
 0x199   : > { %v2752_v45 = vrot.slane %v2751_v1, 4  ;;  %v2845_v47 = vrot.slane %v2844_v33, 2  ;;  %v2858_v48 = vmax.f32 %v2856_v31, %v2857_v39  ;;  %v2839_v59 = vmax.f32 %v2837_v22, %v2838_v40 }
 0x19a   : > { %v3579_v36 = vpack.c.bf16 %v2750_v13, %v2750_v13  ;;  %v3076_v23 = vunpack.c.l.b16 %v3577_v15  ;;  %v3077_v34 = vunpack.c.l.b16 %v3578_v20  ;;  %v2852_v63 = vrot.slane %v2851_v26, 2 }
 0x19b   : > { %v2753_v25 = vmax.f32 %v2751_v1, %v2752_v45  ;;  %v2846_v30 = vmax.f32 %v2844_v33, %v2845_v47  ;;  %v2859_v2 = vrot.slane %v2858_v48, 2  ;;  %v2765_v8 = vsel %vm2722_vm10, %v4978_v42, -inf }
 0x19c   : > { %v3078_v35 = vunpack.c.l.b16 %v3579_v36  ;;  %v3108_v38 = vsel %vm3107_vm13, %v3076_v23, %v3075_v16  ;;  %v2840_v17 = vrot.slane %v2839_v59, 1  ;;  %v2853_v9 = vmax.f32 %v2851_v26, %v2852_v63 }
 0x19d   : > { %v3110_v37 = vsel %vm3109_vm15, %v3077_v34, %v3108_v38  ;;  %v2754_v11 = vrot.slane %v2753_v25, 2  ;;  %v2759_v53 = vrot.slane %v2758_v3, 4  ;;  %v2847_v56 = vrot.slane %v2846_v30, 1 }
 0x19e   : > { %v2860_v60 = vmax.f32 %v2858_v48, %v2859_v2  ;;  %v2766_v10 = vrot.slane %v2765_v8, 4  ;;  %v2772_v21 = vsel %vm2722_vm10, %v2587_v6, -inf  ;;  %v2841_v1 = vmax.f32 %v2839_v59, %v2840_v17 }
 0x19f   : > { %v2854_v29 = vrot.slane %v2853_v9, 1  ;;  %v2755_v41 = vmax.f32 %v2753_v25, %v2754_v11  ;;  %v2760_v62 = vmax.f32 %v2758_v3, %v2759_v53  ;;  %vm2496_vm2 = vcmp.ge.f32.partialorder %v4958_v24, 0.0 }
 0x1a0   : > { %v2848_v54 = vmax.f32 %v2846_v30, %v2847_v56  ;;  %v2861_v42 = vrot.slane %v2860_v60, 1  ;;  %v2767_v43 = vmax.f32 %v2765_v8, %v2766_v10  ;;  %v2773_v5 = vrot.slane %v2772_v21, 4 }
 0x1a1   : > { %v2855_v14 = vmax.f32 %v2853_v9, %v2854_v29  ;;  %v3592_v13 = vpack.c.bf16 %v2841_v1, %v2841_v1  ;;  %v2756_v15 = vrot.slane %v2755_v41, 1  ;;  %v2761_v16 = vrot.slane %v2760_v62, 2 }
 0x1a2   : > { %v2862_v6 = vmax.f32 %v2860_v60, %v2861_v42  ;;  %v3593_v18 = vpack.c.bf16 %v2848_v54, %v2848_v54  ;;  %v2768_v20 = vrot.slane %v2767_v43, 2  ;;  %v2774_v22 = vmax.f32 %v2772_v21, %v2773_v5 }
 0x1a3   : > { %v3594_v28 = vpack.c.bf16 %v2855_v14, %v2855_v14  ;;  %v3091_v31 = vunpack.c.l.b16 %v3592_v13  ;;  %v2757_v36 = vmax.f32 %v2755_v41, %v2756_v15  ;;  %v2762_v23 = vmax.f32 %v2760_v62, %v2761_v16 }
 0x1a4   : > { %v3595_v33 = vpack.c.bf16 %v2862_v6, %v2862_v6  ;;  %v3092_v39 = vunpack.c.l.b16 %v3593_v18  ;;  %v2769_v34 = vmax.f32 %v2767_v43, %v2768_v20  ;;  %v2775_v40 = vrot.slane %v2774_v22, 2 }
 0x1a5   : > { %v3093_v26 = vunpack.c.l.b16 %v3594_v28  ;;  %v2763_v45 = vrot.slane %v2762_v23, 1  ;;  %v3580_v38 = vpack.c.bf16 %v2757_v36, %v2757_v36  ;;  %v3112_v47 = vsel %vm3111_vm0, %v3078_v35, %v3110_v37 }
 0x1a6   : > { %v3094_v48 = vunpack.c.l.b16 %v3595_v33  ;;  %v3128_v59 = vsel %vm3107_vm13, %v3092_v39, %v3091_v31  ;;  %v2770_v63 = vrot.slane %v2769_v34, 1  ;;  %v2776_v25 = vmax.f32 %v2774_v22, %v2775_v40 }
 0x1a7   : > { %v3129_v30 = vsel %vm3109_vm15, %v3093_v26, %v3128_v59  ;;  %v2764_v2 = vmax.f32 %v2762_v23, %v2763_v45  ;;  %v3079_v3 = vunpack.c.l.b16 %v3580_v38  ;;  %v4071_v8 = vadd.f32 %v4945_v32, %v4973_v19 }
 0x1a8   : > { %v2771_v17 = vmax.f32 %v2769_v34, %v2770_v63  ;;  %v2777_v9 = vrot.slane %v2776_v25, 1  ;;  %v5027_v35 = vsel %vm3111_vm0, %v3094_v48, %v3129_v30  ;;  %v2512_v37 = vmul.f32 0.1, %v4958_v24 }
 0x1a9   : > { %v3581_v11 = vpack.c.bf16 %v2764_v2, %v2764_v2  ;;  %v3114_v53 = vsel %vm3113_vm1, %v3079_v3, %v3112_v47  ;;  %vm2499_vm6 = vcmp.ge.f32.partialorder %v4071_v8, 0.0  ;;  %v2515_v56 = vmul.f32 0.1, %v4071_v8 }
 0x1aa   : > { %v2778_v60 = vmax.f32 %v2776_v25, %v2777_v9  ;;  %v3582_v10 = vpack.c.bf16 %v2771_v17, %v2771_v17  ;;  %v2528_v21 = vsel %vm2496_vm2, %v4958_v24, %v2512_v37  ;;  %v4073_v32 = vadd.f32 %v4949_v49, %v4982_v55 }
 0x1ab   : > { %v3080_v19 = vunpack.c.l.b16 %v3581_v11  ;;  %v2531_v1 = vsel %vm2499_vm6, %v4071_v8, %v2515_v56  ;;  %vm2494_vm7 = vcmp.ge.f32.partialorder %v4960_v50, 0.0  ;;  %v2510_v29 = vmul.f32 0.1, %v4960_v50 }
 0x1ac   : > { %v3583_v41 = vpack.c.bf16 %v2778_v60, %v2778_v60  ;;  %v3081_v62 = vunpack.c.l.b16 %v3582_v10  ;;  %v2543_v54 = vmax.f32 %v2531_v1, %v4987_v4  ;;  %vm2504_vm8 = vcmp.ge.f32.partialorder %v4073_v32, 0.0 }
 0x1ad   : > { %v3116_v42 = vsel %vm3115_vm3, %v3080_v19, %v3114_v53  ;;  %v2520_v43 = vmul.f32 0.1, %v4073_v32  ;;  %v2526_v24 = vsel %vm2494_vm7, %v4960_v50, %v2510_v29  ;;  %v4075_v49 = vadd.f32 %v4951_v58, %v4984_v0 }
 0x1ae   : > { %v3082_v55 = vunpack.c.l.b16 %v3583_v41  ;;  %v3118_v5 = vsel %vm3117_vm4, %v3081_v62, %v3116_v42  ;;  %v2639_v14 = vcombine.high %v2543_v54, %v2543_v54  ;;  %v2646_v13 = vrot.slane %v2543_v54, %v4947_v46 }
 0x1af   : > { %v2536_v15 = vsel %vm2504_vm8, %v4073_v32, %v2520_v43  ;;  %v2540_v16 = vmax.f32 %v2526_v24, %v2528_v21  ;;  %vm2502_vm9 = vcmp.ge.f32.partialorder %v4075_v49, 0.0  ;;  %v2518_v4 = vmul.f32 0.1, %v4075_v49 }
 0x1b0   : > { %v3120_v50 = vsel %vm3119_vm5, %v3082_v55, %v3118_v5  ;;  %v2653_v58 = vrot.slane %v2639_v14, %v4947_v46  ;;  %v2654_v0 = vcombine.high %v2646_v13, %v2646_v13  ;;  %v2863_v6 = vsel %vm2722_vm10, %v2646_v13, -inf }
 0x1b1   : > { %v3142_v18 = vpack.c.b16 %v3120_v50, %v3120_v50  ;;  %v2864_v20 = vrot.slane %v2863_v6, 4  ;;  %v2588_v22 = vcombine.high %v2540_v16, %v2540_v16  ;;  %v2595_v28 = vrot.slane %v2540_v16, %v4947_v46 }
 0x1b2   : > { %v2655_v31 = vcombine.high %v2653_v58, %v2653_v58  ;;  %v2870_v36 = vsel %vm2722_vm10, %v2654_v0, -inf  ;;  %v2877_v23 = vsel %vm2722_vm10, %v2653_v58, -inf  ;;  %v2534_v33 = vsel %vm2502_vm9, %v4075_v49, %v2518_v4 }
 0x1b3   : > { %3150 = vst [vmem:[%s5048_s9] sm:$0xf] %v3142_v18  ;;  %v2865_v39 = vmax.f32 %v2863_v6, %v2864_v20  ;;  %v2871_v34 = vrot.slane %v2870_v36, 4  ;;  %v2878_v40 = vrot.slane %v2877_v23, 4  ;;  %v2602_v26 = vrot.slane %v2588_v22, %v4947_v46 }
 0x1b4   : > { %v2884_v45 = vsel %vm2722_vm10, %v2655_v31, -inf  ;;  %v2603_v38 = vcombine.high %v2595_v28, %v2595_v28  ;;  %v2779_v47 = vsel %vm2722_vm10, %v2595_v28, -inf  ;;  %v5060_v48 = vmax.f32 %v2534_v33, %v2536_v15 }
 0x1b5   : > { %v2866_v59 = vrot.slane %v2865_v39, 2  ;;  %v2872_v63 = vmax.f32 %v2870_v36, %v2871_v34  ;;  %v2879_v25 = vmax.f32 %v2877_v23, %v2878_v40  ;;  %v2885_v30 = vrot.slane %v2884_v45, 4 }
 0x1b6   : > { %v2604_v2 = vcombine.high %v2602_v26, %v2602_v26  ;;  %v2780_v3 = vrot.slane %v2779_v47, 4  ;;  %v2786_v8 = vsel %vm2722_vm10, %v2603_v38, -inf  ;;  %v2793_v17 = vsel %vm2722_vm10, %v2602_v26, -inf }
 0x1b7   : > { %v2867_v9 = vmax.f32 %v2865_v39, %v2866_v59  ;;  %v2873_v37 = vrot.slane %v2872_v63, 2  ;;  %v2880_v11 = vrot.slane %v2879_v25, 2  ;;  %v2886_v53 = vmax.f32 %v2884_v45, %v2885_v30 }
 0x1b8   : > { %v2781_v56 = vmax.f32 %v2779_v47, %v2780_v3  ;;  %v2787_v60 = vrot.slane %v2786_v8, 4  ;;  %v2794_v10 = vrot.slane %v2793_v17, 4  ;;  %v2800_v21 = vsel %vm2722_vm10, %v2604_v2, -inf }
 0x1b9   : > { %v2868_v32 = vrot.slane %v2867_v9, 1  ;;  %v2874_v19 = vmax.f32 %v2872_v63, %v2873_v37  ;;  %v2881_v1 = vmax.f32 %v2879_v25, %v2880_v11  ;;  %v2887_v29 = vrot.slane %v2886_v53, 2 }
 0x1ba   : > { %v2782_v41 = vrot.slane %v2781_v56, 2  ;;  %v2788_v62 = vmax.f32 %v2786_v8, %v2787_v60  ;;  %v2795_v54 = vmax.f32 %v2793_v17, %v2794_v10  ;;  %v2801_v42 = vrot.slane %v2800_v21, 4 }
 0x1bb   : > { %v2869_v43 = vmax.f32 %v2867_v9, %v2868_v32  ;;  %v2875_v24 = vrot.slane %v2874_v19, 1  ;;  %v2882_v49 = vrot.slane %v2881_v1, 1  ;;  %v2888_v55 = vmax.f32 %v2886_v53, %v2887_v29 }
 0x1bc   : > { %v2783_v5 = vmax.f32 %v2781_v56, %v2782_v41  ;;  %v2789_v14 = vrot.slane %v2788_v62, 2  ;;  %v2796_v13 = vrot.slane %v2795_v54, 2  ;;  %v2802_v15 = vmax.f32 %v2800_v21, %v2801_v42 }
 0x1bd   : > { %v2876_v16 = vmax.f32 %v2874_v19, %v2875_v24  ;;  %v2883_v4 = vmax.f32 %v2881_v1, %v2882_v49  ;;  %v2889_v50 = vrot.slane %v2888_v55, 1  ;;  %v3596_v58 = vpack.c.bf16 %v2869_v43, %v2869_v43 }
 0x1be   : > { %v2784_v0 = vrot.slane %v2783_v5, 1  ;;  %v2790_v6 = vmax.f32 %v2788_v62, %v2789_v14  ;;  %v2797_v18 = vmax.f32 %v2795_v54, %v2796_v13  ;;  %v2803_v20 = vrot.slane %v2802_v15, 2 }
 0x1bf   : > { %v2890_v22 = vmax.f32 %v2888_v55, %v2889_v50  ;;  %v3597_v28 = vpack.c.bf16 %v2876_v16, %v2876_v16  ;;  %v3598_v31 = vpack.c.bf16 %v2883_v4, %v2883_v4  ;;  %v3095_v36 = vunpack.c.l.b16 %v3596_v58 }
 0x1c0   : > { %v2785_v23 = vmax.f32 %v2783_v5, %v2784_v0  ;;  %v2791_v33 = vrot.slane %v2790_v6, 1  ;;  %v2798_v39 = vrot.slane %v2797_v18, 1  ;;  %v2804_v34 = vmax.f32 %v2802_v15, %v2803_v20 }
 0x1c1   : > { %v3599_v40 = vpack.c.bf16 %v2890_v22, %v2890_v22  ;;  %v3096_v26 = vunpack.c.l.b16 %v3597_v28  ;;  %v3097_v45 = vunpack.c.l.b16 %v3598_v31  ;;  %v3131_v38 = vsel %vm3113_vm1, %v3095_v36, %v5027_v35 }
 0x1c2   : > { %v2792_v47 = vmax.f32 %v2790_v6, %v2791_v33  ;;  %v2799_v59 = vmax.f32 %v2797_v18, %v2798_v39  ;;  %v2805_v63 = vrot.slane %v2804_v34, 1  ;;  %v3584_v25 = vpack.c.bf16 %v2785_v23, %v2785_v23 }
 0x1c3   : > { %v3098_v30 = vunpack.c.l.b16 %v3599_v40  ;;  %v3132_v2 = vsel %vm3115_vm3, %v3096_v26, %v3131_v38  ;;  %v2656_v3 = vcombine.high %v5060_v48, %v5060_v48  ;;  %v2663_v8 = vrot.slane %v5060_v48, %v4947_v46 }
 0x1c4   : > { %v3133_v17 = vsel %vm3117_vm4, %v3097_v45, %v3132_v2  ;;  %v2806_v9 = vmax.f32 %v2804_v34, %v2805_v63  ;;  %v3585_v37 = vpack.c.bf16 %v2792_v47, %v2792_v47  ;;  %v3586_v11 = vpack.c.bf16 %v2799_v59, %v2799_v59 }
 0x1c5   : > { %v3134_v35 = vsel %vm3119_vm5, %v3098_v30, %v3133_v17  ;;  %v2670_v53 = vrot.slane %v2656_v3, %v4947_v46  ;;  %v2671_v56 = vcombine.high %v2663_v8, %v2663_v8  ;;  %v3083_v21 = vunpack.c.l.b16 %v3584_v25 }
 0x1c6   : > { %v3144_v60 = vpack.c.b16 %v3134_v35, %v3134_v35  ;;  %v3587_v10 = vpack.c.bf16 %v2806_v9, %v2806_v9  ;;  %v2891_v19 = vsel %vm2722_vm10, %v2663_v8, -inf  ;;  %v3084_v29 = vunpack.c.l.b16 %v3585_v37 }
 0x1c7   : > { %v2672_v32 = vcombine.high %v2670_v53, %v2670_v53  ;;  %v2898_v1 = vsel %vm2722_vm10, %v2671_v56, -inf  ;;  %v2905_v48 = vsel %vm2722_vm10, %v2670_v53, -inf  ;;  %v3085_v41 = vunpack.c.l.b16 %v3586_v11 }
 0x1c8   : > { %3152 = vst [vmem:[%s5048_s9 + $0x8] sm:$0xf] %v3144_v60  ;;  %v2892_v62 = vrot.slane %v2891_v19, 4  ;;  %v2899_v54 = vrot.slane %v2898_v1, 4  ;;  %v5079_v42 = vunpack.c.l.b16 %v3587_v10  ;;  %v2906_v43 = vrot.slane %v2905_v48, 4 }
 0x1c9   : > { %v2912_v24 = vsel %vm2722_vm10, %v2672_v32, -inf  ;;  %v4062_v49 = vadd.f32 %v4962_v51, %v4939_v52  ;;  %v4077_v13 = vadd.f32 %v4953_v61, %v4991_v44  ;;  %v4063_v4 = vadd.f32 %v4966_v7, %v4941_v57 }
 0x1ca   : > { %v2893_v55 = vmax.f32 %v2891_v19, %v2892_v62  ;;  %v2900_v5 = vmax.f32 %v2898_v1, %v2899_v54  ;;  %v2913_v14 = vrot.slane %v2912_v24, 4  ;;  %v2907_v15 = vmax.f32 %v2905_v48, %v2906_v43 }
 0x1cb   : > { %vm2497_vm11 = vcmp.ge.f32.partialorder %v4062_v49, 0.0  ;;  %v2513_v16 = vmul.f32 0.1, %v4062_v49  ;;  %vm2505_vm12 = vcmp.ge.f32.partialorder %v4077_v13, 0.0  ;;  %v2521_v20 = vmul.f32 0.1, %v4077_v13 }
 0x1cc   : > { %v2894_v50 = vrot.slane %v2893_v55, 2  ;;  %v2901_v58 = vrot.slane %v2900_v5, 2  ;;  %v2914_v0 = vmax.f32 %v2912_v24, %v2913_v14  ;;  %v2908_v6 = vrot.slane %v2907_v15, 2 }
 0x1cd   : > { %v2529_v18 = vsel %vm2497_vm11, %v4062_v49, %v2513_v16  ;;  %vm2495_vm14 = vcmp.ge.f32.partialorder %v4063_v4, 0.0  ;;  %v2511_v28 = vmul.f32 0.1, %v4063_v4  ;;  %v3121_v61 = vsel %vm3107_vm13, %v3084_v29, %v3083_v21 }
 0x1ce   : > { %v2895_v52 = vmax.f32 %v2893_v55, %v2894_v50  ;;  %v2902_v51 = vmax.f32 %v2900_v5, %v2901_v58  ;;  %v2915_v22 = vrot.slane %v2914_v0, 2  ;;  %v2909_v44 = vmax.f32 %v2907_v15, %v2908_v6 }
 0x1cf   : > { %v2537_v31 = vsel %vm2505_vm12, %v4077_v13, %v2521_v20  ;;  %v4079_v36 = vadd.f32 %v4955_v12, %v4994_v27  ;;  %v2527_v33 = vsel %vm2495_vm14, %v4063_v4, %v2511_v28  ;;  %v3122_v26 = vsel %vm3109_vm15, %v3085_v41, %v3121_v61 }
 0x1d0   : > { %v2896_v57 = vrot.slane %v2895_v52, 1  ;;  %v2903_v7 = vrot.slane %v2902_v51, 1  ;;  %v2916_v23 = vmax.f32 %v2914_v0, %v2915_v22  ;;  %v2910_v39 = vrot.slane %v2909_v44, 1 }
 0x1d1   : > { %v2541_v34 = vmax.f32 %v2527_v33, %v2529_v18  ;;  %vm2503_vm2 = vcmp.ge.f32.partialorder %v4079_v36, 0.0  ;;  %v2519_v40 = vmul.f32 0.1, %v4079_v36  ;;  %v3123_v13 = vsel %vm3111_vm0, %v5079_v42, %v3122_v26 }
 0x1d2   : > { %v2897_v45 = vmax.f32 %v2895_v52, %v2896_v57  ;;  %v2904_v38 = vmax.f32 %v2902_v51, %v2903_v7  ;;  %v2917_v47 = vrot.slane %v2916_v23, 1  ;;  %v2911_v59 = vmax.f32 %v2909_v44, %v2910_v39 }
 0x1d3   : > { %v2605_v63 = vcombine.high %v2541_v34, %v2541_v34  ;;  %v2612_v25 = vrot.slane %v2541_v34, %v4947_v46  ;;  %v2535_v30 = vsel %vm2503_vm2, %v4079_v36, %v2519_v40 }
 0x1d4   : > { %v2918_v2 = vmax.f32 %v2916_v23, %v2917_v47  ;;  %v3600_v12 = vpack.c.bf16 %v2897_v45, %v2897_v45  ;;  %v3601_v27 = vpack.c.bf16 %v2904_v38, %v2904_v38  ;;  %v2545_v3 = vmax.f32 %v2535_v30, %v2537_v31 }
 0x1d5   : > { %v3602_v8 = vpack.c.bf16 %v2911_v59, %v2911_v59  ;;  %v2619_v17 = vrot.slane %v2605_v63, %v4947_v46  ;;  %v2620_v9 = vcombine.high %v2612_v25, %v2612_v25  ;;  %v2807_v37 = vsel %vm2722_vm10, %v2612_v25, -inf }
 0x1d6   : > { %v3603_v11 = vpack.c.bf16 %v2918_v2, %v2918_v2  ;;  %v3099_v35 = vunpack.c.l.b16 %v3600_v12  ;;  %v3100_v53 = vunpack.c.l.b16 %v3601_v27  ;;  %v2808_v56 = vrot.slane %v2807_v37, 4 }
 0x1d7   : > { %v3101_v60 = vunpack.c.l.b16 %v3602_v8  ;;  %v2621_v10 = vcombine.high %v2619_v17, %v2619_v17  ;;  %v2814_v21 = vsel %vm2722_vm10, %v2620_v9, -inf  ;;  %v2821_v32 = vsel %vm2722_vm10, %v2619_v17, -inf }
 0x1d8   : > { %v3102_v19 = vunpack.c.l.b16 %v3603_v11  ;;  %v3135_v1 = vsel %vm3107_vm13, %v3100_v53, %v3099_v35  ;;  %v2809_v48 = vmax.f32 %v2807_v37, %v2808_v56  ;;  %v2815_v29 = vrot.slane %v2814_v21, 4 }
 0x1d9   : > { %v3136_v41 = vsel %vm3109_vm15, %v3101_v60, %v3135_v1  ;;  %v2822_v62 = vrot.slane %v2821_v32, 4  ;;  %v2828_v54 = vsel %vm2722_vm10, %v2621_v10, -inf  ;;  %v2673_v43 = vcombine.high %v2545_v3, %v2545_v3 }
 0x1da   : > { %v2810_v24 = vrot.slane %v2809_v48, 2  ;;  %v2816_v49 = vmax.f32 %v2814_v21, %v2815_v29  ;;  %v2829_v55 = vrot.slane %v2828_v54, 4  ;;  %v2680_v5 = vrot.slane %v2545_v3, %v4947_v46 }
 0x1db   : > { %v2823_v14 = vmax.f32 %v2821_v32, %v2822_v62  ;;  %v2687_v15 = vrot.slane %v2673_v43, %v4947_v46  ;;  %v5105_v16 = vsel %vm3111_vm0, %v3102_v19, %v3136_v41 }
 0x1dc   : > { %v2811_v4 = vmax.f32 %v2809_v48, %v2810_v24  ;;  %v2817_v50 = vrot.slane %v2816_v49, 2  ;;  %v2830_v58 = vmax.f32 %v2828_v54, %v2829_v55  ;;  %v2688_v0 = vcombine.high %v2680_v5, %v2680_v5 }
 0x1dd   : > { %v2824_v6 = vrot.slane %v2823_v14, 2  ;;  %v2689_v18 = vcombine.high %v2687_v15, %v2687_v15  ;;  %v2919_v20 = vsel %vm2722_vm10, %v2680_v5, -inf  ;;  %v2933_v52 = vsel %vm2722_vm10, %v2687_v15, -inf }
 0x1de   : > { %v2812_v51 = vrot.slane %v2811_v4, 1  ;;  %v2818_v22 = vmax.f32 %v2816_v49, %v2817_v50  ;;  %v2831_v28 = vrot.slane %v2830_v58, 2  ;;  %v2920_v61 = vrot.slane %v2919_v20, 4 }
 0x1df   : > { %v2825_v42 = vmax.f32 %v2823_v14, %v2824_v6  ;;  %v2926_v46 = vsel %vm2722_vm10, %v2688_v0, -inf  ;;  %v2934_v44 = vrot.slane %v2933_v52, 4  ;;  %v2940_v31 = vsel %vm2722_vm10, %v2689_v18, -inf }
 0x1e0   : > { %v2813_v36 = vmax.f32 %v2811_v4, %v2812_v51  ;;  %v2819_v57 = vrot.slane %v2818_v22, 1  ;;  %v2832_v7 = vmax.f32 %v2830_v58, %v2831_v28  ;;  %v2921_v23 = vmax.f32 %v2919_v20, %v2920_v61 }
 0x1e1   : > { %v2826_v33 = vrot.slane %v2825_v42, 1  ;;  %v2927_v39 = vrot.slane %v2926_v46, 4  ;;  %v2935_v34 = vmax.f32 %v2933_v52, %v2934_v44  ;;  %v2941_v40 = vrot.slane %v2940_v31, 4 }
 0x1e2   : > { %v2820_v26 = vmax.f32 %v2818_v22, %v2819_v57  ;;  %v2833_v45 = vrot.slane %v2832_v7, 1  ;;  %v3588_v38 = vpack.c.bf16 %v2813_v36, %v2813_v36  ;;  %v2922_v47 = vrot.slane %v2921_v23, 2 }
 0x1e3   : > { %v2827_v59 = vmax.f32 %v2825_v42, %v2826_v33  ;;  %v2928_v63 = vmax.f32 %v2926_v46, %v2927_v39  ;;  %v2936_v25 = vrot.slane %v2935_v34, 2  ;;  %v2942_v30 = vmax.f32 %v2940_v31, %v2941_v40 }
 0x1e4   : > { %v2834_v2 = vmax.f32 %v2832_v7, %v2833_v45  ;;  %v3589_v12 = vpack.c.bf16 %v2820_v26, %v2820_v26  ;;  %v3087_v27 = vunpack.c.l.b16 %v3588_v38  ;;  %v2923_v3 = vmax.f32 %v2921_v23, %v2922_v47 }
 0x1e5   : > { %v3590_v8 = vpack.c.bf16 %v2827_v59, %v2827_v59  ;;  %v2929_v17 = vrot.slane %v2928_v63, 2  ;;  %v2937_v9 = vmax.f32 %v2935_v34, %v2936_v25  ;;  %v2943_v37 = vrot.slane %v2942_v30, 2 }
 0x1e6   : > { %v3591_v11 = vpack.c.bf16 %v2834_v2, %v2834_v2  ;;  %v3088_v35 = vunpack.c.l.b16 %v3589_v12  ;;  %v3124_v53 = vsel %vm3113_vm1, %v3087_v27, %v3123_v13  ;;  %v2924_v56 = vrot.slane %v2923_v3, 1 }
 0x1e7   : > { %v3089_v60 = vunpack.c.l.b16 %v3590_v8  ;;  %v2930_v10 = vmax.f32 %v2928_v63, %v2929_v17  ;;  %v2938_v21 = vrot.slane %v2937_v9, 1  ;;  %v2944_v32 = vmax.f32 %v2942_v30, %v2943_v37 }
 0x1e8   : > { %v3090_v19 = vunpack.c.l.b16 %v3591_v11  ;;  %v3125_v1 = vsel %vm3115_vm3, %v3088_v35, %v3124_v53  ;;  %v2925_v48 = vmax.f32 %v2923_v3, %v2924_v56 }
 0x1e9   : > { %v3126_v29 = vsel %vm3117_vm4, %v3089_v60, %v3125_v1  ;;  %v2931_v41 = vrot.slane %v2930_v10, 1  ;;  %v2939_v62 = vmax.f32 %v2937_v9, %v2938_v21  ;;  %v2945_v54 = vrot.slane %v2944_v32, 1 }
 0x1ea   : > { %v3127_v43 = vsel %vm3119_vm5, %v3090_v19, %v3126_v29  ;;  %v3604_v24 = vpack.c.bf16 %v2925_v48, %v2925_v48 }
 0x1eb   : > { %v3143_v49 = vpack.c.b16 %v3127_v43, %v3127_v43  ;;  %v2932_v55 = vmax.f32 %v2930_v10, %v2931_v41  ;;  %v2946_v5 = vmax.f32 %v2944_v32, %v2945_v54  ;;  %v3606_v14 = vpack.c.bf16 %v2939_v62, %v2939_v62 }
 0x1ec   : > { %v3103_v13 = vunpack.c.l.b16 %v3604_v24 }
 0x1ed   : > { %3151 = vst [vmem:[%s5048_s9 + $0x4] sm:$0xf] %v3143_v49  ;;  %v3605_v15 = vpack.c.bf16 %v2932_v55, %v2932_v55  ;;  %v3607_v4 = vpack.c.bf16 %v2946_v5, %v2946_v5  ;;  %v3105_v0 = vunpack.c.l.b16 %v3606_v14 }
 0x1ee   : > { %v3138_v50 = vsel %vm3113_vm1, %v3103_v13, %v5105_v16 }
 0x1ef   : > { %v3104_v58 = vunpack.c.l.b16 %v3605_v15  ;;  %v3106_v6 = vunpack.c.l.b16 %v3607_v4 }
 0x1f1   : > { %v3139_v18 = vsel %vm3115_vm3, %v3104_v58, %v3138_v50 }
 0x1f2   : > { %v3140_v20 = vsel %vm3117_vm4, %v3105_v0, %v3139_v18 }
 0x1f3   : > { %v3141_v52 = vsel %vm3119_vm5, %v3106_v6, %v3140_v20 }
 0x1f4   : > { %v3145_v51 = vpack.c.b16 %v3141_v52, %v3141_v52 }
 0x1f6   : > { %3153 = vst [vmem:[%s5048_s9 + $0xc] sm:$0xf] %v3145_v51 }
 0x1f7 PF: > { %s14_s19 = sadd.s32 1, %s4343_s19   ;;  %s5148_s15 = smov %s4335_s17 }
 0x1f8   : > { %p11_p1 = scmp.ge.s32.totalorder %s14_s19, 6   ;;  %s5149_s16 = smov %s4339_s18 }
 0x1f9   : > { %s5150_s17 = smov %s5153_s20  ;;  %s5151_s18 = smov %s5157_s21 }
 0x1fa   :  { %13 = sbr.rel (!%p11_p1) target bundleno = 3 (0x3), region = 80 }

</bundles_post_ra>
